<compile_context>
chip_gen: v6e
topology: v6e:2x2x1
jax: 0.10.0
libtpu: 0.0.40
codegen_flags: <defaults>
</compile_context>

<pallas_src>
import functools

import jax
import jax.numpy as jnp
from jax.experimental import pallas as pl
from jax.experimental.pallas import tpu as pltpu


def _round_up(x, m):
    return ((x + m - 1) // m) * m


def _pick_block_rows(b_rows, c, vp, cp_cols, co8, itemsize,
                     budget_bytes=24 * 1024 * 1024, cap=512):
    """Largest divisor of b_rows that is <= cap and fits a rough VMEM budget."""
    def lane(d):
        return _round_up(max(d, 1), 128)

    def est(tb):
        x_blk = 2 * tb * vp * lane(c) * itemsize           # double-buffered input block
        o_blk = 2 * tb * co8 * lane(vp) * itemsize         # double-buffered output block
        z = tb * vp * lane(cp_cols) * 4                    # f32 channel-mix result
        zt = tb * cp_cols * lane(vp) * max(itemsize, 4)    # transposed copy
        acc = tb * co8 * lane(vp) * 4                      # f32 accumulator
        return x_blk + o_blk + z + zt + acc

    best = 1
    for t in range(1, min(cap, b_rows) + 1):
        if b_rows % t == 0 and est(t) <= budget_bytes:
            best = t
    return best


# ---------------------------------------------------------------------------
# Fused kernel: all channel mixes (one wide matmul) + all graph diffusions
# (independent matmuls vs. precomputed adjacency powers) + bias, in VMEM.
# ---------------------------------------------------------------------------
def _gcn_fused_kernel(x_ref, ap_ref, wt_ref, b_ref, o_ref, *, n_diff):
    # x_ref : (tb, Vp, C)            rows = a tile of the flattened (n, l) batch
    # ap_ref: (max(P,1), Vp, Vp)     stacked powers [A1, A1^2, ..., AS^order]
    # wt_ref: (C, (P+1)*Co8)         W^T, piece-major chunks, zero-padded to Co8
    # b_ref : (Co8, 1)               bias (f32, zero-padded)
    # o_ref : (tb, Co8, Vp)
    tb, vp, c = x_ref.shape
    co8 = o_ref.shape[1]

    x = x_ref[...]                                            # (tb, Vp, C)
    # every piece's channel mix at once: (tb*Vp, C) @ (C, (P+1)*Co8)
    z = jnp.dot(x.reshape(tb * vp, c), wt_ref[...],
                preferred_element_type=jnp.float32)
    z = z.astype(x.dtype)
    zt = jnp.transpose(z.reshape(tb, vp, (n_diff + 1) * co8), (0, 2, 1))
    # zt: (tb, (P+1)*Co8, Vp) -- lane-dense, sublane-sliced per piece below.

    # piece 0: identity (no diffusion matmul)
    acc = zt[:, 0:co8, :].reshape(tb * co8, vp).astype(jnp.float32)
    # diffusion pieces: acc += (W_p @ X) @ A_s^k  (independent MXU matmuls)
    for p in range(n_diff):
        zp = zt[:, (p + 1) * co8:(p + 2) * co8, :].reshape(tb * co8, vp)
        acc = acc + jnp.dot(zp, ap_ref[p], preferred_element_type=jnp.float32)

    acc = acc.reshape(tb, co8, vp) + b_ref[...]               # f32 bias epilogue
    o_ref[...] = acc.astype(o_ref.dtype)


# ---------------------------------------------------------------------------
# gcn forward
# ---------------------------------------------------------------------------
def gcn_forward(x, supports, w, b, order=2, dropout=0.3):
    # x: (N, C, V, L); supports: list of (V, V); w: (C_out, (order*S+1)*C); b: (C_out,)
    n, c, v, l = x.shape
    c_out = w.shape[0]
    n_diff = len(supports) * order
    assert w.shape[1] == (n_diff + 1) * c, (w.shape, n_diff, c)

    dt = x.dtype
    vp = _round_up(v, 128)          # lane-dense node dim
    co8 = _round_up(c_out, 8)       # sublane-aligned output channels
    cp_cols = (n_diff + 1) * co8
    b_rows = n * l

    # ---- layout plumbing (plain JAX: one transpose in, one transpose out) ----
    # (N, C, V, L) -> (N, L, V, C) -> pad V -> (N*L, Vp, C)
    x3 = jnp.transpose(x, (0, 3, 2, 1))
    x3 = jnp.pad(x3, ((0, 0), (0, 0), (0, vp - v), (0, 0)))
    x3 = x3.reshape(b_rows, vp, c)

    # adjacency powers in torch concat order: per support s -> A_s^1 .. A_s^order
    pows = []
    for a in supports:
        a32 = a.astype(jnp.float32)
        ak = a32
        pows.append(ak)
        for _ in range(order - 1):
            ak = jnp.dot(ak, a32)
            pows.append(ak)
    if pows:
        ap = jnp.stack([jnp.pad(p, ((0, vp - v), (0, vp - v))) for p in pows])
    else:
        ap = jnp.zeros((1, vp, vp), jnp.float32)
    ap = ap.astype(dt)

    # W^T laid out piece-major, each piece's C_out zero-padded to Co8
    wt = jnp.transpose(w).reshape(n_diff + 1, c, c_out)
    wt = jnp.pad(wt, ((0, 0), (0, 0), (0, co8 - c_out)))
    wt = jnp.transpose(wt, (1, 0, 2)).reshape(c, cp_cols).astype(dt)

    bias = jnp.pad(b.astype(jnp.float32), (0, co8 - c_out)).reshape(co8, 1)

    # ---- single fused Pallas kernel over the flattened (n, l) batch ----
    tb = _pick_block_rows(b_rows, c, vp, cp_cols, co8, jnp.dtype(dt).itemsize)
    kern = functools.partial(_gcn_fused_kernel, n_diff=n_diff)
    out3 = pl.pallas_call(
        kern,
        out_shape=jax.ShapeDtypeStruct((b_rows, co8, vp), dt),
        grid=(b_rows // tb,),
        in_specs=[
            pl.BlockSpec((tb, vp, c), lambda i: (i, 0, 0)),
            pl.BlockSpec((ap.shape[0], vp, vp), lambda i: (0, 0, 0)),
            pl.BlockSpec((c, cp_cols), lambda i: (0, 0)),
            pl.BlockSpec((co8, 1), lambda i: (0, 0)),
        ],
        out_specs=pl.BlockSpec((tb, co8, vp), lambda i: (i, 0, 0)),
        compiler_params=pltpu.CompilerParams(
            dimension_semantics=("parallel",),
            vmem_limit_bytes=48 * 1024 * 1024,
        ),
    )(x3, ap, wt, bias)

    # (N*L, Co8, Vp) -> strip padding -> (N, C_out, V, L)
    out = out3.reshape(n, l, co8, vp)[:, :, :c_out, :v]
    out = jnp.transpose(out, (0, 2, 3, 1))
    # F.dropout is identity at inference.
    # TODO(synk): stochastic dropout (pltpu.prng_random_bits mask) for training mode.
    return out


# pure-JAX reference for verification
def gcn_reference(x, supports, w, b, order=2):
    out = [x]
    for a in supports:
        x1 = jnp.einsum('ncvl,vw->ncwl', x, a)
        out.append(x1)
        for _ in range(2, order + 1):
            x2 = jnp.einsum('ncvl,vw->ncwl', x1, a)
            out.append(x2)
            x1 = x2
    h = jnp.concatenate(out, axis=1)
    return jnp.einsum('oi,nivl->novl', w, h) + b[None, :, None, None]


if __name__ == "__main__":
    key = jax.random.PRNGKey(0)
    N, C, V, L = 2, 4, 8, 16
    support_len, order = 3, 2
    C_out = 8
    C_total = (order * support_len + 1) * C       # 28

    ks = jax.random.split(key, 3 + support_len)
    x = jax.random.normal(ks[0], (N, C, V, L), dtype=jnp.float32)
    supports = [
        jax.random.normal(ks[3 + s], (V, V), dtype=jnp.float32) * 0.3
        for s in range(support_len)
    ]
    # deterministic synthetic Conv2d(1x1) params: weight (C_out, C_in, 1, 1) -> (C_out, C_in)
    w = jax.random.normal(ks[1], (C_out, C_total), dtype=jnp.float32) * 0.1
    b = jax.random.normal(ks[2], (C_out,), dtype=jnp.float32) * 0.1

    fwd = jax.jit(lambda x, sup, w, b: gcn_forward(x, sup, w, b, order=order))
    out = jax.block_until_ready(fwd(x, supports, w, b))

    ref = gcn_reference(x, supports, w, b, order=order)
    assert out.shape == (N, C_out, V, L), out.shape
    err = float(jnp.max(jnp.abs(out - ref)))
    assert jnp.allclose(out, ref, atol=2e-4, rtol=2e-4), err
    print("KERNEL_OK")
</pallas_src>

<mosaic_0001>
module attributes {stable_mosaic.version = 11 : i64} {
  func.func @_gcn_fused_kernel(%arg0: i32, %arg1: memref<32x128x4xf32, #tpu.memory_space<vmem>>, %arg2: memref<6x128x128xf32, #tpu.memory_space<vmem>>, %arg3: memref<4x56xf32, #tpu.memory_space<vmem>>, %arg4: memref<8x1xf32, #tpu.memory_space<vmem>>, %arg5: memref<32x8x128xf32, #tpu.memory_space<vmem>>) attributes {dimension_semantics = [#tpu.dimension_semantics<parallel>], iteration_bounds = array<i64: 1>, scalar_prefetch = 0 : i64, scratch_operands = 0 : i64, tpu.core_type = #tpu.core_type<tc>, window_params = [{transform_indices = @transform_0, window_bounds = array<i64: 32, 128, 4>}, {pipeline_mode = #tpu.pipeline_mode<synchronous>, transform_indices = @transform_1, window_bounds = array<i64: 6, 128, 128>}, {pipeline_mode = #tpu.pipeline_mode<synchronous>, transform_indices = @transform_2, window_bounds = array<i64: 4, 56>}, {pipeline_mode = #tpu.pipeline_mode<synchronous>, transform_indices = @transform_3, window_bounds = array<i64: 8, 1>}, {transform_indices = @transform_4, window_bounds = array<i64: 32, 8, 128>}]} {
    %c0 = arith.constant 0 : index
    %c0_0 = arith.constant 0 : index
    %c0_1 = arith.constant 0 : index
    %0 = vector.load %arg1[%c0, %c0_0, %c0_1] : memref<32x128x4xf32, #tpu.memory_space<vmem>>, vector<32x128x4xf32>
    %1 = vector.shape_cast %0 : vector<32x128x4xf32> to vector<4096x4xf32>
    %c0_2 = arith.constant 0 : index
    %c0_3 = arith.constant 0 : index
    %2 = vector.load %arg3[%c0_2, %c0_3] : memref<4x56xf32, #tpu.memory_space<vmem>>, vector<4x56xf32>
    %cst = arith.constant dense<0.000000e+00> : vector<4096x56xf32>
    %3 = tpu.matmul %1, %2, %cst {dimension_numbers = #tpu.dot_dimension_numbers<[1], [0], [0], [1], [0, 0, 1, 1], [], []>} : vector<4096x4xf32>, vector<4x56xf32>, vector<4096x56xf32> -> vector<4096x56xf32>
    %4 = vector.shape_cast %3 : vector<4096x56xf32> to vector<32x128x56xf32>
    %5 = tpu.transpose %4, [0, 2, 1] : vector<32x128x56xf32> -> vector<32x56x128xf32>
    %6 = vector.extract_strided_slice %5 {offsets = [0, 0, 0], sizes = [32, 8, 128], strides = [1, 1, 1]} : vector<32x56x128xf32> to vector<32x8x128xf32>
    %7 = vector.shape_cast %6 : vector<32x8x128xf32> to vector<256x128xf32>
    %8 = vector.extract_strided_slice %5 {offsets = [0, 8, 0], sizes = [32, 8, 128], strides = [1, 1, 1]} : vector<32x56x128xf32> to vector<32x8x128xf32>
    %9 = vector.shape_cast %8 : vector<32x8x128xf32> to vector<256x128xf32>
    %c0_4 = arith.constant 0 : index
    %c0_5 = arith.constant 0 : index
    %c0_6 = arith.constant 0 : index
    %10 = vector.load %arg2[%c0_4, %c0_5, %c0_6] : memref<6x128x128xf32, #tpu.memory_space<vmem>>, vector<1x128x128xf32>
    %11 = vector.shape_cast %10 : vector<1x128x128xf32> to vector<128x128xf32>
    %cst_7 = arith.constant dense<0.000000e+00> : vector<256x128xf32>
    %12 = tpu.matmul %9, %11, %cst_7 {dimension_numbers = #tpu.dot_dimension_numbers<[1], [0], [0], [1], [0, 0, 1, 1], [], []>} : vector<256x128xf32>, vector<128x128xf32>, vector<256x128xf32> -> vector<256x128xf32>
    %13 = arith.addf %7, %12 : vector<256x128xf32>
    %14 = vector.extract_strided_slice %5 {offsets = [0, 16, 0], sizes = [32, 8, 128], strides = [1, 1, 1]} : vector<32x56x128xf32> to vector<32x8x128xf32>
    %15 = vector.shape_cast %14 : vector<32x8x128xf32> to vector<256x128xf32>
    %c1 = arith.constant 1 : index
    %c0_8 = arith.constant 0 : index
    %c0_9 = arith.constant 0 : index
    %16 = vector.load %arg2[%c1, %c0_8, %c0_9] : memref<6x128x128xf32, #tpu.memory_space<vmem>>, vector<1x128x128xf32>
    %17 = vector.shape_cast %16 : vector<1x128x128xf32> to vector<128x128xf32>
    %cst_10 = arith.constant dense<0.000000e+00> : vector<256x128xf32>
    %18 = tpu.matmul %15, %17, %cst_10 {dimension_numbers = #tpu.dot_dimension_numbers<[1], [0], [0], [1], [0, 0, 1, 1], [], []>} : vector<256x128xf32>, vector<128x128xf32>, vector<256x128xf32> -> vector<256x128xf32>
    %19 = arith.addf %13, %18 : vector<256x128xf32>
    %20 = vector.extract_strided_slice %5 {offsets = [0, 24, 0], sizes = [32, 8, 128], strides = [1, 1, 1]} : vector<32x56x128xf32> to vector<32x8x128xf32>
    %21 = vector.shape_cast %20 : vector<32x8x128xf32> to vector<256x128xf32>
    %c2 = arith.constant 2 : index
    %c0_11 = arith.constant 0 : index
    %c0_12 = arith.constant 0 : index
    %22 = vector.load %arg2[%c2, %c0_11, %c0_12] : memref<6x128x128xf32, #tpu.memory_space<vmem>>, vector<1x128x128xf32>
    %23 = vector.shape_cast %22 : vector<1x128x128xf32> to vector<128x128xf32>
    %cst_13 = arith.constant dense<0.000000e+00> : vector<256x128xf32>
    %24 = tpu.matmul %21, %23, %cst_13 {dimension_numbers = #tpu.dot_dimension_numbers<[1], [0], [0], [1], [0, 0, 1, 1], [], []>} : vector<256x128xf32>, vector<128x128xf32>, vector<256x128xf32> -> vector<256x128xf32>
    %25 = arith.addf %19, %24 : vector<256x128xf32>
    %26 = vector.extract_strided_slice %5 {offsets = [0, 32, 0], sizes = [32, 8, 128], strides = [1, 1, 1]} : vector<32x56x128xf32> to vector<32x8x128xf32>
    %27 = vector.shape_cast %26 : vector<32x8x128xf32> to vector<256x128xf32>
    %c3 = arith.constant 3 : index
    %c0_14 = arith.constant 0 : index
    %c0_15 = arith.constant 0 : index
    %28 = vector.load %arg2[%c3, %c0_14, %c0_15] : memref<6x128x128xf32, #tpu.memory_space<vmem>>, vector<1x128x128xf32>
    %29 = vector.shape_cast %28 : vector<1x128x128xf32> to vector<128x128xf32>
    %cst_16 = arith.constant dense<0.000000e+00> : vector<256x128xf32>
    %30 = tpu.matmul %27, %29, %cst_16 {dimension_numbers = #tpu.dot_dimension_numbers<[1], [0], [0], [1], [0, 0, 1, 1], [], []>} : vector<256x128xf32>, vector<128x128xf32>, vector<256x128xf32> -> vector<256x128xf32>
    %31 = arith.addf %25, %30 : vector<256x128xf32>
    %32 = vector.extract_strided_slice %5 {offsets = [0, 40, 0], sizes = [32, 8, 128], strides = [1, 1, 1]} : vector<32x56x128xf32> to vector<32x8x128xf32>
    %33 = vector.shape_cast %32 : vector<32x8x128xf32> to vector<256x128xf32>
    %c4 = arith.constant 4 : index
    %c0_17 = arith.constant 0 : index
    %c0_18 = arith.constant 0 : index
    %34 = vector.load %arg2[%c4, %c0_17, %c0_18] : memref<6x128x128xf32, #tpu.memory_space<vmem>>, vector<1x128x128xf32>
    %35 = vector.shape_cast %34 : vector<1x128x128xf32> to vector<128x128xf32>
    %cst_19 = arith.constant dense<0.000000e+00> : vector<256x128xf32>
    %36 = tpu.matmul %33, %35, %cst_19 {dimension_numbers = #tpu.dot_dimension_numbers<[1], [0], [0], [1], [0, 0, 1, 1], [], []>} : vector<256x128xf32>, vector<128x128xf32>, vector<256x128xf32> -> vector<256x128xf32>
    %37 = arith.addf %31, %36 : vector<256x128xf32>
    %38 = vector.extract_strided_slice %5 {offsets = [0, 48, 0], sizes = [32, 8, 128], strides = [1, 1, 1]} : vector<32x56x128xf32> to vector<32x8x128xf32>
    %39 = vector.shape_cast %38 : vector<32x8x128xf32> to vector<256x128xf32>
    %c5 = arith.constant 5 : index
    %c0_20 = arith.constant 0 : index
    %c0_21 = arith.constant 0 : index
    %40 = vector.load %arg2[%c5, %c0_20, %c0_21] : memref<6x128x128xf32, #tpu.memory_space<vmem>>, vector<1x128x128xf32>
    %41 = vector.shape_cast %40 : vector<1x128x128xf32> to vector<128x128xf32>
    %cst_22 = arith.constant dense<0.000000e+00> : vector<256x128xf32>
    %42 = tpu.matmul %39, %41, %cst_22 {dimension_numbers = #tpu.dot_dimension_numbers<[1], [0], [0], [1], [0, 0, 1, 1], [], []>} : vector<256x128xf32>, vector<128x128xf32>, vector<256x128xf32> -> vector<256x128xf32>
    %43 = arith.addf %37, %42 : vector<256x128xf32>
    %44 = vector.shape_cast %43 : vector<256x128xf32> to vector<32x8x128xf32>
    %c0_23 = arith.constant 0 : index
    %c0_24 = arith.constant 0 : index
    %45 = vector.load %arg4[%c0_23, %c0_24] : memref<8x1xf32, #tpu.memory_space<vmem>>, vector<8x1xf32>
    %46 = vector.shape_cast %45 : vector<8x1xf32> to vector<1x8x1xf32>
    %47 = vector.broadcast %46 : vector<1x8x1xf32> to vector<32x8x128xf32>
    %48 = arith.addf %44, %47 : vector<32x8x128xf32>
    %c0_25 = arith.constant 0 : index
    %c0_26 = arith.constant 0 : index
    %c0_27 = arith.constant 0 : index
    %49 = vector.load %arg5[%c0_25, %c0_26, %c0_27] : memref<32x8x128xf32, #tpu.memory_space<vmem>>, vector<32x8x128xf32>
    tpu.vector_store %arg5[%c0_25, %c0_26, %c0_27], %48 {strides = array<i32>} : memref<32x8x128xf32, #tpu.memory_space<vmem>>, vector<32x8x128xf32>,
    return
  }
  func.func @transform_0(%arg0: i32) -> (i32, i32, i32) {
    %c0_i32 = arith.constant 0 : i32
    %c0_i32_0 = arith.constant 0 : i32
    %c0_i32_1 = arith.constant 0 : i32
    return %arg0, %c0_i32, %c0_i32_0 : i32, i32, i32
  }
  func.func @transform_1(%arg0: i32) -> (i32, i32, i32) {
    %c0_i32 = arith.constant 0 : i32
    %c0_i32_0 = arith.constant 0 : i32
    %c0_i32_1 = arith.constant 0 : i32
    %c0_i32_2 = arith.constant 0 : i32
    return %c0_i32, %c0_i32_0, %c0_i32_1 : i32, i32, i32
  }
  func.func @transform_2(%arg0: i32) -> (i32, i32) {
    %c0_i32 = arith.constant 0 : i32
    %c0_i32_0 = arith.constant 0 : i32
    %c0_i32_1 = arith.constant 0 : i32
    return %c0_i32, %c0_i32_0 : i32, i32
  }
  func.func @transform_3(%arg0: i32) -> (i32, i32) {
    %c0_i32 = arith.constant 0 : i32
    %c0_i32_0 = arith.constant 0 : i32
    %c0_i32_1 = arith.constant 0 : i32
    return %c0_i32, %c0_i32_0 : i32, i32
  }
  func.func @transform_4(%arg0: i32) -> (i32, i32, i32) {
    %c0_i32 = arith.constant 0 : i32
    %c0_i32_0 = arith.constant 0 : i32
    %c0_i32_1 = arith.constant 0 : i32
    return %arg0, %c0_i32, %c0_i32_0 : i32, i32, i32
  }
}

</mosaic_0001>

<bundles_post_ra>
// kernel: _lambda_.1
= control target key start
LH: loop header
LB: loop body
LE: loop exit
PB: predicated region body
PF: predicated region fallthrough
CT: control target
= control target key end

     0   :  { %vm2067_vm0 = vcmask 1043456   ;;  %vm530_vm1 = vcmask 31744   ;;  %s14819_s2 = inlined_call_operand.vmem [shape: f32[4,56], index: 2, kind: input, shape index: {}]   ;;  %s14820_s0 = inlined_call_operand.vmem [shape: f32[32,128,4], index: 0, kind: input, shape index: {}]   ;;  %s14821_s1 = inlined_call_operand.vmem [shape: f32[6,128,128], index: 1, kind: input, shape index: {}]   ;;  %s14822_s3 = inlined_call_operand.vmem [shape: f32[8,1], index: 3, kind: input, shape index: {}]   ;;  %s14823_s4 = inlined_call_operand.vmem [shape: f32[32,8,128], index: 4, kind: output, shape index: {}]  }
   0x1   :  { %v529_v0 = vld [vmem:[%s14819_s2] sm:$0xf]  ;;  %v18_v2 = vld [vmem:[%s14820_s0 + $0x8] sm:$0xff]  ;;  %v19_v3 = vld [vmem:[%s14820_s0 + $0x10] sm:$0xff] }
   0x2   :  { %v17_v1 = vld [vmem:[%s14820_s0] sm:$0xff]  ;;  %8831 = vmatprep.subr.msk.mxu0 %vm2067_vm0, %v529_v0  ;;  %10081 = vmatprep.subr.msk.mxu1 %vm2067_vm0, %v529_v0  ;;  %v20_v4 = vld [vmem:[%s14820_s0 + $0x18] sm:$0xff]  ;;  %v22_v6 = vld [vmem:[%s14820_s0 + $0x28] sm:$0xff] }
   0x3   :  { %8833 = vmatprep.mubr.msk.f32.mxu0 %vm530_vm1, %v17_v1  ;;  %8832 = vmatpush3.msk.msra.mxu0 %vm2067_vm0, %v529_v0  ;;  %v21_v5 = vld [vmem:[%s14820_s0 + $0x20] sm:$0xff]  ;;  %v23_v8 = vld [vmem:[%s14820_s0 + $0x30] sm:$0xff]  ;;  %v370_v9 = vld [vmem:[%s14820_s0 + $0xb08] sm:$0xff] }
   0x4   :  { %8834 = vmatmul.mubr.msk.f32.vlgmr.msra.gmra.mxu0 %vm530_vm1, %v18_v2  ;;  %10082 = vmatpush3.msk.msra.mxu1 %vm2067_vm0, %v529_v0  ;;  %v369_v7 = vld [vmem:[%s14820_s0 + $0xb00] sm:$0xff]  ;;  %v371_v10 = vld [vmem:[%s14820_s0 + $0xb10] sm:$0xff]  ;;  %v372_v11 = vld [vmem:[%s14820_s0 + $0xb18] sm:$0xff] }
   0x5   :  { %8836 = vmatprep.mubr.msk.f32.mxu0 %vm530_vm1, %v19_v3  ;;  %9361 = vmatprep.mubr.msk.f32.mxu1 %vm530_vm1, %v369_v7  ;;  %v24_v12 = vld [vmem:[%s14820_s0 + $0x38] sm:$0xff]  ;;  %v373_v13 = vld [vmem:[%s14820_s0 + $0xb20] sm:$0xff]  ;;  %v374_v15 = vld [vmem:[%s14820_s0 + $0xb28] sm:$0xff] }
   0x6   :  { %9362 = vmatmul.mubr.msk.f32.vlgmr.msra.gmra.mxu1 %vm530_vm1, %v370_v9  ;;  %v25_v14 = vld [vmem:[%s14820_s0 + $0x40] sm:$0xff]  ;;  %v26_v16 = vld [vmem:[%s14820_s0 + $0x48] sm:$0xff]  ;;  %v375_v17 = vld [vmem:[%s14820_s0 + $0xb30] sm:$0xff] }
   0x7   :  { %9364 = vmatprep.mubr.msk.f32.mxu1 %vm530_vm1, %v371_v10  ;;  %v27_v18 = vld [vmem:[%s14820_s0 + $0x50] sm:$0xff]  ;;  %v376_v19 = vld [vmem:[%s14820_s0 + $0xb38] sm:$0xff]  ;;  %v377_v21 = vld [vmem:[%s14820_s0 + $0xb40] sm:$0xff] }
   0x8   :  { %8837 = vmatmul.mubr.msk.f32.gmra.mxu0 %vm530_vm1, %v20_v4  ;;  %v28_v20 = vld [vmem:[%s14820_s0 + $0x58] sm:$0xff]  ;;  %v29_v22 = vld [vmem:[%s14820_s0 + $0x60] sm:$0xff]  ;;  %v378_v23 = vld [vmem:[%s14820_s0 + $0xb48] sm:$0xff] }
   0x9   :  { %8839 = vmatprep.mubr.msk.f32.mxu0 %vm530_vm1, %v21_v5  ;;  %v30_v24 = vld [vmem:[%s14820_s0 + $0x68] sm:$0xff]  ;;  %v379_v25 = vld [vmem:[%s14820_s0 + $0xb50] sm:$0xff]  ;;  %v380_v27 = vld [vmem:[%s14820_s0 + $0xb58] sm:$0xff] }
   0xa   :  { %9365 = vmatmul.mubr.msk.f32.gmra.mxu1 %vm530_vm1, %v372_v11  ;;  %v31_v26 = vld [vmem:[%s14820_s0 + $0x70] sm:$0xff]  ;;  %v32_v28 = vld [vmem:[%s14820_s0 + $0x78] sm:$0xff]  ;;  %v381_v29 = vld [vmem:[%s14820_s0 + $0xb60] sm:$0xff] }
   0xb   :  { %9367 = vmatprep.mubr.msk.f32.mxu1 %vm530_vm1, %v373_v13  ;;  %v33_v30 = vld [vmem:[%s14820_s0 + $0x80] sm:$0xff]  ;;  %v382_v31 = vld [vmem:[%s14820_s0 + $0xb68] sm:$0xff]  ;;  %v383_v33 = vld [vmem:[%s14820_s0 + $0xb70] sm:$0xff] }
   0xc   :  { %8840 = vmatmul.mubr.msk.f32.gmra.mxu0 %vm530_vm1, %v22_v6  ;;  %v34_v32 = vld [vmem:[%s14820_s0 + $0x88] sm:$0xff]  ;;  %v35_v34 = vld [vmem:[%s14820_s0 + $0x90] sm:$0xff]  ;;  %v384_v35 = vld [vmem:[%s14820_s0 + $0xb78] sm:$0xff] }
   0xd   :  { %8842 = vmatprep.mubr.msk.f32.mxu0 %vm530_vm1, %v23_v8  ;;  %v36_v36 = vld [vmem:[%s14820_s0 + $0x98] sm:$0xff]  ;;  %v385_v37 = vld [vmem:[%s14820_s0 + $0xb80] sm:$0xff]  ;;  %v386_v39 = vld [vmem:[%s14820_s0 + $0xb88] sm:$0xff] }
   0xe   :  { %9368 = vmatmul.mubr.msk.f32.gmra.mxu1 %vm530_vm1, %v374_v15  ;;  %v37_v38 = vld [vmem:[%s14820_s0 + $0xa0] sm:$0xff]  ;;  %v38_v40 = vld [vmem:[%s14820_s0 + $0xa8] sm:$0xff]  ;;  %v387_v41 = vld [vmem:[%s14820_s0 + $0xb90] sm:$0xff] }
   0xf   :  { %9370 = vmatprep.mubr.msk.f32.mxu1 %vm530_vm1, %v375_v17  ;;  %v39_v42 = vld [vmem:[%s14820_s0 + $0xb0] sm:$0xff]  ;;  %v388_v43 = vld [vmem:[%s14820_s0 + $0xb98] sm:$0xff]  ;;  %v389_v45 = vld [vmem:[%s14820_s0 + $0xba0] sm:$0xff] }
  0x10   :  { %8843 = vmatmul.mubr.msk.f32.gmra.mxu0 %vm530_vm1, %v24_v12  ;;  %v40_v44 = vld [vmem:[%s14820_s0 + $0xb8] sm:$0xff]  ;;  %v41_v46 = vld [vmem:[%s14820_s0 + $0xc0] sm:$0xff]  ;;  %v390_v47 = vld [vmem:[%s14820_s0 + $0xba8] sm:$0xff] }
  0x11   :  { %8845 = vmatprep.mubr.msk.f32.mxu0 %vm530_vm1, %v25_v14  ;;  %v42_v48 = vld [vmem:[%s14820_s0 + $0xc8] sm:$0xff]  ;;  %v391_v49 = vld [vmem:[%s14820_s0 + $0xbb0] sm:$0xff]  ;;  %v392_v51 = vld [vmem:[%s14820_s0 + $0xbb8] sm:$0xff] }
  0x12   :  { %9371 = vmatmul.mubr.msk.f32.gmra.mxu1 %vm530_vm1, %v376_v19  ;;  %v43_v50 = vld [vmem:[%s14820_s0 + $0xd0] sm:$0xff]  ;;  %v44_v52 = vld [vmem:[%s14820_s0 + $0xd8] sm:$0xff]  ;;  %v393_v53 = vld [vmem:[%s14820_s0 + $0xbc0] sm:$0xff] }
  0x13   :  { %9373 = vmatprep.mubr.msk.f32.mxu1 %vm530_vm1, %v377_v21  ;;  %v45_v54 = vld [vmem:[%s14820_s0 + $0xe0] sm:$0xff]  ;;  %v394_v55 = vld [vmem:[%s14820_s0 + $0xbc8] sm:$0xff]  ;;  %v395_v57 = vld [vmem:[%s14820_s0 + $0xbd0] sm:$0xff] }
  0x14   :  { %8846 = vmatmul.mubr.msk.f32.gmra.mxu0 %vm530_vm1, %v26_v16  ;;  %v46_v56 = vld [vmem:[%s14820_s0 + $0xe8] sm:$0xff]  ;;  %v47_v58 = vld [vmem:[%s14820_s0 + $0xf0] sm:$0xff]  ;;  %v396_v59 = vld [vmem:[%s14820_s0 + $0xbd8] sm:$0xff] }
  0x15   :  { %8848 = vmatprep.mubr.msk.f32.mxu0 %vm530_vm1, %v27_v18  ;;  %v48_v60 = vld [vmem:[%s14820_s0 + $0xf8] sm:$0xff]  ;;  %v397_v61 = vld [vmem:[%s14820_s0 + $0xbe0] sm:$0xff]  ;;  %v398_v63 = vld [vmem:[%s14820_s0 + $0xbe8] sm:$0xff] }
  0x16   :  { %9374 = vmatmul.mubr.msk.f32.gmra.mxu1 %vm530_vm1, %v378_v23  ;;  %v49_v62 = vld [vmem:[%s14820_s0 + $0x100] sm:$0xff]  ;;  %v50_v0 = vld [vmem:[%s14820_s0 + $0x108] sm:$0xff]  ;;  %v399_v1 = vld [vmem:[%s14820_s0 + $0xbf0] sm:$0xff] }
  0x17   :  { %9376 = vmatprep.mubr.msk.f32.mxu1 %vm530_vm1, %v379_v25  ;;  %v51_v2 = vld [vmem:[%s14820_s0 + $0x110] sm:$0xff]  ;;  %v400_v3 = vld [vmem:[%s14820_s0 + $0xbf8] sm:$0xff]  ;;  %v401_v5 = vld [vmem:[%s14820_s0 + $0xc00] sm:$0xff] }
  0x18   :  { %8849 = vmatmul.mubr.msk.f32.gmra.mxu0 %vm530_vm1, %v28_v20  ;;  %v52_v4 = vld [vmem:[%s14820_s0 + $0x118] sm:$0xff]  ;;  %v53_v6 = vld [vmem:[%s14820_s0 + $0x120] sm:$0xff]  ;;  %v402_v7 = vld [vmem:[%s14820_s0 + $0xc08] sm:$0xff] }
  0x19   :  { %8851 = vmatprep.mubr.msk.f32.mxu0 %vm530_vm1, %v29_v22  ;;  %v54_v8 = vld [vmem:[%s14820_s0 + $0x128] sm:$0xff]  ;;  %v403_v9 = vld [vmem:[%s14820_s0 + $0xc10] sm:$0xff]  ;;  %v404_v11 = vld [vmem:[%s14820_s0 + $0xc18] sm:$0xff] }
  0x1a   :  { %9377 = vmatmul.mubr.msk.f32.gmra.mxu1 %vm530_vm1, %v380_v27  ;;  %v55_v10 = vld [vmem:[%s14820_s0 + $0x130] sm:$0xff]  ;;  %v56_v12 = vld [vmem:[%s14820_s0 + $0x138] sm:$0xff]  ;;  %v405_v13 = vld [vmem:[%s14820_s0 + $0xc20] sm:$0xff] }
  0x1b   :  { %9379 = vmatprep.mubr.msk.f32.mxu1 %vm530_vm1, %v381_v29  ;;  %v57_v14 = vld [vmem:[%s14820_s0 + $0x140] sm:$0xff]  ;;  %v406_v15 = vld [vmem:[%s14820_s0 + $0xc28] sm:$0xff]  ;;  %v407_v17 = vld [vmem:[%s14820_s0 + $0xc30] sm:$0xff] }
  0x1c   :  { %8852 = vmatmul.mubr.msk.f32.gmra.mxu0 %vm530_vm1, %v30_v24  ;;  %v58_v16 = vld [vmem:[%s14820_s0 + $0x148] sm:$0xff]  ;;  %v59_v18 = vld [vmem:[%s14820_s0 + $0x150] sm:$0xff]  ;;  %v408_v19 = vld [vmem:[%s14820_s0 + $0xc38] sm:$0xff] }
  0x1d   :  { %8854 = vmatprep.mubr.msk.f32.mxu0 %vm530_vm1, %v31_v26  ;;  %v60_v20 = vld [vmem:[%s14820_s0 + $0x158] sm:$0xff]  ;;  %v409_v21 = vld [vmem:[%s14820_s0 + $0xc40] sm:$0xff]  ;;  %v410_v23 = vld [vmem:[%s14820_s0 + $0xc48] sm:$0xff] }
  0x1e   :  { %9380 = vmatmul.mubr.msk.f32.gmra.mxu1 %vm530_vm1, %v382_v31  ;;  %v61_v22 = vld [vmem:[%s14820_s0 + $0x160] sm:$0xff]  ;;  %v62_v24 = vld [vmem:[%s14820_s0 + $0x168] sm:$0xff]  ;;  %v411_v25 = vld [vmem:[%s14820_s0 + $0xc50] sm:$0xff] }
  0x1f   :  { %9382 = vmatprep.mubr.msk.f32.mxu1 %vm530_vm1, %v383_v33  ;;  %v63_v26 = vld [vmem:[%s14820_s0 + $0x170] sm:$0xff]  ;;  %v412_v27 = vld [vmem:[%s14820_s0 + $0xc58] sm:$0xff]  ;;  %v413_v29 = vld [vmem:[%s14820_s0 + $0xc60] sm:$0xff] }
  0x20   :  { %8855 = vmatmul.mubr.msk.f32.gmra.mxu0 %vm530_vm1, %v32_v28  ;;  %v64_v28 = vld [vmem:[%s14820_s0 + $0x178] sm:$0xff]  ;;  %v414_v31 = vld [vmem:[%s14820_s0 + $0xc68] sm:$0xff]  ;;  %v415_v33 = vld [vmem:[%s14820_s0 + $0xc70] sm:$0xff] }
  0x21   :  { %8857 = vmatprep.mubr.msk.f32.mxu0 %vm530_vm1, %v33_v30  ;;  %v65_v30 = vld [vmem:[%s14820_s0 + $0x180] sm:$0xff] }
  0x22   :  { %9383 = vmatmul.mubr.msk.f32.gmra.mxu1 %vm530_vm1, %v384_v35  ;;  %v416_v35 = vld [vmem:[%s14820_s0 + $0xc78] sm:$0xff] }
  0x23   :  { %9385 = vmatprep.mubr.msk.f32.mxu1 %vm530_vm1, %v385_v37  ;;  %v417_v37 = vld [vmem:[%s14820_s0 + $0xc80] sm:$0xff] }
  0x24   :  { %8858 = vmatmul.mubr.msk.f32.gmra.mxu0 %vm530_vm1, %v34_v32  ;;  %v66_v32 = vld [vmem:[%s14820_s0 + $0x188] sm:$0xff] }
  0x25   :  { %8860 = vmatprep.mubr.msk.f32.mxu0 %vm530_vm1, %v35_v34  ;;  %v67_v34 = vld [vmem:[%s14820_s0 + $0x190] sm:$0xff] }
  0x26   :  { %9386 = vmatmul.mubr.msk.f32.gmra.mxu1 %vm530_vm1, %v386_v39  ;;  %v418_v39 = vld [vmem:[%s14820_s0 + $0xc88] sm:$0xff] }
  0x27   :  { %9388 = vmatprep.mubr.msk.f32.mxu1 %vm530_vm1, %v387_v41  ;;  %v419_v41 = vld [vmem:[%s14820_s0 + $0xc90] sm:$0xff] }
  0x28   :  { %8861 = vmatmul.mubr.msk.f32.gmra.mxu0 %vm530_vm1, %v36_v36  ;;  %v68_v36 = vld [vmem:[%s14820_s0 + $0x198] sm:$0xff] }
  0x29   :  { %8863 = vmatprep.mubr.msk.f32.mxu0 %vm530_vm1, %v37_v38  ;;  %v69_v38 = vld [vmem:[%s14820_s0 + $0x1a0] sm:$0xff] }
  0x2a   :  { %9389 = vmatmul.mubr.msk.f32.gmra.mxu1 %vm530_vm1, %v388_v43  ;;  %v420_v43 = vld [vmem:[%s14820_s0 + $0xc98] sm:$0xff] }
  0x2b   :  { %9391 = vmatprep.mubr.msk.f32.mxu1 %vm530_vm1, %v389_v45  ;;  %v73_v45 = vld [vmem:[%s14820_s0 + $0x1c0] sm:$0xff] }
  0x2c   :  { %8864 = vmatmul.mubr.msk.f32.gmra.mxu0 %vm530_vm1, %v38_v40  ;;  %v70_v40 = vld [vmem:[%s14820_s0 + $0x1a8] sm:$0xff] }
  0x2d   :  { %8866 = vmatprep.mubr.msk.f32.mxu0 %vm530_vm1, %v39_v42  ;;  %v71_v42 = vld [vmem:[%s14820_s0 + $0x1b0] sm:$0xff] }
  0x2e   :  { %9392 = vmatmul.mubr.msk.f32.gmra.mxu1 %vm530_vm1, %v390_v47  ;;  %v422_v47 = vld [vmem:[%s14820_s0 + $0xca8] sm:$0xff] }
  0x2f   :  { %9394 = vmatprep.mubr.msk.f32.mxu1 %vm530_vm1, %v391_v49  ;;  %v75_v49 = vld [vmem:[%s14820_s0 + $0x1d0] sm:$0xff] }
  0x30   :  { %8867 = vmatmul.mubr.msk.f32.gmra.mxu0 %vm530_vm1, %v40_v44  ;;  %v72_v44 = vld [vmem:[%s14820_s0 + $0x1b8] sm:$0xff] }
  0x31   :  { %8869 = vmatprep.mubr.msk.f32.mxu0 %vm530_vm1, %v41_v46  ;;  %v421_v46 = vld [vmem:[%s14820_s0 + $0xca0] sm:$0xff] }
  0x32   :  { %9395 = vmatmul.mubr.msk.f32.gmra.mxu1 %vm530_vm1, %v392_v51  ;;  %v76_v51 = vld [vmem:[%s14820_s0 + $0x1d8] sm:$0xff] }
  0x33   :  { %9397 = vmatprep.mubr.msk.f32.mxu1 %vm530_vm1, %v393_v53  ;;  %v424_v53 = vld [vmem:[%s14820_s0 + $0xcb8] sm:$0xff] }
  0x34   :  { %8870 = vmatmul.mubr.msk.f32.gmra.mxu0 %vm530_vm1, %v42_v48  ;;  %v74_v48 = vld [vmem:[%s14820_s0 + $0x1c8] sm:$0xff] }
  0x35   :  { %8872 = vmatprep.mubr.msk.f32.mxu0 %vm530_vm1, %v43_v50  ;;  %v423_v50 = vld [vmem:[%s14820_s0 + $0xcb0] sm:$0xff] }
  0x36   :  { %9398 = vmatmul.mubr.msk.f32.gmra.mxu1 %vm530_vm1, %v394_v55  ;;  %v78_v55 = vld [vmem:[%s14820_s0 + $0x1e8] sm:$0xff] }
  0x37   :  { %9400 = vmatprep.mubr.msk.f32.mxu1 %vm530_vm1, %v395_v57  ;;  %v426_v57 = vld [vmem:[%s14820_s0 + $0xcc8] sm:$0xff] }
  0x38   :  { %8873 = vmatmul.mubr.msk.f32.gmra.mxu0 %vm530_vm1, %v44_v52  ;;  %v77_v52 = vld [vmem:[%s14820_s0 + $0x1e0] sm:$0xff] }
  0x39   :  { %8875 = vmatprep.mubr.msk.f32.mxu0 %vm530_vm1, %v45_v54  ;;  %v425_v54 = vld [vmem:[%s14820_s0 + $0xcc0] sm:$0xff] }
  0x3a   :  { %9401 = vmatmul.mubr.msk.f32.gmra.mxu1 %vm530_vm1, %v396_v59  ;;  %v80_v59 = vld [vmem:[%s14820_s0 + $0x1f8] sm:$0xff] }
  0x3b   :  { %9403 = vmatprep.mubr.msk.f32.mxu1 %vm530_vm1, %v397_v61  ;;  %v81_v61 = vld [vmem:[%s14820_s0 + $0x200] sm:$0xff] }
  0x3c   :  { %8876 = vmatmul.mubr.msk.f32.gmra.mxu0 %vm530_vm1, %v46_v56  ;;  %v79_v56 = vld [vmem:[%s14820_s0 + $0x1f0] sm:$0xff] }
  0x3d   :  { %8878 = vmatprep.mubr.msk.f32.mxu0 %vm530_vm1, %v47_v58  ;;  %v427_v58 = vld [vmem:[%s14820_s0 + $0xcd0] sm:$0xff] }
  0x3e   :  { %9404 = vmatmul.mubr.msk.f32.gmra.mxu1 %vm530_vm1, %v398_v63  ;;  %v82_v63 = vld [vmem:[%s14820_s0 + $0x208] sm:$0xff] }
  0x3f   :  { %9406 = vmatprep.mubr.msk.f32.mxu1 %vm530_vm1, %v399_v1  ;;  %v83_v1 = vld [vmem:[%s14820_s0 + $0x210] sm:$0xff] }
  0x40   :  { %8879 = vmatmul.mubr.msk.f32.gmra.mxu0 %vm530_vm1, %v48_v60  ;;  %v428_v60 = vld [vmem:[%s14820_s0 + $0xcd8] sm:$0xff] }
  0x41   :  { %8881 = vmatprep.mubr.msk.f32.mxu0 %vm530_vm1, %v49_v62  ;;  %v429_v62 = vld [vmem:[%s14820_s0 + $0xce0] sm:$0xff] }
  0x42   :  { %9407 = vmatmul.mubr.msk.f32.gmra.mxu1 %vm530_vm1, %v400_v3  ;;  %v84_v3 = vld [vmem:[%s14820_s0 + $0x218] sm:$0xff] }
  0x43   :  { %9409 = vmatprep.mubr.msk.f32.mxu1 %vm530_vm1, %v401_v5  ;;  %v85_v5 = vld [vmem:[%s14820_s0 + $0x220] sm:$0xff] }
  0x44   :  { %8882 = vmatmul.mubr.msk.f32.gmra.mxu0 %vm530_vm1, %v50_v0  ;;  %v430_v0 = vld [vmem:[%s14820_s0 + $0xce8] sm:$0xff] }
  0x45   :  { %8884 = vmatprep.mubr.msk.f32.mxu0 %vm530_vm1, %v51_v2  ;;  %v431_v2 = vld [vmem:[%s14820_s0 + $0xcf0] sm:$0xff] }
  0x46   :  { %9410 = vmatmul.mubr.msk.f32.gmra.mxu1 %vm530_vm1, %v402_v7  ;;  %v86_v7 = vld [vmem:[%s14820_s0 + $0x228] sm:$0xff] }
  0x47   :  { %9412 = vmatprep.mubr.msk.f32.mxu1 %vm530_vm1, %v403_v9  ;;  %v87_v9 = vld [vmem:[%s14820_s0 + $0x230] sm:$0xff] }
  0x48   :  { %8885 = vmatmul.mubr.msk.f32.gmra.mxu0 %vm530_vm1, %v52_v4  ;;  %v432_v4 = vld [vmem:[%s14820_s0 + $0xcf8] sm:$0xff] }
  0x49   :  { %8887 = vmatprep.mubr.msk.f32.mxu0 %vm530_vm1, %v53_v6  ;;  %v433_v6 = vld [vmem:[%s14820_s0 + $0xd00] sm:$0xff] }
  0x4a   :  { %9413 = vmatmul.mubr.msk.f32.gmra.mxu1 %vm530_vm1, %v404_v11  ;;  %v88_v11 = vld [vmem:[%s14820_s0 + $0x238] sm:$0xff] }
  0x4b   :  { %9415 = vmatprep.mubr.msk.f32.mxu1 %vm530_vm1, %v405_v13  ;;  %v89_v13 = vld [vmem:[%s14820_s0 + $0x240] sm:$0xff] }
  0x4c   :  { %8888 = vmatmul.mubr.msk.f32.gmra.mxu0 %vm530_vm1, %v54_v8  ;;  %v434_v8 = vld [vmem:[%s14820_s0 + $0xd08] sm:$0xff] }
  0x4d   :  { %8890 = vmatprep.mubr.msk.f32.mxu0 %vm530_vm1, %v55_v10  ;;  %v435_v10 = vld [vmem:[%s14820_s0 + $0xd10] sm:$0xff] }
  0x4e   :  { %9416 = vmatmul.mubr.msk.f32.gmra.mxu1 %vm530_vm1, %v406_v15  ;;  %v90_v15 = vld [vmem:[%s14820_s0 + $0x248] sm:$0xff] }
  0x4f   :  { %9418 = vmatprep.mubr.msk.f32.mxu1 %vm530_vm1, %v407_v17  ;;  %v91_v17 = vld [vmem:[%s14820_s0 + $0x250] sm:$0xff] }
  0x50   :  { %8891 = vmatmul.mubr.msk.f32.gmra.mxu0 %vm530_vm1, %v56_v12  ;;  %v436_v12 = vld [vmem:[%s14820_s0 + $0xd18] sm:$0xff] }
  0x51   :  { %8893 = vmatprep.mubr.msk.f32.mxu0 %vm530_vm1, %v57_v14  ;;  %v437_v14 = vld [vmem:[%s14820_s0 + $0xd20] sm:$0xff] }
  0x52   :  { %9419 = vmatmul.mubr.msk.f32.gmra.mxu1 %vm530_vm1, %v408_v19  ;;  %v92_v19 = vld [vmem:[%s14820_s0 + $0x258] sm:$0xff] }
  0x53   :  { %9421 = vmatprep.mubr.msk.f32.mxu1 %vm530_vm1, %v409_v21  ;;  %v93_v21 = vld [vmem:[%s14820_s0 + $0x260] sm:$0xff] }
  0x54   :  { %8894 = vmatmul.mubr.msk.f32.gmra.mxu0 %vm530_vm1, %v58_v16  ;;  %v438_v16 = vld [vmem:[%s14820_s0 + $0xd28] sm:$0xff] }
  0x55   :  { %8896 = vmatprep.mubr.msk.f32.mxu0 %vm530_vm1, %v59_v18  ;;  %v439_v18 = vld [vmem:[%s14820_s0 + $0xd30] sm:$0xff] }
  0x56   :  { %9422 = vmatmul.mubr.msk.f32.gmra.mxu1 %vm530_vm1, %v410_v23  ;;  %v94_v23 = vld [vmem:[%s14820_s0 + $0x268] sm:$0xff] }
  0x57   :  { %9424 = vmatprep.mubr.msk.f32.mxu1 %vm530_vm1, %v411_v25  ;;  %v95_v25 = vld [vmem:[%s14820_s0 + $0x270] sm:$0xff] }
  0x58   :  { %8897 = vmatmul.mubr.msk.f32.gmra.mxu0 %vm530_vm1, %v60_v20  ;;  %v440_v20 = vld [vmem:[%s14820_s0 + $0xd38] sm:$0xff] }
  0x59   :  { %8899 = vmatprep.mubr.msk.f32.mxu0 %vm530_vm1, %v61_v22  ;;  %v441_v22 = vld [vmem:[%s14820_s0 + $0xd40] sm:$0xff] }
  0x5a   :  { %9425 = vmatmul.mubr.msk.f32.gmra.mxu1 %vm530_vm1, %v412_v27  ;;  %v96_v27 = vld [vmem:[%s14820_s0 + $0x278] sm:$0xff] }
  0x5b   :  { %9427 = vmatprep.mubr.msk.f32.mxu1 %vm530_vm1, %v413_v29  ;;  %v97_v29 = vld [vmem:[%s14820_s0 + $0x280] sm:$0xff] }
  0x5c   :  { %8900 = vmatmul.mubr.msk.f32.gmra.mxu0 %vm530_vm1, %v62_v24  ;;  %v442_v24 = vld [vmem:[%s14820_s0 + $0xd48] sm:$0xff] }
  0x5d   :  { %8902 = vmatprep.mubr.msk.f32.mxu0 %vm530_vm1, %v63_v26  ;;  %v443_v26 = vld [vmem:[%s14820_s0 + $0xd50] sm:$0xff] }
  0x5e   :  { %9428 = vmatmul.mubr.msk.f32.gmra.mxu1 %vm530_vm1, %v414_v31  ;;  %v98_v31 = vld [vmem:[%s14820_s0 + $0x288] sm:$0xff] }
  0x5f   :  { %9430 = vmatprep.mubr.msk.f32.mxu1 %vm530_vm1, %v415_v33  ;;  %v447_v33 = vld [vmem:[%s14820_s0 + $0xd70] sm:$0xff] }
  0x60   :  { %8903 = vmatmul.mubr.msk.f32.gmra.mxu0 %vm530_vm1, %v64_v28  ;;  %v444_v28 = vld [vmem:[%s14820_s0 + $0xd58] sm:$0xff] }
  0x61   :  { %8905 = vmatprep.mubr.msk.f32.mxu0 %vm530_vm1, %v65_v30  ;;  %v445_v30 = vld [vmem:[%s14820_s0 + $0xd60] sm:$0xff] }
  0x62   :  { %9431 = vmatmul.mubr.msk.f32.gmra.mxu1 %vm530_vm1, %v416_v35  ;;  %v99_v35 = vld [vmem:[%s14820_s0 + $0x290] sm:$0xff] }
  0x63   :  { %9433 = vmatprep.mubr.msk.f32.mxu1 %vm530_vm1, %v417_v37  ;;  %v449_v37 = vld [vmem:[%s14820_s0 + $0xd80] sm:$0xff] }
  0x64   :  { %8906 = vmatmul.mubr.msk.f32.gmra.mxu0 %vm530_vm1, %v66_v32  ;;  %v446_v32 = vld [vmem:[%s14820_s0 + $0xd68] sm:$0xff] }
  0x65   :  { %8908 = vmatprep.mubr.msk.f32.mxu0 %vm530_vm1, %v67_v34  ;;  %v448_v34 = vld [vmem:[%s14820_s0 + $0xd78] sm:$0xff] }
  0x66   :  { %9434 = vmatmul.mubr.msk.f32.gmra.mxu1 %vm530_vm1, %v418_v39  ;;  %v451_v39 = vld [vmem:[%s14820_s0 + $0xd90] sm:$0xff] }
  0x67   :  { %9436 = vmatprep.mubr.msk.f32.mxu1 %vm530_vm1, %v419_v41  ;;  %v101_v41 = vld [vmem:[%s14820_s0 + $0x2a0] sm:$0xff] }
  0x68   :  { %8909 = vmatmul.mubr.msk.f32.gmra.mxu0 %vm530_vm1, %v68_v36  ;;  %v100_v36 = vld [vmem:[%s14820_s0 + $0x298] sm:$0xff] }
  0x69   :  { %8911 = vmatprep.mubr.msk.f32.mxu0 %vm530_vm1, %v69_v38  ;;  %v450_v38 = vld [vmem:[%s14820_s0 + $0xd88] sm:$0xff] }
  0x6a   :  { %9437 = vmatmul.mubr.msk.f32.gmra.mxu1 %vm530_vm1, %v420_v43  ;;  %v453_v43 = vld [vmem:[%s14820_s0 + $0xda0] sm:$0xff] }
  0x6b   :  { %9439 = vmatprep.mubr.msk.f32.mxu1 %vm530_vm1, %v421_v46  ;;  %v456_v46 = vld [vmem:[%s14820_s0 + $0xdb8] sm:$0xff] }
  0x6c   :  { %8912 = vmatmul.mubr.msk.f32.gmra.mxu0 %vm530_vm1, %v70_v40  ;;  %v452_v40 = vld [vmem:[%s14820_s0 + $0xd98] sm:$0xff] }
  0x6d   :  { %8914 = vmatprep.mubr.msk.f32.mxu0 %vm530_vm1, %v71_v42  ;;  %v102_v42 = vld [vmem:[%s14820_s0 + $0x2a8] sm:$0xff] }
  0x6e   :  { %9440 = vmatmul.mubr.msk.f32.gmra.mxu1 %vm530_vm1, %v422_v47  ;;  %v103_v47 = vld [vmem:[%s14820_s0 + $0x2b0] sm:$0xff] }
  0x6f   :  { %9442 = vmatprep.mubr.msk.f32.mxu1 %vm530_vm1, %v423_v50  ;;  %v458_v50 = vld [vmem:[%s14820_s0 + $0xdc8] sm:$0xff] }
  0x70   :  { %8915 = vmatmul.mubr.msk.f32.gmra.mxu0 %vm530_vm1, %v72_v44  ;;  %v454_v44 = vld [vmem:[%s14820_s0 + $0xda8] sm:$0xff] }
  0x71   :  { %8917 = vmatprep.mubr.msk.f32.mxu0 %vm530_vm1, %v73_v45  ;;  %v455_v45 = vld [vmem:[%s14820_s0 + $0xdb0] sm:$0xff] }
  0x72   :  { %9443 = vmatmul.mubr.msk.f32.gmra.mxu1 %vm530_vm1, %v424_v53  ;;  %v105_v53 = vld [vmem:[%s14820_s0 + $0x2c0] sm:$0xff] }
  0x73   :  { %9445 = vmatprep.mubr.msk.f32.mxu1 %vm530_vm1, %v425_v54  ;;  %v106_v54 = vld [vmem:[%s14820_s0 + $0x2c8] sm:$0xff] }
  0x74   :  { %8918 = vmatmul.mubr.msk.f32.gmra.mxu0 %vm530_vm1, %v74_v48  ;;  %v104_v48 = vld [vmem:[%s14820_s0 + $0x2b8] sm:$0xff] }
  0x75   :  { %8920 = vmatprep.mubr.msk.f32.mxu0 %vm530_vm1, %v75_v49  ;;  %v457_v49 = vld [vmem:[%s14820_s0 + $0xdc0] sm:$0xff] }
  0x76   :  { %9446 = vmatmul.mubr.msk.f32.gmra.mxu1 %vm530_vm1, %v426_v57  ;;  %v463_v57 = vld [vmem:[%s14820_s0 + $0xdf0] sm:$0xff] }
  0x77   :  { %9448 = vmatprep.mubr.msk.f32.mxu1 %vm530_vm1, %v427_v58 }
  0x78   :  { %8921 = vmatmul.mubr.msk.f32.gmra.mxu0 %vm530_vm1, %v76_v51  ;;  %v459_v51 = vld [vmem:[%s14820_s0 + $0xdd0] sm:$0xff] }
  0x79   :  { %8923 = vmatprep.mubr.msk.f32.mxu0 %vm530_vm1, %v77_v52  ;;  %v460_v52 = vld [vmem:[%s14820_s0 + $0xdd8] sm:$0xff] }
  0x7a   :  { %9449 = vmatmul.mubr.msk.f32.gmra.mxu1 %vm530_vm1, %v428_v60  ;;  %v464_v60 = vld [vmem:[%s14820_s0 + $0xdf8] sm:$0xff] }
  0x7b   :  { %9451 = vmatprep.mubr.msk.f32.mxu1 %vm530_vm1, %v429_v62  ;;  %v108_v62 = vld [vmem:[%s14820_s0 + $0x2d8] sm:$0xff] }
  0x7c   :  { %8924 = vmatmul.mubr.msk.f32.gmra.mxu0 %vm530_vm1, %v78_v55  ;;  %v461_v55 = vld [vmem:[%s14820_s0 + $0xde0] sm:$0xff] }
  0x7d   :  { %8926 = vmatprep.mubr.msk.f32.mxu0 %vm530_vm1, %v79_v56  ;;  %v462_v56 = vld [vmem:[%s14820_s0 + $0xde8] sm:$0xff] }
  0x7e   :  { %9452 = vmatmul.mubr.msk.f32.gmra.mxu1 %vm530_vm1, %v430_v0  ;;  %v465_v0 = vld [vmem:[%s14820_s0 + $0xe00] sm:$0xff] }
  0x7f   :  { %9454 = vmatprep.mubr.msk.f32.mxu1 %vm530_vm1, %v431_v2 }
  0x80   :  { %8927 = vmatmul.mubr.msk.f32.gmra.mxu0 %vm530_vm1, %v80_v59 }
  0x81   :  { %8929 = vmatprep.mubr.msk.f32.mxu0 %vm530_vm1, %v81_v61  ;;  %v107_v61 = vld [vmem:[%s14820_s0 + $0x2d0] sm:$0xff] }
  0x82   :  { %9455 = vmatmul.mubr.msk.f32.gmra.mxu1 %vm530_vm1, %v432_v4  ;;  %v467_v4 = vld [vmem:[%s14820_s0 + $0xe10] sm:$0xff] }
  0x83   :  { %9457 = vmatprep.mubr.msk.f32.mxu1 %vm530_vm1, %v433_v6 }
  0x84   :  { %8930 = vmatmul.mubr.msk.f32.gmra.mxu0 %vm530_vm1, %v82_v63 }
  0x85   :  { %8932 = vmatprep.mubr.msk.f32.mxu0 %vm530_vm1, %v83_v1 }
  0x86   :  { %9458 = vmatmul.mubr.msk.f32.gmra.mxu1 %vm530_vm1, %v434_v8 }
  0x87   :  { %9460 = vmatprep.mubr.msk.f32.mxu1 %vm530_vm1, %v435_v10  ;;  %v109_v10 = vld [vmem:[%s14820_s0 + $0x2e0] sm:$0xff] }
  0x88   :  { %8933 = vmatmul.mubr.msk.f32.gmra.mxu0 %vm530_vm1, %v84_v3  ;;  %v466_v3 = vld [vmem:[%s14820_s0 + $0xe08] sm:$0xff] }
  0x89   :  { %8935 = vmatprep.mubr.msk.f32.mxu0 %vm530_vm1, %v85_v5 }
  0x8a   :  { %9461 = vmatmul.mubr.msk.f32.gmra.mxu1 %vm530_vm1, %v436_v12 }
  0x8b   :  { %9463 = vmatprep.mubr.msk.f32.mxu1 %vm530_vm1, %v437_v14 }
  0x8c   :  { %8936 = vmatmul.mubr.msk.f32.gmra.mxu0 %vm530_vm1, %v86_v7 }
  0x8d   :  { %8938 = vmatprep.mubr.msk.f32.mxu0 %vm530_vm1, %v87_v9  ;;  %v468_v9 = vld [vmem:[%s14820_s0 + $0xe18] sm:$0xff] }
  0x8e   :  { %9464 = vmatmul.mubr.msk.f32.gmra.mxu1 %vm530_vm1, %v438_v16 }
  0x8f   :  { %9466 = vmatprep.mubr.msk.f32.mxu1 %vm530_vm1, %v439_v18  ;;  %v471_v18 = vld [vmem:[%s14820_s0 + $0xe30] sm:$0xff] }
  0x90   :  { %8939 = vmatmul.mubr.msk.f32.gmra.mxu0 %vm530_vm1, %v88_v11  ;;  %v110_v11 = vld [vmem:[%s14820_s0 + $0x2e8] sm:$0xff] }
  0x91   :  { %8941 = vmatprep.mubr.msk.f32.mxu0 %vm530_vm1, %v89_v13  ;;  %v469_v13 = vld [vmem:[%s14820_s0 + $0xe20] sm:$0xff] }
  0x92   :  { %9467 = vmatmul.mubr.msk.f32.gmra.mxu1 %vm530_vm1, %v440_v20 }
  0x93   :  { %9469 = vmatprep.mubr.msk.f32.mxu1 %vm530_vm1, %v441_v22 }
  0x94   :  { %8942 = vmatmul.mubr.msk.f32.gmra.mxu0 %vm530_vm1, %v90_v15 }
  0x95   :  { %8944 = vmatprep.mubr.msk.f32.mxu0 %vm530_vm1, %v91_v17  ;;  %v470_v17 = vld [vmem:[%s14820_s0 + $0xe28] sm:$0xff] }
  0x96   :  { %9470 = vmatmul.mubr.msk.f32.gmra.mxu1 %vm530_vm1, %v442_v24  ;;  %v111_v24 = vld [vmem:[%s14820_s0 + $0x2f0] sm:$0xff] }
  0x97   :  { %9472 = vmatprep.mubr.msk.f32.mxu1 %vm530_vm1, %v443_v26 }
  0x98   :  { %8945 = vmatmul.mubr.msk.f32.gmra.mxu0 %vm530_vm1, %v92_v19 }
  0x99   :  { %8947 = vmatprep.mubr.msk.f32.mxu0 %vm530_vm1, %v93_v21 }
  0x9a   :  { %9473 = vmatmul.mubr.msk.f32.gmra.mxu1 %vm530_vm1, %v444_v28 }
  0x9b   :  { %9475 = vmatprep.mubr.msk.f32.mxu1 %vm530_vm1, %v445_v30 }
  0x9c   :  { %8948 = vmatmul.mubr.msk.f32.gmra.mxu0 %vm530_vm1, %v94_v23  ;;  %v472_v23 = vld [vmem:[%s14820_s0 + $0xe38] sm:$0xff] }
  0x9d   :  { %8950 = vmatprep.mubr.msk.f32.mxu0 %vm530_vm1, %v95_v25  ;;  %v112_v25 = vld [vmem:[%s14820_s0 + $0x2f8] sm:$0xff] }
  0x9e   :  { %9476 = vmatmul.mubr.msk.f32.gmra.mxu1 %vm530_vm1, %v446_v32  ;;  %v475_v32 = vld [vmem:[%s14820_s0 + $0xe50] sm:$0xff] }
  0x9f   :  { %9478 = vmatprep.mubr.msk.f32.mxu1 %vm530_vm1, %v447_v33 }
  0xa0   :  { %8951 = vmatmul.mubr.msk.f32.gmra.mxu0 %vm530_vm1, %v96_v27  ;;  %v473_v27 = vld [vmem:[%s14820_s0 + $0xe40] sm:$0xff] }
  0xa1   :  { %8953 = vmatprep.mubr.msk.f32.mxu0 %vm530_vm1, %v97_v29 }
  0xa2   :  { %9479 = vmatmul.mubr.msk.f32.gmra.mxu1 %vm530_vm1, %v448_v34 }
  0xa3   :  { %9481 = vmatprep.mubr.msk.f32.mxu1 %vm530_vm1, %v449_v37  ;;  %v476_v37 = vld [vmem:[%s14820_s0 + $0xe58] sm:$0xff] }
  0xa4   :  { %8954 = vmatmul.mubr.msk.f32.gmra.mxu0 %vm530_vm1, %v98_v31  ;;  %v474_v31 = vld [vmem:[%s14820_s0 + $0xe48] sm:$0xff] }
  0xa5   :  { %8956 = vmatprep.mubr.msk.f32.mxu0 %vm530_vm1, %v99_v35 }
  0xa6   :  { %9482 = vmatmul.mubr.msk.f32.gmra.mxu1 %vm530_vm1, %v450_v38  ;;  %v477_v38 = vld [vmem:[%s14820_s0 + $0xe60] sm:$0xff] }
  0xa7   :  { %9484 = vmatprep.mubr.msk.f32.mxu1 %vm530_vm1, %v451_v39 }
  0xa8   :  { %8957 = vmatmul.mubr.msk.f32.gmra.mxu0 %vm530_vm1, %v100_v36 }
  0xa9   :  { %8959 = vmatprep.mubr.msk.f32.mxu0 %vm530_vm1, %v101_v41 }
  0xaa   :  { %9485 = vmatmul.mubr.msk.f32.gmra.mxu1 %vm530_vm1, %v452_v40 }
  0xab   :  { %9487 = vmatprep.mubr.msk.f32.mxu1 %vm530_vm1, %v453_v43  ;;  %v478_v43 = vld [vmem:[%s14820_s0 + $0xe68] sm:$0xff] }
  0xac   :  { %8960 = vmatmul.mubr.msk.f32.gmra.mxu0 %vm530_vm1, %v102_v42 }
  0xad   :  { %8962 = vmatprep.mubr.msk.f32.mxu0 %vm530_vm1, %v103_v47 }
  0xae   :  { %9488 = vmatmul.mubr.msk.f32.gmra.mxu1 %vm530_vm1, %v454_v44  ;;  %v479_v44 = vld [vmem:[%s14820_s0 + $0xe70] sm:$0xff] }
  0xaf   :  { %9490 = vmatprep.mubr.msk.f32.mxu1 %vm530_vm1, %v455_v45 }
  0xb0   :  { %8963 = vmatmul.mubr.msk.f32.gmra.mxu0 %vm530_vm1, %v104_v48 }
  0xb1   :  { %8965 = vmatprep.mubr.msk.f32.mxu0 %vm530_vm1, %v105_v53 }
  0xb2   :  { %9491 = vmatmul.mubr.msk.f32.gmra.mxu1 %vm530_vm1, %v456_v46 }
  0xb3   :  { %9493 = vmatprep.mubr.msk.f32.mxu1 %vm530_vm1, %v457_v49  ;;  %v480_v49 = vld [vmem:[%s14820_s0 + $0xe78] sm:$0xff] }
  0xb4   :  { %8966 = vmatmul.mubr.msk.f32.gmra.mxu0 %vm530_vm1, %v106_v54 }
  0xb5   :  { %8968 = vmatprep.mubr.msk.f32.mxu0 %vm530_vm1, %v107_v61  ;;  %v484_v61 = vld [vmem:[%s14820_s0 + $0xe98] sm:$0xff] }
  0xb6   :  { %9494 = vmatmul.mubr.msk.f32.gmra.mxu1 %vm530_vm1, %v458_v50  ;;  %v481_v50 = vld [vmem:[%s14820_s0 + $0xe80] sm:$0xff] }
  0xb7   :  { %9496 = vmatprep.mubr.msk.f32.mxu1 %vm530_vm1, %v459_v51 }
  0xb8   :  { %8969 = vmatmul.mubr.msk.f32.gmra.mxu0 %vm530_vm1, %v108_v62  ;;  %v485_v62 = vld [vmem:[%s14820_s0 + $0xea0] sm:$0xff] }
  0xb9   :  { %8971 = vmatprep.mubr.msk.f32.mxu0 %vm530_vm1, %v109_v10 }
  0xba   :  { %9497 = vmatmul.mubr.msk.f32.gmra.mxu1 %vm530_vm1, %v460_v52 }
  0xbb   :  { %9499 = vmatprep.mubr.msk.f32.mxu1 %vm530_vm1, %v461_v55  ;;  %v482_v55 = vld [vmem:[%s14820_s0 + $0xe88] sm:$0xff] }
  0xbc   :  { %8972 = vmatmul.mubr.msk.f32.gmra.mxu0 %vm530_vm1, %v110_v11 }
  0xbd   :  { %8974 = vmatprep.mubr.msk.f32.mxu0 %vm530_vm1, %v111_v24 }
  0xbe   :  { %9500 = vmatmul.mubr.msk.f32.gmra.mxu1 %vm530_vm1, %v462_v56  ;;  %v483_v56 = vld [vmem:[%s14820_s0 + $0xe90] sm:$0xff] }
  0xbf   :  { %9502 = vmatprep.mubr.msk.f32.mxu1 %vm530_vm1, %v463_v57 }
  0xc0   :  { %8975 = vmatmul.mubr.msk.f32.gmra.mxu0 %vm530_vm1, %v112_v25 }
  0xc2   :  { %9503 = vmatmul.mubr.msk.f32.gmra.mxu1 %vm530_vm1, %v464_v60 }
  0xc3   :  { %9505 = vmatprep.mubr.msk.f32.mxu1 %vm530_vm1, %v465_v0 }
  0xc4   :  { %v8835_v58 = vpop.f32.mrf.mxu0 }
  0xc6   :  { %v2137_v59 = vpop.f32.mrf.mxu0  ;;  %v10870_v2 = vpop.f32.mrf.mxu1  ;;  %9506 = vmatmul.mubr.msk.f32.gmra.mxu1 %vm530_vm1, %v466_v3 }
  0xc7   :  { %4696 = vxpose.xlu0.b32.start [1/16] (narrow) %v2137_v59, 56  ;;  %9508 = vmatprep.mubr.msk.f32.mxu1 %vm530_vm1, %v467_v4  ;;  %v486_v4 = vld [vmem:[%s14820_s0 + $0xea8] sm:$0xff] }
  0xc8   :  { %v8838_v63 = vpop.f32.mrf.mxu0  ;;  %v10879_v6 = vpop.f32.mrf.mxu1 }
  0xca   :  { %v2147_v1 = vpop.f32.mrf.mxu0  ;;  %v10882_v8 = vpop.f32.mrf.mxu1  ;;  %9509 = vmatmul.mubr.msk.f32.gmra.mxu1 %vm530_vm1, %v468_v9 }
  0xcb   :  { %4697 = vxpose.xlu0.b32.cont [2/16] (narrow) %v8835_v58, 56  ;;  %9511 = vmatprep.mubr.msk.f32.mxu1 %vm530_vm1, %v469_v13  ;;  %v489_v13 = vld [vmem:[%s14820_s0 + $0xec0] sm:$0xff] }
  0xcc   :  { %v8841_v5 = vpop.f32.mrf.mxu0  ;;  %v10898_v14 = vpop.f32.mrf.mxu1 }
  0xce   :  { %v2157_v7 = vpop.f32.mrf.mxu0  ;;  %v10902_v16 = vpop.f32.mrf.mxu1  ;;  %9512 = vmatmul.mubr.msk.f32.gmra.mxu1 %vm530_vm1, %v470_v17 }
  0xcf   :  { %4698 = vxpose.xlu0.b32.cont [3/16] (narrow) %v2147_v1, 56  ;;  %9514 = vmatprep.mubr.msk.f32.mxu1 %vm530_vm1, %v471_v18 }
  0xd0   :  { %v8844_v12 = vpop.f32.mrf.mxu0  ;;  %v10911_v20 = vpop.f32.mrf.mxu1 }
  0xd2   :  { %v2167_v15 = vpop.f32.mrf.mxu0  ;;  %v10914_v22 = vpop.f32.mrf.mxu1  ;;  %9515 = vmatmul.mubr.msk.f32.gmra.mxu1 %vm530_vm1, %v472_v23 }
  0xd3   :  { %4699 = vxpose.xlu0.b32.cont [4/16] (narrow) %v8838_v63, 56  ;;  %9517 = vmatprep.mubr.msk.f32.mxu1 %vm530_vm1, %v473_v27  ;;  %v113_v27 = vld [vmem:[%s14820_s0 + $0x300] sm:$0xff] }
  0xd4   :  { %v8847_v19 = vpop.f32.mrf.mxu0  ;;  %v10932_v28 = vpop.f32.mrf.mxu1  ;;  %8977 = vmatprep.mubr.msk.f32.mxu0 %vm530_vm1, %v113_v27 }
  0xd6   :  { %v2177_v21 = vpop.f32.mrf.mxu0  ;;  %v10936_v30 = vpop.f32.mrf.mxu1  ;;  %9518 = vmatmul.mubr.msk.f32.gmra.mxu1 %vm530_vm1, %v474_v31 }
  0xd7   :  { %4700 = vxpose.xlu0.b32.cont [5/16] (narrow) %v2157_v7, 56  ;;  %9520 = vmatprep.mubr.msk.f32.mxu1 %vm530_vm1, %v475_v32  ;;  %v493_v32 = vld [vmem:[%s14820_s0 + $0xee0] sm:$0xff] }
  0xd8   :  { %v10925_v26 = vpop.f32.mrf.mxu0  ;;  %v10947_v34 = vpop.f32.mrf.mxu1 }
  0xda   :  { %v2187_v29 = vpop.f32.mrf.mxu0  ;;  %v10950_v36 = vpop.f32.mrf.mxu1  ;;  %9521 = vmatmul.mubr.msk.f32.gmra.mxu1 %vm530_vm1, %v476_v37 }
  0xdb   :  { %4701 = vxpose.xlu0.b32.cont [6/16] (narrow) %v8841_v5, 56  ;;  %9523 = vmatprep.mubr.msk.f32.mxu1 %vm530_vm1, %v477_v38  ;;  %v487_v5 = vld [vmem:[%s14820_s0 + $0xeb0] sm:$0xff]  ;;  %v494_v38 = vld [vmem:[%s14820_s0 + $0xee8] sm:$0xff] }
  0xdc   :  { %v10944_v33 = vpop.f32.mrf.mxu0  ;;  %v10961_v40 = vpop.f32.mrf.mxu1 }
  0xde   :  { %v2197_v35 = vpop.f32.mrf.mxu0  ;;  %v10966_v42 = vpop.f32.mrf.mxu1  ;;  %9524 = vmatmul.mubr.msk.f32.gmra.mxu1 %vm530_vm1, %v478_v43  ;;  %v116_v43 = vld [vmem:[%s14820_s0 + $0x318] sm:$0xff] }
  0xdf   :  { %4702 = vxpose.xlu0.b32.cont [7/16] (narrow) %v2167_v15, 56  ;;  %9526 = vmatprep.mubr.msk.f32.mxu1 %vm530_vm1, %v479_v44 }
  0xe0   :  { %v10958_v39 = vpop.f32.mrf.mxu0  ;;  %v10975_v46 = vpop.f32.mrf.mxu1 }
  0xe2   :  { %v10964_v41 = vpop.f32.mrf.mxu0  ;;  %v10978_v48 = vpop.f32.mrf.mxu1  ;;  %9527 = vmatmul.mubr.msk.f32.gmra.mxu1 %vm530_vm1, %v480_v49  ;;  %v496_v49 = vld [vmem:[%s14820_s0 + $0xef8] sm:$0xff] }
  0xe3   :  { %4703 = vxpose.xlu0.b32.cont [8/16] (narrow) %v8844_v12, 56  ;;  %9529 = vmatprep.mubr.msk.f32.mxu1 %vm530_vm1, %v481_v50  ;;  %v488_v12 = vld [vmem:[%s14820_s0 + $0xeb8] sm:$0xff]  ;;  %v117_v50 = vld [vmem:[%s14820_s0 + $0x320] sm:$0xff] }
  0xe4   :  { %v8859_v45 = vpop.f32.mrf.mxu0  ;;  %v10987_v52 = vpop.f32.mrf.mxu1 }
  0xe6   :  { %v2217_v47 = vpop.f32.mrf.mxu0  ;;  %v10990_v54 = vpop.f32.mrf.mxu1  ;;  %9530 = vmatmul.mubr.msk.f32.gmra.mxu1 %vm530_vm1, %v482_v55 }
  0xe7   :  { %4704 = vxpose.xlu0.b32.cont [9/16] (narrow) %v2177_v21, 56  ;;  %4728 = vxpose.xlu1.b32.start [1/16] (narrow) %v2217_v47, 56  ;;  %v491_v21 = vld [vmem:[%s14820_s0 + $0xed0] sm:$0xff] }
  0xe8   :  { %v8862_v51 = vpop.f32.mrf.mxu0  ;;  %v10999_v58 = vpop.f32.mrf.mxu1  ;;  %9532 = vmatprep.mubr.msk.f32.mxu1 %vm530_vm1, %v483_v56 }
  0xea   :  { %v2227_v53 = vpop.f32.mrf.mxu0  ;;  %v11002_v60 = vpop.f32.mrf.mxu1  ;;  %9533 = vmatmul.mubr.msk.f32.gmra.mxu1 %vm530_vm1, %v484_v61  ;;  %v120_v61 = vld [vmem:[%s14820_s0 + $0x338] sm:$0xff] }
  0xeb   :  { %4705 = vxpose.xlu0.b32.cont [10/16] (narrow) %v8847_v19, 56  ;;  %4729 = vxpose.xlu1.b32.cont [2/16] (narrow) %v8859_v45, 56  ;;  %v490_v19 = vld [vmem:[%s14820_s0 + $0xec8] sm:$0xff] }
  0xec   :  { %v8865_v57 = vpop.f32.mrf.mxu0  ;;  %v11011_v0 = vpop.f32.mrf.mxu1  ;;  %9535 = vmatprep.mubr.msk.f32.mxu1 %vm530_vm1, %v485_v62 }
  0xee   :  { %v2237_v59 = vpop.f32.mrf.mxu0  ;;  %v11015_v3 = vpop.f32.mrf.mxu1  ;;  %9536 = vmatmul.mubr.msk.f32.gmra.mxu1 %vm530_vm1, %v486_v4 }
  0xef   :  { %4706 = vxpose.xlu0.b32.cont [11/16] (narrow) %v2187_v29, 56  ;;  %4730 = vxpose.xlu1.b32.cont [3/16] (narrow) %v2227_v53, 56  ;;  %v114_v29 = vld [vmem:[%s14820_s0 + $0x308] sm:$0xff] }
  0xf0   :  { %v8868_v63 = vpop.f32.mrf.mxu0  ;;  %v11026_v9 = vpop.f32.mrf.mxu1  ;;  %9538 = vmatprep.mubr.msk.f32.mxu1 %vm530_vm1, %v487_v5  ;;  %8978 = vmatmul.mubr.msk.f32.gmra.mxu0 %vm530_vm1, %v114_v29  ;;  %v500_v5 = vld [vmem:[%s14820_s0 + $0xf18] sm:$0xff] }
  0xf2   :  { %v2247_v1 = vpop.f32.mrf.mxu0  ;;  %v11029_v11 = vpop.f32.mrf.mxu1  ;;  %9539 = vmatmul.mubr.msk.f32.gmra.mxu1 %vm530_vm1, %v488_v12 }
  0xf3   :  { %4707 = vxpose.xlu0.b32.cont [12/16] (narrow) %v10925_v26, 56  ;;  %4731 = vxpose.xlu1.b32.cont [4/16] (narrow) %v8862_v51, 56  ;;  %v492_v26 = vld [vmem:[%s14820_s0 + $0xed8] sm:$0xff]  ;;  %v118_v51 = vld [vmem:[%s14820_s0 + $0x328] sm:$0xff] }
  0xf4   :  { %v11023_v7 = vpop.f32.mrf.mxu0  ;;  %9541 = vmatprep.mubr.msk.f32.mxu1 %vm530_vm1, %v489_v13  ;;  %v11044_v18 = vpop.f32.mrf.mxu1 }
  0xf6   :  { %v2257_v10 = vpop.f32.mrf.mxu0  ;;  %9542 = vmatmul.mubr.msk.f32.gmra.mxu1 %vm530_vm1, %v490_v19  ;;  %v11055_v24 = vpop.f32.mrf.mxu1  ;;  %v502_v19 = vld [vmem:[%s14820_s0 + $0xf28] sm:$0xff] }
  0xf7   :  { %4708 = vxpose.xlu0.b32.cont [13/16] (narrow) %v2197_v35, 56  ;;  %4732 = vxpose.xlu1.b32.cont [5/16] (narrow) %v2237_v59, 56  ;;  %v119_v59 = vld [vmem:[%s14820_s0 + $0x330] sm:$0xff] }
  0xf8   :  { %v11037_v15 = vpop.f32.mrf.mxu0  ;;  %9544 = vmatprep.mubr.msk.f32.mxu1 %vm530_vm1, %v491_v21  ;;  %v123_v21 = vld [vmem:[%s14820_s0 + $0x350] sm:$0xff] }
  0xfa   :  { %v11041_v17 = vpop.f32.mrf.mxu0  ;;  %9545 = vmatmul.mubr.msk.f32.gmra.mxu1 %vm530_vm1, %v492_v26  ;;  %v124_v26 = vld [vmem:[%s14820_s0 + $0x358] sm:$0xff] }
  0xfb   :  { %4709 = vxpose.xlu0.b32.cont [14/16] (narrow) %v10944_v33, 56  ;;  %4733 = vxpose.xlu1.b32.cont [6/16] (narrow) %v8865_v57, 56  ;;  %v11077_v33 = vpop.f32.mrf.mxu1  ;;  %v498_v57 = vld [vmem:[%s14820_s0 + $0xf08] sm:$0xff] }
  0xfc   :  { %v11052_v23 = vpop.f32.mrf.mxu0  ;;  %9547 = vmatprep.mubr.msk.f32.mxu1 %vm530_vm1, %v493_v32  ;;  %v504_v32 = vld [vmem:[%s14820_s0 + $0xf38] sm:$0xff] }
  0xfd   :  { %v11084_v37 = vpop.f32.mrf.mxu1 }
  0xfe   :  { %v11058_v25 = vpop.f32.mrf.mxu0  ;;  %9548 = vmatmul.mubr.msk.f32.gmra.mxu1 %vm530_vm1, %v494_v38  ;;  %v125_v38 = vld [vmem:[%s14820_s0 + $0x360] sm:$0xff] }
  0xff   :  { %4710 = vxpose.xlu0.b32.cont [15/16] (narrow) %v10964_v41, 56  ;;  %4734 = vxpose.xlu1.b32.cont [7/16] (narrow) %v2247_v1, 56  ;;  %v115_v41 = vld [vmem:[%s14820_s0 + $0x310] sm:$0xff]  ;;  %v11107_v47 = vpop.f32.mrf.mxu1 }
 0x100   :  { %v11070_v31 = vpop.f32.mrf.mxu0  ;;  %8980 = vmatprep.mubr.msk.f32.mxu0 %vm530_vm1, %v115_v41  ;;  %v126_v41 = vld [vmem:[%s14820_s0 + $0x368] sm:$0xff] }
 0x101   :  { %8981 = vmatmul.mubr.msk.f32.gmra.mxu0 %vm530_vm1, %v116_v43  ;;  %v11125_v55 = vpop.f32.mrf.mxu1 }
 0x102   :  { %v11081_v35 = vpop.f32.mrf.mxu0  ;;  %8983 = vmatprep.mubr.msk.f32.mxu0 %vm530_vm1, %v117_v50  ;;  %v127_v50 = vld [vmem:[%s14820_s0 + $0x370] sm:$0xff] }
 0x103   :  { %4711 = vxpose.xlu0.b32.end [16/16] (narrow) %v10958_v39, 56  ;;  %4735 = vxpose.xlu1.b32.cont [8/16] (narrow) %v8868_v63, 56  ;;  %v495_v39 = vld [vmem:[%s14820_s0 + $0xef0] sm:$0xff]  ;;  %v11149_v63 = vpop.f32.mrf.mxu1 }
 0x104   :  { %v11095_v44 = vpop.f32.mrf.mxu0  ;;  %9550 = vmatprep.mubr.msk.f32.mxu1 %vm530_vm1, %v495_v39 }
 0x105   :  { %9551 = vmatmul.mubr.msk.f32.gmra.mxu1 %vm530_vm1, %v496_v49  ;;  %8984 = vmatmul.mubr.msk.f32.gmra.mxu0 %vm530_vm1, %v118_v51  ;;  %v11157_v4 = vpop.f32.mrf.mxu1  ;;  %v506_v49 = vld [vmem:[%s14820_s0 + $0xf48] sm:$0xff]  ;;  %v128_v51 = vld [vmem:[%s14820_s0 + $0x378] sm:$0xff] }
 0x106   :  { %v11104_v45 = vpop.f32.mrf.mxu0  ;;  %8986 = vmatprep.mubr.msk.f32.mxu0 %vm530_vm1, %v119_v59  ;;  %v508_v59 = vld [vmem:[%s14820_s0 + $0xf58] sm:$0xff] }
 0x107   :  { %5400 = vxpose.xlu0.b32.start [1/16] (narrow) %v10879_v6, 56  ;;  %4736 = vxpose.xlu1.b32.cont [9/16] (narrow) %v2257_v10, 56  ;;  %v497_v6 = vld [vmem:[%s14820_s0 + $0xf00] sm:$0xff]  ;;  %v122_v10 = vld [vmem:[%s14820_s0 + $0x348] sm:$0xff] }
 0x108   :  { %v11118_v53 = vpop.f32.mrf.mxu0  ;;  %9553 = vmatprep.mubr.msk.f32.mxu1 %vm530_vm1, %v497_v6 }
 0x109   :  { %9554 = vmatmul.mubr.msk.f32.gmra.mxu1 %vm530_vm1, %v498_v57  ;;  %8987 = vmatmul.mubr.msk.f32.gmra.mxu0 %vm530_vm1, %v120_v61  ;;  %v129_v61 = vld [vmem:[%s14820_s0 + $0x380] sm:$0xff] }
 0x10a   :  { %v11129_v56 = vpop.f32.mrf.mxu0 }
 0x10b   :  { %5401 = vxpose.xlu0.b32.cont [2/16] (narrow) %v10870_v2, 56  ;;  %4737 = vxpose.xlu1.b32.cont [10/16] (narrow) %v11023_v7, 56  ;;  %v499_v2 = vld [vmem:[%s14820_s0 + $0xf10] sm:$0xff]  ;;  %v121_v7 = vld [vmem:[%s14820_s0 + $0x340] sm:$0xff] }
 0x10c   :  { %v11142_v62 = vpop.f32.mrf.mxu0  ;;  %9556 = vmatprep.mubr.msk.f32.mxu1 %vm530_vm1, %v499_v2  ;;  %8989 = vmatprep.mubr.msk.f32.mxu0 %vm530_vm1, %v121_v7  ;;  %v130_v2 = vld [vmem:[%s14820_s0 + $0x388] sm:$0xff] }
 0x10d   :  { %9557 = vmatmul.mubr.msk.f32.gmra.mxu1 %vm530_vm1, %v500_v5  ;;  %8990 = vmatmul.mubr.msk.f32.gmra.mxu0 %vm530_vm1, %v122_v10  ;;  %v510_v10 = vld [vmem:[%s14820_s0 + $0xf68] sm:$0xff] }
 0x10e   :  { %v11153_v1 = vpop.f32.mrf.mxu0  ;;  %8992 = vmatprep.mubr.msk.f32.mxu0 %vm530_vm1, %v123_v21 }
 0x10f   :  { %5402 = vxpose.xlu0.b32.cont [3/16] (narrow) %v10898_v14, 56  ;;  %4738 = vxpose.xlu1.b32.cont [11/16] (narrow) %v11041_v17, 56  ;;  %v501_v14 = vld [vmem:[%s14820_s0 + $0xf20] sm:$0xff]  ;;  %v11181_v17 = vpop.f32.mrf.mxu1 }
 0x110   :  { %v11168_v12 = vpop.f32.mrf.mxu0  ;;  %9559 = vmatprep.mubr.msk.f32.mxu1 %vm530_vm1, %v501_v14  ;;  %v131_v14 = vld [vmem:[%s14820_s0 + $0x390] sm:$0xff] }
 0x111   :  { %9560 = vmatmul.mubr.msk.f32.gmra.mxu1 %vm530_vm1, %v502_v19  ;;  %8993 = vmatmul.mubr.msk.f32.gmra.mxu0 %vm530_vm1, %v124_v26  ;;  %v132_v19 = vld [vmem:[%s14820_s0 + $0x398] sm:$0xff] }
 0x112   :  { %v11177_v13 = vpop.f32.mrf.mxu0  ;;  %8995 = vmatprep.mubr.msk.f32.mxu0 %vm530_vm1, %v125_v38  ;;  %v134_v38 = vld [vmem:[%s14820_s0 + $0x3a8] sm:$0xff] }
 0x113   :  { %5403 = vxpose.xlu0.b32.cont [4/16] (narrow) %v10882_v8, 56  ;;  %4739 = vxpose.xlu1.b32.cont [12/16] (narrow) %v11037_v15, 56  ;;  %v503_v8 = vld [vmem:[%s14820_s0 + $0xf30] sm:$0xff]  ;;  %v11199_v15 = vpop.f32.mrf.mxu1 }
 0x114   :  { %v11192_v27 = vpop.f32.mrf.mxu0  ;;  %9562 = vmatprep.mubr.msk.f32.mxu1 %vm530_vm1, %v503_v8  ;;  %v512_v8 = vld [vmem:[%s14820_s0 + $0xf78] sm:$0xff] }
 0x115   :  { %9563 = vmatmul.mubr.msk.f32.gmra.mxu1 %vm530_vm1, %v504_v32  ;;  %8996 = vmatmul.mubr.msk.f32.gmra.mxu0 %vm530_vm1, %v126_v41  ;;  %v133_v32 = vld [vmem:[%s14820_s0 + $0x3a0] sm:$0xff] }
 0x116   :  { %v11203_v29 = vpop.f32.mrf.mxu0  ;;  %8998 = vmatprep.mubr.msk.f32.mxu0 %vm530_vm1, %v127_v50  ;;  %v5735_v50 = vld [vmem:[%s14821_s1 + $0x78] sm:$0xff] }
 0x117   :  { %5404 = vxpose.xlu0.b32.cont [5/16] (narrow) %v10911_v20, 56  ;;  %4740 = vxpose.xlu1.b32.cont [13/16] (narrow) %v11058_v25, 56  ;;  %v505_v20 = vld [vmem:[%s14820_s0 + $0xf40] sm:$0xff]  ;;  %v11223_v25 = vpop.f32.mrf.mxu1 }
 0x118   :  { %v11216_v43 = vpop.f32.mrf.mxu0  ;;  %9565 = vmatprep.mubr.msk.f32.mxu1 %vm530_vm1, %v505_v20  ;;  %9601 = vmatprep.subr.mxu1 %v5735_v50 }
 0x119   :  { %9566 = vmatmul.mubr.msk.f32.gmra.mxu1 %vm530_vm1, %v506_v49  ;;  %8999 = vmatmul.mubr.msk.f32.gmra.mxu0 %vm530_vm1, %v128_v51  ;;  %v514_v49 = vld [vmem:[%s14820_s0 + $0xf88] sm:$0xff]  ;;  %v135_v51 = vld [vmem:[%s14820_s0 + $0x3b0] sm:$0xff] }
 0x11a   :  { %v11227_v39 = vpop.f32.mrf.mxu0  ;;  %9001 = vmatprep.mubr.msk.f32.mxu0 %vm530_vm1, %v129_v61  ;;  %9602 = vmatpush3.msra.mxu1 %v5735_v50  ;;  %v515_v61 = vld [vmem:[%s14820_s0 + $0xf90] sm:$0xff] }
 0x11b   :  { %5405 = vxpose.xlu0.b32.cont [6/16] (narrow) %v10902_v16, 56  ;;  %4741 = vxpose.xlu1.b32.cont [14/16] (narrow) %v11052_v23, 56  ;;  %v507_v16 = vld [vmem:[%s14820_s0 + $0xf50] sm:$0xff]  ;;  %v11247_v23 = vpop.f32.mrf.mxu1 }
 0x11c   :  { %v11240_v6 = vpop.f32.mrf.mxu0  ;;  %9568 = vmatprep.mubr.msk.f32.mxu1 %vm530_vm1, %v507_v16  ;;  %v5730_v50 = vld [vmem:[%s14821_s1 + $0x50] sm:$0xff] }
 0x11d   :  { %9569 = vmatmul.mubr.msk.f32.gmra.mxu1 %vm530_vm1, %v508_v59  ;;  %9002 = vmatmul.mubr.msk.f32.gmra.mxu0 %vm530_vm1, %v130_v2  ;;  %v516_v2 = vld [vmem:[%s14820_s0 + $0xf98] sm:$0xff] }
 0x11e   :  { %v11251_v57 = vpop.f32.mrf.mxu0  ;;  %9004 = vmatprep.mubr.msk.f32.mxu0 %vm530_vm1, %v131_v14 }
 0x11f   :  { %5406 = vxpose.xlu0.b32.cont [7/16] (narrow) %v10932_v28, 56  ;;  %4742 = vxpose.xlu1.b32.cont [15/16] (narrow) %v11081_v35, 56  ;;  %v509_v28 = vld [vmem:[%s14820_s0 + $0xf60] sm:$0xff]  ;;  %v11271_v35 = vpop.f32.mrf.mxu1 }
 0x120   :  { %v11264_v5 = vpop.f32.mrf.mxu0  ;;  %9571 = vmatprep.mubr.msk.f32.mxu1 %vm530_vm1, %v509_v28  ;;  %v5733_v28 = vld [vmem:[%s14821_s1 + $0x68] sm:$0xff] }
 0x121   :  { %9572 = vmatmul.mubr.msk.f32.gmra.mxu1 %vm530_vm1, %v510_v10  ;;  %9005 = vmatmul.mubr.msk.f32.gmra.mxu0 %vm530_vm1, %v132_v19  ;;  %v137_v10 = vld [vmem:[%s14820_s0 + $0x3c0] sm:$0xff] }
 0x122   :  { %v11275_v7 = vpop.f32.mrf.mxu0  ;;  %9007 = vmatprep.mubr.msk.f32.mxu0 %vm530_vm1, %v133_v32  ;;  %v5732_v19 = vld [vmem:[%s14821_s1 + $0x60] sm:$0xff]  ;;  %v518_v32 = vld [vmem:[%s14820_s0 + $0xfa8] sm:$0xff] }
 0x123   :  { %5407 = vxpose.xlu0.b32.cont [8/16] (narrow) %v10914_v22, 56  ;;  %4743 = vxpose.xlu1.b32.end [16/16] (narrow) %v11070_v31, 56  ;;  %v511_v22 = vld [vmem:[%s14820_s0 + $0xf70] sm:$0xff]  ;;  %v11295_v31 = vpop.f32.mrf.mxu1 }
 0x124   :  { %v11288_v21 = vpop.f32.mrf.mxu0  ;;  %9574 = vmatprep.mubr.msk.f32.mxu1 %vm530_vm1, %v511_v22 }
 0x125   :  { %9575 = vmatmul.mubr.msk.f32.gmra.mxu1 %vm530_vm1, %v512_v8  ;;  %9008 = vmatmul.mubr.msk.f32.gmra.mxu0 %vm530_vm1, %v134_v38  ;;  %v517_v8 = vld [vmem:[%s14820_s0 + $0xfa0] sm:$0xff]  ;;  %v5731_v38 = vld [vmem:[%s14821_s1 + $0x58] sm:$0xff] }
 0x126   :  { %v11299_v26 = vpop.f32.mrf.mxu0  ;;  %9010 = vmatprep.mubr.msk.f32.mxu0 %vm530_vm1, %v135_v51  ;;  %v519_v51 = vld [vmem:[%s14820_s0 + $0xfb0] sm:$0xff] }
 0x127   :  { %5408 = vxpose.xlu0.b32.cont [9/16] (narrow) %v10947_v34, 56  ;;  %5432 = vxpose.xlu1.b32.start [1/16] (narrow) %v10999_v58, 56  ;;  %v513_v34 = vld [vmem:[%s14820_s0 + $0xf80] sm:$0xff]  ;;  %v11319_v58 = vpop.f32.mrf.mxu1 }
 0x128   :  { %v11312_v41 = vpop.f32.mrf.mxu0  ;;  %9577 = vmatprep.mubr.msk.f32.mxu1 %vm530_vm1, %v513_v34 }
 0x129   :  { %9578 = vmatmul.mubr.msk.f32.gmra.mxu1 %vm530_vm1, %v514_v49  ;;  %v11345_v59 = vpop.f32.mrf.mxu1  ;;  %v140_v49 = vld [vmem:[%s14820_s0 + $0x3d8] sm:$0xff] }
 0x12a   :  { %v11323_v20 = vpop.f32.mrf.mxu0  ;;  %9580 = vmatprep.mubr.msk.f32.mxu1 %vm530_vm1, %v515_v61  ;;  %v141_v61 = vld [vmem:[%s14820_s0 + $0x3e0] sm:$0xff] }
 0x12b   :  { %5409 = vxpose.xlu0.b32.cont [10/16] (narrow) %v10936_v30, 56  ;;  %5433 = vxpose.xlu1.b32.cont [2/16] (narrow) %v10990_v54, 56  ;;  %v136_v30 = vld [vmem:[%s14820_s0 + $0x3b8] sm:$0xff]  ;;  %v5734_v54 = vld [vmem:[%s14821_s1 + $0x70] sm:$0xff] }
 0x12c   :  { %v11336_v16 = vpop.f32.mrf.mxu0  ;;  %9011 = vmatmul.mubr.msk.f32.gmra.mxu0 %vm530_vm1, %v136_v30  ;;  %9603 = vmatprep.subr.mxu1 %v5734_v54 }
 0x12d   :  { %9604 = vmatpush3.msra.mxu1 %v5734_v54  ;;  %9013 = vmatprep.mubr.msk.f32.mxu0 %vm530_vm1, %v137_v10 }
 0x12e   :  { %v11363_v14 = vpop.f32.mrf.mxu0  ;;  %9581 = vmatmul.mubr.msk.f32.gmra.mxu1 %vm530_vm1, %v516_v2  ;;  %9605 = vmatprep.subr.mxu1 %v5733_v28  ;;  %v142_v2 = vld [vmem:[%s14820_s0 + $0x3e8] sm:$0xff] }
 0x12f   :  { %5410 = vxpose.xlu0.b32.cont [11/16] (narrow) %v10961_v40, 56  ;;  %5434 = vxpose.xlu1.b32.cont [3/16] (narrow) %v11011_v0, 56  ;;  %v11366_v40 = vpop.f32.mrf.mxu1  ;;  %v138_v0 = vld [vmem:[%s14820_s0 + $0x3c8] sm:$0xff] }
 0x130   :  { %v11375_v22 = vpop.f32.mrf.mxu0  ;;  %9606 = vmatpush3.msra.mxu1 %v5733_v28  ;;  %9014 = vmatmul.mubr.msk.f32.gmra.mxu0 %vm530_vm1, %v138_v0  ;;  %v5728_v28 = vld [vmem:[%s14821_s1 + $0x40] sm:$0xff] }
 0x131   :  { %9607 = vmatprep.subr.mxu1 %v5732_v19  ;;  %v11390_v34 = vpop.f32.mrf.mxu1  ;;  %9583 = vmatprep.mubr.msk.f32.mxu1 %vm530_vm1, %v517_v8  ;;  %v5727_v8 = vld [vmem:[%s14821_s1 + $0x38] sm:$0xff] }
 0x132   :  { %9608 = vmatpush3.msra.mxu1 %v5732_v19  ;;  %v522_v19 = vld [vmem:[%s14820_s0 + $0xfc8] sm:$0xff] }
 0x133   :  { %5411 = vxpose.xlu0.b32.cont [12/16] (narrow) %v10950_v36, 56  ;;  %5435 = vxpose.xlu1.b32.cont [4/16] (narrow) %v11002_v60, 56  ;;  %v139_v36 = vld [vmem:[%s14820_s0 + $0x3d0] sm:$0xff]  ;;  %v11396_v60 = vpop.f32.mrf.mxu0  ;;  %v11413_v54 = vpop.f32.mrf.mxu1 }
 0x134   :  { %9584 = vmatmul.mubr.msk.f32.gmra.mxu1 %vm530_vm1, %v518_v32  ;;  %9609 = vmatprep.subr.mxu1 %v5731_v38  ;;  %v143_v32 = vld [vmem:[%s14820_s0 + $0x3f0] sm:$0xff] }
 0x135   :  { %v11410_v30 = vpop.f32.mrf.mxu0  ;;  %9016 = vmatprep.mubr.msk.f32.mxu0 %vm530_vm1, %v139_v36  ;;  %9610 = vmatpush3.msra.mxu1 %v5731_v38  ;;  %v11437_v0 = vpop.f32.mrf.mxu1  ;;  %v144_v36 = vld [vmem:[%s14820_s0 + $0x3f8] sm:$0xff] }
 0x136   :  { %9017 = vmatmul.mubr.msk.f32.gmra.mxu0 %vm530_vm1, %v140_v49  ;;  %9611 = vmatprep.subr.mxu1 %v5730_v50  ;;  %v523_v49 = vld [vmem:[%s14820_s0 + $0xfd0] sm:$0xff] }
 0x137   :  { %5412 = vxpose.xlu0.b32.cont [13/16] (narrow) %v10975_v46, 56  ;;  %5436 = vxpose.xlu1.b32.cont [5/16] (narrow) %v11026_v9, 56  ;;  %v520_v46 = vld [vmem:[%s14820_s0 + $0xfb8] sm:$0xff]  ;;  %v5729_v9 = vld [vmem:[%s14821_s1 + $0x48] sm:$0xff]  ;;  %v11434_v10 = vpop.f32.mrf.mxu0  ;;  %v11458_v38 = vpop.f32.mrf.mxu1 }
 0x138   :  { %9586 = vmatprep.mubr.msk.f32.mxu1 %vm530_vm1, %v519_v51  ;;  %9612 = vmatpush3.msra.mxu1 %v5730_v50  ;;  %v524_v50 = vld [vmem:[%s14820_s0 + $0xfd8] sm:$0xff]  ;;  %v5725_v51 = vld [vmem:[%s14821_s1 + $0x28] sm:$0xff] }
 0x139   :  { %9587 = vmatmul.mubr.msk.f32.gmra.mxu1 %vm530_vm1, %v520_v46  ;;  %9613 = vmatprep.subr.mxu1 %v5729_v9 }
 0x13a   :  { %9019 = vmatprep.mubr.msk.f32.mxu0 %vm530_vm1, %v141_v61  ;;  %9614 = vmatpush3.msra.mxu1 %v5729_v9  ;;  %v11484_v9 = vpop.f32.mrf.mxu1  ;;  %v5724_v61 = vld [vmem:[%s14821_s1 + $0x20] sm:$0xff] }
 0x13b   :  { %5413 = vxpose.xlu0.b32.cont [14/16] (narrow) %v10966_v42, 56  ;;  %5437 = vxpose.xlu1.b32.cont [6/16] (narrow) %v11015_v3, 56  ;;  %v521_v42 = vld [vmem:[%s14820_s0 + $0xfc0] sm:$0xff]  ;;  %v11443_v3 = vpop.f32.mrf.mxu0 }
 0x13c   :  { %9020 = vmatmul.mubr.msk.f32.gmra.mxu0 %vm530_vm1, %v142_v2  ;;  %9615 = vmatprep.subr.mxu1 %v5728_v28  ;;  %v525_v2 = vld [vmem:[%s14820_s0 + $0xfe0] sm:$0xff] }
 0x13d   :  { %9589 = vmatprep.mubr.msk.f32.mxu1 %vm530_vm1, %v521_v42  ;;  %9616 = vmatpush3.msra.mxu1 %v5728_v28  ;;  %v11505_v42 = vpop.f32.mrf.mxu1 }
 0x13e   :  { %9590 = vmatmul.mubr.msk.f32.gmra.mxu1 %vm530_vm1, %v522_v19  ;;  %9617 = vmatprep.subr.mxu1 %v5727_v8 }
 0x13f   :  { %5414 = vxpose.xlu0.b32.cont [15/16] (narrow) %v10987_v52, 56  ;;  %5438 = vxpose.xlu1.b32.cont [7/16] (narrow) %v11044_v18, 56  ;;  %v5726_v52 = vld [vmem:[%s14821_s1 + $0x30] sm:$0xff]  ;;  %v11467_v18 = vpop.f32.mrf.mxu0 }
 0x140   :  { %9022 = vmatprep.mubr.msk.f32.mxu0 %vm530_vm1, %v143_v32  ;;  %9618 = vmatpush3.msra.mxu1 %v5727_v8  ;;  %v147_v8 = vld [vmem:[%s14820_s0 + $0x410] sm:$0xff] }
 0x141   :  { %v11481_v46 = vpop.f32.mrf.mxu0  ;;  %9023 = vmatmul.mubr.msk.f32.gmra.mxu0 %vm530_vm1, %v144_v36  ;;  %9619 = vmatprep.subr.mxu1 %v5726_v52  ;;  %v5722_v32 = vld [vmem:[%s14821_s1 + $0x10] sm:$0xff]  ;;  %v148_v36 = vld [vmem:[%s14820_s0 + $0x418] sm:$0xff] }
 0x142   :  { %9592 = vmatprep.mubr.msk.f32.mxu1 %vm530_vm1, %v523_v49  ;;  %9620 = vmatpush3.msra.mxu1 %v5726_v52  ;;  %v11531_v49 = vpop.f32.mrf.mxu1 }
 0x143   :  { %5415 = vxpose.xlu0.b32.end [16/16] (narrow) %v10978_v48, 56  ;;  %5439 = vxpose.xlu1.b32.cont [8/16] (narrow) %v11029_v11, 56  ;;  %v145_v48 = vld [vmem:[%s14820_s0 + $0x400] sm:$0xff]  ;;  %v146_v11 = vld [vmem:[%s14820_s0 + $0x408] sm:$0xff]  ;;  %v11502_v28 = vpop.f32.mrf.mxu0  ;;  %v11529_v52 = vpop.trf.xlu0 }
 0x144   :  { %9593 = vmatmul.mubr.msk.f32.gmra.mxu1 %vm530_vm1, %v524_v50  ;;  %9621 = vmatprep.subr.mxu1 %v5725_v51  ;;  %14824 = vst [vmem:[#allocation2_spill] sm:$0xff] %v11529_v52  ;;  %v528_v50 = vld [vmem:[%s14820_s0 + $0xff8] sm:$0xff] }
 0x145   :  { %9025 = vmatprep.mubr.msk.f32.mxu0 %vm530_vm1, %v145_v48  ;;  %9622 = vmatpush3.msra.mxu1 %v5725_v51  ;;  %v11514_v19 = vpop.f32.mrf.mxu0  ;;  %v5721_v51 = vld [vmem:[%s14821_s1 + $0x8] sm:$0xff]  ;;  %v149_v48 = vld [vmem:[%s14820_s0 + $0x420] sm:$0xff] }
 0x146   :  { %9026 = vmatmul.mubr.msk.f32.gmra.mxu0 %vm530_vm1, %v146_v11  ;;  %9623 = vmatprep.subr.mxu1 %v5724_v61 }
 0x147   :  { %5440 = vxpose.xlu1.b32.cont [9/16] (narrow) %v11077_v33, 56  ;;  %4760 = vxpose.xlu0.b32.start [1/16] (narrow) %v11104_v45, 56  ;;  %v526_v33 = vld [vmem:[%s14820_s0 + $0xfe8] sm:$0xff]  ;;  %v5723_v45 = vld [vmem:[%s14821_s1 + $0x18] sm:$0xff] }
 0x148   :  { %9595 = vmatprep.mubr.msk.f32.mxu1 %vm530_vm1, %v525_v2  ;;  %9624 = vmatpush3.msra.mxu1 %v5724_v61  ;;  %v11554_v61 = vpop.f32.mrf.mxu1  ;;  %v4713_v2 = vpop.trf.xlu0 }
 0x149   :  { %9596 = vmatmul.mubr.msk.f32.gmra.mxu1 %vm530_vm1, %v526_v33  ;;  %9625 = vmatprep.subr.mxu1 %v5723_v45  ;;  %v151_v33 = vld [vmem:[%s14820_s0 + $0x430] sm:$0xff] }
 0x14a   :  { %9028 = vmatprep.mubr.msk.f32.mxu0 %vm530_vm1, %v147_v8  ;;  %9626 = vmatpush3.msra.mxu1 %v5723_v45  ;;  %v152_v8 = vld [vmem:[%s14820_s0 + $0x438] sm:$0xff] }
 0x14b   :  { %5441 = vxpose.xlu1.b32.cont [10/16] (narrow) %v11055_v24, 56  ;;  %4761 = vxpose.xlu0.b32.cont [2/16] (narrow) %v11095_v44, 56  ;;  %v527_v24 = vld [vmem:[%s14820_s0 + $0xff0] sm:$0xff]  ;;  %v11537_v44 = vpop.f32.mrf.mxu0 }
 0x14c   :  { %9627 = vmatprep.subr.mxu1 %v5722_v32  ;;  %9029 = vmatmul.mubr.msk.f32.gmra.mxu0 %vm530_vm1, %v148_v36  ;;  %v155_v36 = vld [vmem:[%s14820_s0 + $0x450] sm:$0xff] }
 0x14d   :  { %v11551_v11 = vpop.f32.mrf.mxu0  ;;  %9598 = vmatprep.mubr.msk.f32.mxu1 %vm530_vm1, %v527_v24  ;;  %9628 = vmatpush3.msra.mxu1 %v5722_v32  ;;  %v154_v32 = vld [vmem:[%s14820_s0 + $0x448] sm:$0xff]  ;;  %v157_v24 = vld [vmem:[%s14820_s0 + $0x460] sm:$0xff] }
 0x14e   :  { %9599 = vmatmul.mubr.msk.f32.gmra.mxu1 %vm530_vm1, %v528_v50  ;;  %9629 = vmatprep.subr.mxu1 %v5721_v51  ;;  %v159_v50 = vld [vmem:[%s14820_s0 + $0x470] sm:$0xff] }
 0x14f   :  { %5442 = vxpose.xlu1.b32.cont [11/16] (narrow) %v11107_v47, 56  ;;  %4762 = vxpose.xlu0.b32.cont [3/16] (narrow) %v11129_v56, 56  ;;  %v5720_v47 = vld [vmem:[%s14821_s1] sm:$0xff]  ;;  %v150_v56 = vld [vmem:[%s14820_s0 + $0x428] sm:$0xff]  ;;  %v11569_v45 = vpop.f32.mrf.mxu0 }
 0x150   :  { %9031 = vmatprep.mubr.msk.f32.mxu0 %vm530_vm1, %v149_v48  ;;  %9630 = vmatpush3.msra.mxu1 %v5721_v51  ;;  %v160_v48 = vld [vmem:[%s14820_s0 + $0x478] sm:$0xff] }
 0x151   :  { %9631 = vmatprep.subr.mxu1 %v5720_v47  ;;  %9032 = vmatmul.mubr.msk.f32.gmra.mxu0 %vm530_vm1, %v150_v56 }
 0x152   :  { %9632 = vmatpush3.msra.mxu1 %v5720_v47  ;;  %9633 = vmatprep.mubr.f32.mxu1 %v4713_v2  ;;  %v162_v2 = vld [vmem:[%s14820_s0 + $0x488] sm:$0xff] }
 0x153   :  { %5443 = vxpose.xlu1.b32.cont [12/16] (narrow) %v11084_v37, 56  ;;  %4763 = vxpose.xlu0.b32.cont [4/16] (narrow) %v11118_v53, 56  ;;  %v153_v37 = vld [vmem:[%s14820_s0 + $0x440] sm:$0xff]  ;;  %v11581_v53 = vpop.f32.mrf.mxu0 }
 0x154   :  { %9034 = vmatprep.mubr.msk.f32.mxu0 %vm530_vm1, %v151_v33  ;;  %v164_v33 = vld [vmem:[%s14820_s0 + $0x498] sm:$0xff] }
 0x155   :  { %9035 = vmatmul.mubr.msk.f32.gmra.mxu0 %vm530_vm1, %v152_v8  ;;  %v165_v8 = vld [vmem:[%s14820_s0 + $0x4a0] sm:$0xff] }
 0x156   :  { %9037 = vmatprep.mubr.msk.f32.mxu0 %vm530_vm1, %v153_v37  ;;  %v167_v37 = vld [vmem:[%s14820_s0 + $0x4b0] sm:$0xff] }
 0x157   :  { %5444 = vxpose.xlu1.b32.cont [13/16] (narrow) %v11149_v63, 56  ;;  %4764 = vxpose.xlu0.b32.cont [5/16] (narrow) %v11153_v1, 56  ;;  %v11593_v63 = vpop.f32.mrf.mxu0  ;;  %v156_v1 = vld [vmem:[%s14820_s0 + $0x458] sm:$0xff] }
 0x159   :  { %9038 = vmatmul.mubr.msk.f32.gmra.mxu0 %vm530_vm1, %v154_v32  ;;  %v169_v32 = vld [vmem:[%s14820_s0 + $0x4c0] sm:$0xff] }
 0x15a   :  { %9040 = vmatprep.mubr.msk.f32.mxu0 %vm530_vm1, %v155_v36  ;;  %v171_v36 = vld [vmem:[%s14820_s0 + $0x4d0] sm:$0xff] }
 0x15b   :  { %5445 = vxpose.xlu1.b32.cont [14/16] (narrow) %v11125_v55, 56  ;;  %4765 = vxpose.xlu0.b32.cont [6/16] (narrow) %v11142_v62, 56  ;;  %v11605_v55 = vpop.f32.mrf.mxu0  ;;  %v158_v62 = vld [vmem:[%s14820_s0 + $0x468] sm:$0xff] }
 0x15d   :  { %9041 = vmatmul.mubr.msk.f32.gmra.mxu0 %vm530_vm1, %v156_v1  ;;  %v11621_v51 = vpop.f32.mrf.mxu0  ;;  %v173_v1 = vld [vmem:[%s14820_s0 + $0x4e0] sm:$0xff] }
 0x15e   :  { %9043 = vmatprep.mubr.msk.f32.mxu0 %vm530_vm1, %v157_v24  ;;  %v175_v24 = vld [vmem:[%s14820_s0 + $0x4f0] sm:$0xff] }
 0x15f   :  { %5446 = vxpose.xlu1.b32.cont [15/16] (narrow) %v11181_v17, 56  ;;  %4766 = vxpose.xlu0.b32.cont [7/16] (narrow) %v11177_v13, 56  ;;  %v11619_v13 = vpop.f32.mrf.mxu1  ;;  %v11635_v56 = vpop.f32.mrf.mxu0 }
 0x161   :  { %9044 = vmatmul.mubr.msk.f32.gmra.mxu0 %vm530_vm1, %v158_v62  ;;  %v11633_v47 = vpop.f32.mrf.mxu1  ;;  %v177_v62 = vld [vmem:[%s14820_s0 + $0x500] sm:$0xff] }
 0x162   :  { %9046 = vmatprep.mubr.msk.f32.mxu0 %vm530_vm1, %v159_v50  ;;  %v179_v50 = vld [vmem:[%s14820_s0 + $0x510] sm:$0xff] }
 0x163   :  { %5447 = vxpose.xlu1.b32.end [16/16] (narrow) %v11157_v4, 56  ;;  %4767 = vxpose.xlu0.b32.cont [8/16] (narrow) %v11168_v12, 56  ;;  %v11617_v17 = vpop.trf.xlu1  ;;  %v161_v4 = vld [vmem:[%s14820_s0 + $0x480] sm:$0xff] }
 0x164   :  { %14825 = vst [vmem:[#allocation3_spill] sm:$0xff] %v11617_v17 }
 0x165   :  { %9047 = vmatmul.mubr.msk.f32.gmra.mxu0 %vm530_vm1, %v160_v48  ;;  %v181_v48 = vld [vmem:[%s14820_s0 + $0x520] sm:$0xff] }
 0x166   :  { %9049 = vmatprep.mubr.msk.f32.mxu0 %vm530_vm1, %v161_v4  ;;  %v183_v4 = vld [vmem:[%s14820_s0 + $0x530] sm:$0xff] }
 0x167   :  { %4768 = vxpose.xlu0.b32.cont [9/16] (narrow) %v11203_v29, 56  ;;  %4792 = vxpose.xlu1.b32.start [1/16] (narrow) %v11299_v26, 56  ;;  %v4745_v12 = vpop.trf.xlu1  ;;  %v163_v29 = vld [vmem:[%s14820_s0 + $0x490] sm:$0xff]  ;;  %v11647_v26 = vpop.f32.mrf.mxu0 }
 0x168   :  { %9634 = vmatmul.mubr.f32.vlgmr.msra.gmra.mxu1 %v4745_v12  ;;  %v184_v12 = vld [vmem:[%s14820_s0 + $0x538] sm:$0xff] }
 0x169   :  { %9050 = vmatmul.mubr.msk.f32.gmra.mxu0 %vm530_vm1, %v162_v2 }
 0x16a   :  { %9052 = vmatprep.mubr.msk.f32.mxu0 %vm530_vm1, %v163_v29  ;;  %v186_v29 = vld [vmem:[%s14820_s0 + $0x548] sm:$0xff] }
 0x16b   :  { %4769 = vxpose.xlu0.b32.cont [10/16] (narrow) %v11192_v27, 56  ;;  %4793 = vxpose.xlu1.b32.cont [2/16] (narrow) %v11288_v21, 56  ;;  %v11659_v27 = vpop.f32.mrf.mxu0  ;;  %v166_v21 = vld [vmem:[%s14820_s0 + $0x4a8] sm:$0xff] }
 0x16d   :  { %9053 = vmatmul.mubr.msk.f32.gmra.mxu0 %vm530_vm1, %v164_v33 }
 0x16e   :  { %9055 = vmatprep.mubr.msk.f32.mxu0 %vm530_vm1, %v165_v8  ;;  %v187_v8 = vld [vmem:[%s14820_s0 + $0x550] sm:$0xff] }
 0x16f   :  { %4770 = vxpose.xlu0.b32.cont [11/16] (narrow) %v11227_v39, 56  ;;  %4794 = vxpose.xlu1.b32.cont [3/16] (narrow) %v11323_v20, 56  ;;  %v11671_v39 = vpop.f32.mrf.mxu0  ;;  %v168_v20 = vld [vmem:[%s14820_s0 + $0x4b8] sm:$0xff] }
 0x171   :  { %9056 = vmatmul.mubr.msk.f32.gmra.mxu0 %vm530_vm1, %v166_v21 }
 0x172   :  { %9058 = vmatprep.mubr.msk.f32.mxu0 %vm530_vm1, %v167_v37  ;;  %v188_v37 = vld [vmem:[%s14820_s0 + $0x558] sm:$0xff] }
 0x173   :  { %4771 = vxpose.xlu0.b32.cont [12/16] (narrow) %v11216_v43, 56  ;;  %4795 = vxpose.xlu1.b32.cont [4/16] (narrow) %v11312_v41, 56  ;;  %v11683_v43 = vpop.f32.mrf.mxu0  ;;  %v170_v41 = vld [vmem:[%s14820_s0 + $0x4c8] sm:$0xff] }
 0x175   :  { %9059 = vmatmul.mubr.msk.f32.gmra.mxu0 %vm530_vm1, %v168_v20 }
 0x176   :  { %9061 = vmatprep.mubr.msk.f32.mxu0 %vm530_vm1, %v169_v32  ;;  %v190_v32 = vld [vmem:[%s14820_s0 + $0x568] sm:$0xff] }
 0x177   :  { %4772 = vxpose.xlu0.b32.cont [13/16] (narrow) %v11251_v57, 56  ;;  %4796 = vxpose.xlu1.b32.cont [5/16] (narrow) %v11363_v14, 56  ;;  %v11695_v57 = vpop.f32.mrf.mxu0  ;;  %v172_v14 = vld [vmem:[%s14820_s0 + $0x4d8] sm:$0xff] }
 0x179   :  { %9062 = vmatmul.mubr.msk.f32.gmra.mxu0 %vm530_vm1, %v170_v41 }
 0x17a   :  { %9064 = vmatprep.mubr.msk.f32.mxu0 %vm530_vm1, %v171_v36 }
 0x17b   :  { %4773 = vxpose.xlu0.b32.cont [14/16] (narrow) %v11240_v6, 56  ;;  %4797 = vxpose.xlu1.b32.cont [6/16] (narrow) %v11336_v16, 56  ;;  %v11707_v6 = vpop.f32.mrf.mxu0  ;;  %v174_v16 = vld [vmem:[%s14820_s0 + $0x4e8] sm:$0xff] }
 0x17d   :  { %9065 = vmatmul.mubr.msk.f32.gmra.mxu0 %vm530_vm1, %v172_v14  ;;  %v192_v14 = vld [vmem:[%s14820_s0 + $0x578] sm:$0xff] }
 0x17e   :  { %9067 = vmatprep.mubr.msk.f32.mxu0 %vm530_vm1, %v173_v1 }
 0x17f   :  { %4774 = vxpose.xlu0.b32.cont [15/16] (narrow) %v11275_v7, 56  ;;  %4798 = vxpose.xlu1.b32.cont [7/16] (narrow) %v11396_v60, 56  ;;  %v11719_v7 = vpop.f32.mrf.mxu0  ;;  %v176_v60 = vld [vmem:[%s14820_s0 + $0x4f8] sm:$0xff] }
 0x181   :  { %9068 = vmatmul.mubr.msk.f32.gmra.mxu0 %vm530_vm1, %v174_v16  ;;  %v193_v16 = vld [vmem:[%s14820_s0 + $0x580] sm:$0xff] }
 0x182   :  { %9070 = vmatprep.mubr.msk.f32.mxu0 %vm530_vm1, %v175_v24 }
 0x183   :  { %4775 = vxpose.xlu0.b32.end [16/16] (narrow) %v11264_v5, 56  ;;  %4799 = vxpose.xlu1.b32.cont [8/16] (narrow) %v11375_v22, 56  ;;  %v11731_v5 = vpop.f32.mrf.mxu0  ;;  %v178_v22 = vld [vmem:[%s14820_s0 + $0x508] sm:$0xff] }
 0x185   :  { %9071 = vmatmul.mubr.msk.f32.gmra.mxu0 %vm530_vm1, %v176_v60  ;;  %v194_v60 = vld [vmem:[%s14820_s0 + $0x588] sm:$0xff] }
 0x186   :  { %9073 = vmatprep.mubr.msk.f32.mxu0 %vm530_vm1, %v177_v62  ;;  %v9438_v62 = vpop.f32.mrf.mxu1 }
 0x187   :  { %5464 = vxpose.xlu0.b32.start [1/16] (narrow) %v11223_v25, 56  ;;  %4800 = vxpose.xlu1.b32.cont [9/16] (narrow) %v11434_v10, 56  ;;  %v11743_v25 = vpop.f32.mrf.mxu0  ;;  %v180_v10 = vld [vmem:[%s14820_s0 + $0x518] sm:$0xff] }
 0x189   :  { %9074 = vmatmul.mubr.msk.f32.gmra.mxu0 %vm530_vm1, %v178_v22 }
 0x18a   :  { %9076 = vmatprep.mubr.msk.f32.mxu0 %vm530_vm1, %v179_v50 }
 0x18b   :  { %5465 = vxpose.xlu0.b32.cont [2/16] (narrow) %v11199_v15, 56  ;;  %4801 = vxpose.xlu1.b32.cont [10/16] (narrow) %v11410_v30, 56  ;;  %v11755_v15 = vpop.f32.mrf.mxu0  ;;  %v182_v30 = vld [vmem:[%s14820_s0 + $0x528] sm:$0xff] }
 0x18d   :  { %9077 = vmatmul.mubr.msk.f32.gmra.mxu0 %vm530_vm1, %v180_v10  ;;  %v196_v10 = vld [vmem:[%s14820_s0 + $0x598] sm:$0xff] }
 0x18e   :  { %9079 = vmatprep.mubr.msk.f32.mxu0 %vm530_vm1, %v181_v48  ;;  %v4147_v48 = vpop.f32.mrf.mxu1 }
 0x18f   :  { %5466 = vxpose.xlu0.b32.cont [3/16] (narrow) %v11271_v35, 56  ;;  %4802 = vxpose.xlu1.b32.cont [11/16] (narrow) %v11467_v18, 56  ;;  %v11767_v35 = vpop.trf.xlu0  ;;  %v11769_v18 = vpop.f32.mrf.mxu0 }
 0x190   :  { %14826 = vst [vmem:[#allocation4_spill] sm:$0xff] %v11767_v35 }
 0x191   :  { %9080 = vmatmul.mubr.msk.f32.gmra.mxu0 %vm530_vm1, %v182_v30  ;;  %v11776_v2 = vpop.f32.mrf.mxu0 }
 0x192   :  { %9082 = vmatprep.mubr.msk.f32.mxu0 %vm530_vm1, %v183_v4  ;;  %v198_v4 = vld [vmem:[%s14820_s0 + $0x5a8] sm:$0xff] }
 0x193   :  { %5467 = vxpose.xlu0.b32.cont [4/16] (narrow) %v11247_v23, 56  ;;  %4803 = vxpose.xlu1.b32.cont [12/16] (narrow) %v11443_v3, 56  ;;  %v185_v23 = vld [vmem:[%s14820_s0 + $0x540] sm:$0xff]  ;;  %v11783_v3 = vpop.trf.xlu0  ;;  %v11790_v33 = vpop.f32.mrf.mxu0 }
 0x194   :  { %14827 = vst [vmem:[#allocation5_spill] sm:$0xff] %v11783_v3 }
 0x195   :  { %9083 = vmatmul.mubr.msk.f32.gmra.mxu0 %vm530_vm1, %v184_v12  ;;  %v11801_v21 = vpop.f32.mrf.mxu0  ;;  %v9441_v12 = vpop.f32.mrf.mxu1 }
 0x196   :  { %9085 = vmatprep.mubr.msk.f32.mxu0 %vm530_vm1, %v185_v23 }
 0x197   :  { %5468 = vxpose.xlu0.b32.cont [5/16] (narrow) %v11319_v58, 56  ;;  %4804 = vxpose.xlu1.b32.cont [13/16] (narrow) %v11502_v28, 56  ;;  %v11797_v58 = vpop.trf.xlu1  ;;  %v11799_v28 = vpop.trf.xlu0 }
 0x198   :  { %14828 = vst [vmem:[#allocation6_spill] sm:$0xff] %v11797_v58  ;;  %14829 = vst [vmem:[#allocation7_spill] sm:$0xff] %v11799_v28  ;;  %v11815_v20 = vpop.f32.mrf.mxu0 }
 0x199   :  { %9086 = vmatmul.mubr.msk.f32.gmra.mxu0 %vm530_vm1, %v186_v29  ;;  %v199_v29 = vld [vmem:[%s14820_s0 + $0x5b0] sm:$0xff] }
 0x19a   :  { %9088 = vmatprep.mubr.msk.f32.mxu0 %vm530_vm1, %v187_v8  ;;  %v11824_v36 = vpop.f32.mrf.mxu0 }
 0x19b   :  { %5469 = vxpose.xlu0.b32.cont [6/16] (narrow) %v11295_v31, 56  ;;  %4805 = vxpose.xlu1.b32.cont [14/16] (narrow) %v11481_v46, 56  ;;  %v189_v31 = vld [vmem:[%s14820_s0 + $0x560] sm:$0xff]  ;;  %v11813_v46 = vpop.trf.xlu0  ;;  %v11822_v41 = vpop.trf.xlu1 }
 0x19c   :  { %14830 = vst [vmem:[#allocation8_spill] sm:$0xff] %v11813_v46  ;;  %14831 = vst [vmem:[#allocation9_spill] sm:$0xff] %v11822_v41  ;;  %v11838_v1 = vpop.f32.mrf.mxu0  ;;  %v247_v41 = vld [vmem:[%s14820_s0 + $0x730] sm:$0xff] }
 0x19d   :  { %9089 = vmatmul.mubr.msk.f32.gmra.mxu0 %vm530_vm1, %v188_v37 }
 0x19e   :  { %9091 = vmatprep.mubr.msk.f32.mxu0 %vm530_vm1, %v189_v31  ;;  %v11849_v24 = vpop.f32.mrf.mxu0  ;;  %v200_v31 = vld [vmem:[%s14820_s0 + $0x5b8] sm:$0xff] }
 0x19f   :  { %5470 = vxpose.xlu0.b32.cont [7/16] (narrow) %v11366_v40, 56  ;;  %4806 = vxpose.xlu1.b32.cont [15/16] (narrow) %v11537_v44, 56  ;;  %v191_v40 = vld [vmem:[%s14820_s0 + $0x570] sm:$0xff]  ;;  %v11831_v44 = vpop.trf.xlu0 }
 0x1a0   :  { %14832 = vst [vmem:[#allocation10_spill] sm:$0xff] %v11831_v44  ;;  %v11863_v22 = vpop.f32.mrf.mxu0 }
 0x1a1   :  { %9092 = vmatmul.mubr.msk.f32.gmra.mxu0 %vm530_vm1, %v190_v32  ;;  %v4157_v32 = vpop.f32.mrf.mxu1 }
 0x1a2   :  { %9094 = vmatprep.mubr.msk.f32.mxu0 %vm530_vm1, %v191_v40  ;;  %v11872_v30 = vpop.f32.mrf.mxu0 }
 0x1a3   :  { %5471 = vxpose.xlu0.b32.cont [8/16] (narrow) %v11345_v59, 56  ;;  %4807 = vxpose.xlu1.b32.end [16/16] (narrow) %v11514_v19, 56  ;;  %v11845_v59 = vpop.trf.xlu1  ;;  %v11847_v19 = vpop.trf.xlu0 }
 0x1a4   :  { %14833 = vst [vmem:[#allocation11_spill] sm:$0xff] %v11845_v59  ;;  %14834 = vst [vmem:[#allocation12_spill] sm:$0xff] %v11847_v19  ;;  %v11885_v23 = vpop.f32.mrf.mxu0 }
 0x1a5   :  { %9095 = vmatmul.mubr.msk.f32.gmra.mxu0 %vm530_vm1, %v192_v14 }
 0x1a6   :  { %9097 = vmatprep.mubr.msk.f32.mxu0 %vm530_vm1, %v193_v16  ;;  %v11895_v37 = vpop.f32.mrf.mxu0 }
 0x1a7   :  { %5472 = vxpose.xlu0.b32.cont [9/16] (narrow) %v11413_v54, 56  ;;  %5496 = vxpose.xlu1.b32.start [1/16] (narrow) %v11633_v47, 56  ;;  %v195_v54 = vld [vmem:[%s14820_s0 + $0x590] sm:$0xff]  ;;  %v11861_v47 = vpop.trf.xlu0  ;;  %v11866_v50 = vpop.trf.xlu1 }
 0x1a8   :  { %14835 = vst [vmem:[#allocation13_spill] sm:$0xff] %v11861_v47  ;;  %14836 = vst [vmem:[#allocation14_spill] sm:$0xff] %v11866_v50  ;;  %v11908_v14 = vpop.f32.mrf.mxu0 }
 0x1a9   :  { %9098 = vmatmul.mubr.msk.f32.gmra.mxu0 %vm530_vm1, %v194_v60  ;;  %v202_v60 = vld [vmem:[%s14820_s0 + $0x5c8] sm:$0xff] }
 0x1aa   :  { %9100 = vmatprep.mubr.msk.f32.mxu0 %vm530_vm1, %v195_v54  ;;  %v11917_v54 = vpop.f32.mrf.mxu0 }
 0x1ab   :  { %5473 = vxpose.xlu0.b32.cont [10/16] (narrow) %v11390_v34, 56  ;;  %5497 = vxpose.xlu1.b32.cont [2/16] (narrow) %v11619_v13, 56  ;;  %v197_v34 = vld [vmem:[%s14820_s0 + $0x5a0] sm:$0xff]  ;;  %v11878_v13 = vpop.trf.xlu0 }
 0x1ac   :  { %14837 = vst [vmem:[#allocation15_spill] sm:$0xff] %v11878_v13 }
 0x1ad   :  { %9101 = vmatmul.mubr.msk.f32.gmra.mxu0 %vm530_vm1, %v196_v10 }
 0x1ae   :  { %9103 = vmatprep.mubr.msk.f32.mxu0 %vm530_vm1, %v197_v34 }
 0x1af   :  { %5474 = vxpose.xlu0.b32.cont [11/16] (narrow) %v11458_v38, 56  ;;  %5498 = vxpose.xlu1.b32.cont [3/16] (narrow) %v4147_v48, 56  ;;  %v11891_v38 = vpop.trf.xlu1  ;;  %v11893_v8 = vpop.trf.xlu0  ;;  %v204_v48 = vld [vmem:[%s14820_s0 + $0x5d8] sm:$0xff] }
 0x1b0   :  { %14838 = vst [vmem:[#allocation16_spill] sm:$0xff] %v11891_v38  ;;  %14839 = vst [vmem:[#allocation17_spill] sm:$0xff] %v11893_v8  ;;  %v243_v8 = vld [vmem:[%s14820_s0 + $0x710] sm:$0xff] }
 0x1b1   :  { %9104 = vmatmul.mubr.msk.f32.gmra.mxu0 %vm530_vm1, %v198_v4  ;;  %v11930_v4 = vpop.f32.mrf.mxu0 }
 0x1b2   :  { %9106 = vmatprep.mubr.msk.f32.mxu0 %vm530_vm1, %v199_v29  ;;  %v205_v29 = vld [vmem:[%s14820_s0 + $0x5e0] sm:$0xff] }
 0x1b3   :  { %5475 = vxpose.xlu0.b32.cont [12/16] (narrow) %v11437_v0, 56  ;;  %5499 = vxpose.xlu1.b32.cont [4/16] (narrow) %v9438_v62, 56  ;;  %v201_v0 = vld [vmem:[%s14820_s0 + $0x5c0] sm:$0xff]  ;;  %v11906_v40 = vpop.trf.xlu0  ;;  %v11911_v16 = vpop.trf.xlu1 }
 0x1b4   :  { %14840 = vst [vmem:[#allocation18_spill] sm:$0xff] %v11906_v40  ;;  %14841 = vst [vmem:[#allocation19_spill] sm:$0xff] %v11911_v16  ;;  %v9444_v62 = vpop.f32.mrf.mxu1 }
 0x1b5   :  { %9107 = vmatmul.mubr.msk.f32.gmra.mxu0 %vm530_vm1, %v200_v31  ;;  %v206_v31 = vld [vmem:[%s14820_s0 + $0x5e8] sm:$0xff] }
 0x1b6   :  { %9109 = vmatprep.mubr.msk.f32.mxu0 %vm530_vm1, %v201_v0  ;;  %v4167_v34 = vpop.f32.mrf.mxu1 }
 0x1b7   :  { %5476 = vxpose.xlu0.b32.cont [13/16] (narrow) %v11505_v42, 56  ;;  %5500 = vxpose.xlu1.b32.cont [5/16] (narrow) %v4157_v32, 56  ;;  %v203_v42 = vld [vmem:[%s14820_s0 + $0x5d0] sm:$0xff]  ;;  %v11923_v10 = vpop.trf.xlu0  ;;  %v11945_v32 = vpop.f32.mrf.mxu0 }
 0x1b8   :  { %14842 = vst [vmem:[#allocation20_spill] sm:$0xff] %v11923_v10  ;;  %v9447_v0 = vpop.f32.mrf.mxu1  ;;  %v217_v10 = vld [vmem:[%s14820_s0 + $0x640] sm:$0xff] }
 0x1b9   :  { %9110 = vmatmul.mubr.msk.f32.gmra.mxu0 %vm530_vm1, %v202_v60  ;;  %v11951_v60 = vpop.f32.mrf.mxu0 }
 0x1ba   :  { %9112 = vmatprep.mubr.msk.f32.mxu0 %vm530_vm1, %v203_v42  ;;  %v4177_v19 = vpop.f32.mrf.mxu1 }
 0x1bb   :  { %5477 = vxpose.xlu0.b32.cont [14/16] (narrow) %v11484_v9, 56  ;;  %5501 = vxpose.xlu1.b32.cont [6/16] (narrow) %v9441_v12, 56  ;;  %v11936_v9 = vpop.trf.xlu1  ;;  %v11938_v12 = vpop.trf.xlu0 }
 0x1bc   :  { %14843 = vst [vmem:[#allocation21_spill] sm:$0xff] %v11936_v9  ;;  %14844 = vst [vmem:[#allocation22_spill] sm:$0xff] %v11938_v12 }
 0x1bd   :  { %9113 = vmatmul.mubr.msk.f32.gmra.mxu0 %vm530_vm1, %v204_v48 }
 0x1be   :  { %9115 = vmatprep.mubr.msk.f32.mxu0 %vm530_vm1, %v205_v29 }
 0x1bf   :  { %5478 = vxpose.xlu0.b32.cont [15/16] (narrow) %v11554_v61, 56  ;;  %5502 = vxpose.xlu1.b32.cont [7/16] (narrow) %v4167_v34, 56  ;;  %v207_v61 = vld [vmem:[%s14820_s0 + $0x5f0] sm:$0xff]  ;;  %v11956_v48 = vpop.trf.xlu1  ;;  %v208_v34 = vld [vmem:[%s14820_s0 + $0x5f8] sm:$0xff] }
 0x1c0   :  { %14846 = vst [vmem:[#allocation24_spill] sm:$0xff] %v11956_v48 }
 0x1c1   :  { %9116 = vmatmul.mubr.msk.f32.gmra.mxu0 %vm530_vm1, %v206_v31  ;;  %v11962_v29 = vpop.f32.mrf.mxu0 }
 0x1c2   :  { %9118 = vmatprep.mubr.msk.f32.mxu0 %vm530_vm1, %v207_v61  ;;  %v210_v61 = vld [vmem:[%s14820_s0 + $0x608] sm:$0xff] }
 0x1c3   :  { %5479 = vxpose.xlu0.b32.end [16/16] (narrow) %v11531_v49, 56  ;;  %5503 = vxpose.xlu1.b32.cont [8/16] (narrow) %v9444_v62, 56  ;;  %v11953_v42 = vpop.trf.xlu0  ;;  %v209_v49 = vld [vmem:[%s14820_s0 + $0x600] sm:$0xff]  ;;  %v11968_v62 = vpop.f32.mrf.mxu0 }
 0x1c4   :  { %14845 = vst [vmem:[#allocation23_spill] sm:$0xff] %v11953_v42  ;;  %v9450_v42 = vpop.f32.mrf.mxu1 }
 0x1c5   :  { %9119 = vmatmul.mubr.msk.f32.gmra.mxu0 %vm530_vm1, %v208_v34  ;;  %v11975_v12 = vpop.f32.mrf.mxu0 }
 0x1c6   :  { %9121 = vmatprep.mubr.msk.f32.mxu0 %vm530_vm1, %v209_v49  ;;  %v212_v49 = vld [vmem:[%s14820_s0 + $0x618] sm:$0xff]  ;;  %v4187_v38 = vpop.f32.mrf.mxu1 }
 0x1c7   :  { %5504 = vxpose.xlu1.b32.cont [9/16] (narrow) %v4177_v19, 56  ;;  %4824 = vxpose.xlu0.b32.start [1/16] (narrow) %v11569_v45, 56  ;;  %v4777_v31 = vpop.trf.xlu0  ;;  %v211_v19 = vld [vmem:[%s14820_s0 + $0x610] sm:$0xff]  ;;  %v11981_v45 = vpop.trf.xlu1 }
 0x1c8   :  { %9636 = vmatprep.mubr.f32.mxu1 %v4777_v31  ;;  %14847 = vst [vmem:[#allocation25_spill] sm:$0xff] %v11981_v45  ;;  %v11983_v34 = vpop.f32.mrf.mxu0  ;;  %v9453_v44 = vpop.f32.mrf.mxu1 }
 0x1c9   :  { %9122 = vmatmul.mubr.msk.f32.gmra.mxu0 %vm530_vm1, %v210_v61 }
 0x1ca   :  { %9124 = vmatprep.mubr.msk.f32.mxu0 %vm530_vm1, %v211_v19  ;;  %v11990_v31 = vpop.f32.mrf.mxu0  ;;  %v214_v19 = vld [vmem:[%s14820_s0 + $0x628] sm:$0xff]  ;;  %v4197_v16 = vpop.f32.mrf.mxu1 }
 0x1cb   :  { %5505 = vxpose.xlu1.b32.cont [10/16] (narrow) %v9447_v0, 56  ;;  %4825 = vxpose.xlu0.b32.cont [2/16] (narrow) %v11551_v11, 56  ;;  %v213_v0 = vld [vmem:[%s14820_s0 + $0x620] sm:$0xff]  ;;  %v11999_v61 = vpop.trf.xlu1 }
 0x1cc   :  { %v11996_v11 = vpop.f32.mrf.mxu0  ;;  %14848 = vst [vmem:[#allocation26_spill] sm:$0xff] %v11999_v61  ;;  %v9456_v50 = vpop.f32.mrf.mxu1 }
 0x1cd   :  { %9125 = vmatmul.mubr.msk.f32.gmra.mxu0 %vm530_vm1, %v212_v49  ;;  %v216_v49 = vld [vmem:[%s14820_s0 + $0x638] sm:$0xff] }
 0x1ce   :  { %9127 = vmatprep.mubr.msk.f32.mxu0 %vm530_vm1, %v213_v0  ;;  %v12005_v52 = vpop.f32.mrf.mxu0  ;;  %v4207_v17 = vpop.f32.mrf.mxu1 }
 0x1cf   :  { %5506 = vxpose.xlu1.b32.cont [11/16] (narrow) %v4187_v38, 56  ;;  %4826 = vxpose.xlu0.b32.cont [3/16] (narrow) %v11593_v63, 56  ;;  %v215_v38 = vld [vmem:[%s14820_s0 + $0x630] sm:$0xff] }
 0x1d0   :  { %v12011_v63 = vpop.f32.mrf.mxu0 }
 0x1d1   :  { %9128 = vmatmul.mubr.msk.f32.gmra.mxu0 %vm530_vm1, %v214_v19  ;;  %v218_v19 = vld [vmem:[%s14820_s0 + $0x648] sm:$0xff] }
 0x1d2   :  { %9130 = vmatprep.mubr.msk.f32.mxu0 %vm530_vm1, %v215_v38  ;;  %v12018_v0 = vpop.f32.mrf.mxu0 }
 0x1d3   :  { %5507 = vxpose.xlu1.b32.cont [12/16] (narrow) %v9450_v42, 56  ;;  %4827 = vxpose.xlu0.b32.cont [4/16] (narrow) %v11581_v53, 56  ;;  %v12024_v53 = vpop.trf.xlu1 }
 0x1d4   :  { %14849 = vst [vmem:[#allocation27_spill] sm:$0xff] %v12024_v53  ;;  %v12026_v42 = vpop.f32.mrf.mxu0 }
 0x1d5   :  { %9131 = vmatmul.mubr.msk.f32.gmra.mxu0 %vm530_vm1, %v216_v49 }
 0x1d6   :  { %9133 = vmatprep.mubr.msk.f32.mxu0 %vm530_vm1, %v217_v10  ;;  %v12033_v38 = vpop.f32.mrf.mxu0  ;;  %v220_v10 = vld [vmem:[%s14820_s0 + $0x658] sm:$0xff] }
 0x1d7   :  { %5508 = vxpose.xlu1.b32.cont [13/16] (narrow) %v4197_v16, 56  ;;  %4828 = vxpose.xlu0.b32.cont [5/16] (narrow) %v11621_v51, 56  ;;  %v219_v16 = vld [vmem:[%s14820_s0 + $0x650] sm:$0xff]  ;;  %v12042_v49 = vpop.trf.xlu1 }
 0x1d8   :  { %v12039_v51 = vpop.f32.mrf.mxu0  ;;  %14850 = vst [vmem:[#allocation28_spill] sm:$0xff] %v12042_v49  ;;  %v12063_v49 = vpop.f32.mrf.mxu1 }
 0x1d9   :  { %9134 = vmatmul.mubr.msk.f32.gmra.mxu0 %vm530_vm1, %v218_v19  ;;  %v222_v19 = vld [vmem:[%s14820_s0 + $0x668] sm:$0xff] }
 0x1da   :  { %9136 = vmatprep.mubr.msk.f32.mxu0 %vm530_vm1, %v219_v16  ;;  %v12048_v53 = vpop.f32.mrf.mxu0  ;;  %v12080_v61 = vpop.f32.mrf.mxu1 }
 0x1db   :  { %5509 = vxpose.xlu1.b32.cont [14/16] (narrow) %v9453_v44, 56  ;;  %4829 = vxpose.xlu0.b32.cont [6/16] (narrow) %v11605_v55, 56  ;;  %v221_v44 = vld [vmem:[%s14820_s0 + $0x660] sm:$0xff] }
 0x1dc   :  { %v12054_v55 = vpop.f32.mrf.mxu0  ;;  %v12096_v40 = vpop.f32.mrf.mxu1 }
 0x1dd   :  { %9137 = vmatmul.mubr.msk.f32.gmra.mxu0 %vm530_vm1, %v220_v10 }
 0x1de   :  { %9139 = vmatprep.mubr.msk.f32.mxu0 %vm530_vm1, %v221_v44  ;;  %v12061_v16 = vpop.f32.mrf.mxu0  ;;  %v224_v44 = vld [vmem:[%s14820_s0 + $0x678] sm:$0xff] }
 0x1df   :  { %5510 = vxpose.xlu1.b32.cont [15/16] (narrow) %v4207_v17, 56  ;;  %4830 = vxpose.xlu0.b32.cont [7/16] (narrow) %v11647_v26, 56  ;;  %v223_v17 = vld [vmem:[%s14820_s0 + $0x670] sm:$0xff] }
 0x1e0   :  { %v12071_v10 = vpop.f32.mrf.mxu0 }
 0x1e1   :  { %9140 = vmatmul.mubr.msk.f32.gmra.mxu0 %vm530_vm1, %v222_v19 }
 0x1e2   :  { %9142 = vmatprep.mubr.msk.f32.mxu0 %vm530_vm1, %v223_v17  ;;  %v12078_v46 = vpop.f32.mrf.mxu0  ;;  %v226_v17 = vld [vmem:[%s14820_s0 + $0x688] sm:$0xff] }
 0x1e3   :  { %5511 = vxpose.xlu1.b32.end [16/16] (narrow) %v9456_v50, 56  ;;  %4831 = vxpose.xlu0.b32.cont [8/16] (narrow) %v11635_v56, 56  ;;  %v12069_v26 = vpop.trf.xlu1  ;;  %v225_v56 = vld [vmem:[%s14820_s0 + $0x680] sm:$0xff] }
 0x1e4   :  { %14851 = vst [vmem:[#allocation29_spill] sm:$0xff] %v12069_v26  ;;  %v12087_v19 = vpop.f32.mrf.mxu0 }
 0x1e5   :  { %9143 = vmatmul.mubr.msk.f32.gmra.mxu0 %vm530_vm1, %v224_v44  ;;  %v228_v44 = vld [vmem:[%s14820_s0 + $0x698] sm:$0xff] }
 0x1e6   :  { %9145 = vmatprep.mubr.msk.f32.mxu0 %vm530_vm1, %v225_v56  ;;  %v12094_v26 = vpop.f32.mrf.mxu0  ;;  %v12110_v56 = vpop.f32.mrf.mxu1 }
 0x1e7   :  { %4832 = vxpose.xlu0.b32.cont [9/16] (narrow) %v11671_v39, 56  ;;  %4856 = vxpose.xlu1.b32.start [1/16] (narrow) %v11769_v18, 56  ;;  %v4809_v50 = vpop.trf.xlu1  ;;  %v227_v39 = vld [vmem:[%s14820_s0 + $0x690] sm:$0xff] }
 0x1e8   :  { %9637 = vmatmul.mubr.f32.gmra.mxu1 %v4809_v50  ;;  %v12103_v18 = vpop.f32.mrf.mxu0  ;;  %v229_v50 = vld [vmem:[%s14820_s0 + $0x6a0] sm:$0xff] }
 0x1e9   :  { %9146 = vmatmul.mubr.msk.f32.gmra.mxu0 %vm530_vm1, %v226_v17  ;;  %v12126_v17 = vpop.f32.mrf.mxu1 }
 0x1ea   :  { %9148 = vmatprep.mubr.msk.f32.mxu0 %vm530_vm1, %v227_v39  ;;  %v231_v39 = vld [vmem:[%s14820_s0 + $0x6b0] sm:$0xff] }
 0x1eb   :  { %4833 = vxpose.xlu0.b32.cont [10/16] (narrow) %v11659_v27, 56  ;;  %4857 = vxpose.xlu1.b32.cont [2/16] (narrow) %v11755_v15, 56  ;;  %v230_v15 = vld [vmem:[%s14820_s0 + $0x6a8] sm:$0xff] }
 0x1ec   :  { %v12115_v59 = vpop.f32.mrf.mxu0 }
 0x1ed   :  { %9149 = vmatmul.mubr.msk.f32.gmra.mxu0 %vm530_vm1, %v228_v44  ;;  %v12140_v44 = vpop.f32.mrf.mxu1 }
 0x1ee   :  { %v12120_v27 = vpop.f32.mrf.mxu0  ;;  %9151 = vmatprep.mubr.msk.f32.mxu0 %vm530_vm1, %v229_v50  ;;  %v233_v50 = vld [vmem:[%s14820_s0 + $0x6c0] sm:$0xff] }
 0x1ef   :  { %4834 = vxpose.xlu0.b32.cont [11/16] (narrow) %v11695_v57, 56  ;;  %4858 = vxpose.xlu1.b32.cont [3/16] (narrow) %v11790_v33, 56  ;;  %v232_v33 = vld [vmem:[%s14820_s0 + $0x6b8] sm:$0xff] }
 0x1f0   :  { %v12134_v57 = vpop.f32.mrf.mxu0 }
 0x1f1   :  { %9152 = vmatmul.mubr.msk.f32.gmra.mxu0 %vm530_vm1, %v230_v15  ;;  %v12156_v15 = vpop.f32.mrf.mxu1 }
 0x1f2   :  { %9154 = vmatprep.mubr.msk.f32.mxu0 %vm530_vm1, %v231_v39  ;;  %v12145_v28 = vpop.f32.mrf.mxu0  ;;  %v235_v39 = vld [vmem:[%s14820_s0 + $0x6d0] sm:$0xff] }
 0x1f3   :  { %4835 = vxpose.xlu0.b32.cont [12/16] (narrow) %v11683_v43, 56  ;;  %4859 = vxpose.xlu1.b32.cont [4/16] (narrow) %v11776_v2, 56  ;;  %v234_v43 = vld [vmem:[%s14820_s0 + $0x6c8] sm:$0xff] }
 0x1f5   :  { %9155 = vmatmul.mubr.msk.f32.gmra.mxu0 %vm530_vm1, %v232_v33  ;;  %v12170_v33 = vpop.f32.mrf.mxu1 }
 0x1f6   :  { %9157 = vmatprep.mubr.msk.f32.mxu0 %vm530_vm1, %v233_v50  ;;  %v12154_v2 = vpop.f32.mrf.mxu0  ;;  %v237_v50 = vld [vmem:[%s14820_s0 + $0x6e0] sm:$0xff] }
 0x1f7   :  { %4836 = vxpose.xlu0.b32.cont [13/16] (narrow) %v11719_v7, 56  ;;  %4860 = vxpose.xlu1.b32.cont [5/16] (narrow) %v11815_v20, 56  ;;  %v236_v20 = vld [vmem:[%s14820_s0 + $0x6d8] sm:$0xff] }
 0x1f8   :  { %v12163_v7 = vpop.f32.mrf.mxu0 }
 0x1f9   :  { %9158 = vmatmul.mubr.msk.f32.gmra.mxu0 %vm530_vm1, %v234_v43  ;;  %v12186_v43 = vpop.f32.mrf.mxu1 }
 0x1fa   :  { %9160 = vmatprep.mubr.msk.f32.mxu0 %vm530_vm1, %v235_v39  ;;  %v239_v39 = vld [vmem:[%s14820_s0 + $0x6f0] sm:$0xff] }
 0x1fb   :  { %4837 = vxpose.xlu0.b32.cont [14/16] (narrow) %v11707_v6, 56  ;;  %4861 = vxpose.xlu1.b32.cont [6/16] (narrow) %v11801_v21, 56  ;;  %v238_v21 = vld [vmem:[%s14820_s0 + $0x6e8] sm:$0xff] }
 0x1fc   :  { %v12175_v45 = vpop.f32.mrf.mxu0 }
 0x1fd   :  { %9161 = vmatmul.mubr.msk.f32.gmra.mxu0 %vm530_vm1, %v236_v20  ;;  %v12200_v20 = vpop.f32.mrf.mxu1 }
 0x1fe   :  { %v12180_v6 = vpop.f32.mrf.mxu0  ;;  %9163 = vmatprep.mubr.msk.f32.mxu0 %vm530_vm1, %v237_v50 }
 0x1ff   :  { %4838 = vxpose.xlu0.b32.cont [15/16] (narrow) %v11743_v25, 56  ;;  %4862 = vxpose.xlu1.b32.cont [7/16] (narrow) %v11838_v1, 56  ;;  %v240_v1 = vld [vmem:[%s14820_s0 + $0x6f8] sm:$0xff] }
 0x201   :  { %9164 = vmatmul.mubr.msk.f32.gmra.mxu0 %vm530_vm1, %v238_v21  ;;  %v12194_v25 = vpop.f32.mrf.mxu0  ;;  %v242_v21 = vld [vmem:[%s14820_s0 + $0x708] sm:$0xff] }
 0x202   :  { %9166 = vmatprep.mubr.msk.f32.mxu0 %vm530_vm1, %v239_v39  ;;  %v12216_v39 = vpop.f32.mrf.mxu1 }
 0x203   :  { %4839 = vxpose.xlu0.b32.end [16/16] (narrow) %v11731_v5, 56  ;;  %4863 = vxpose.xlu1.b32.cont [8/16] (narrow) %v11824_v36, 56  ;;  %v12202_v50 = vpop.f32.mrf.mxu0  ;;  %v241_v5 = vld [vmem:[%s14820_s0 + $0x700] sm:$0xff] }
 0x205   :  { %9167 = vmatmul.mubr.msk.f32.gmra.mxu0 %vm530_vm1, %v240_v1  ;;  %v12230_v1 = vpop.f32.mrf.mxu1 }
 0x206   :  { %9169 = vmatprep.mubr.msk.f32.mxu0 %vm530_vm1, %v241_v5  ;;  %v12211_v36 = vpop.f32.mrf.mxu0 }
 0x207   :  { %5528 = vxpose.xlu0.b32.start [1/16] (narrow) %v12080_v61, 56  ;;  %4864 = vxpose.xlu1.b32.cont [9/16] (narrow) %v11863_v22, 56  ;;  %v244_v61 = vld [vmem:[%s14820_s0 + $0x718] sm:$0xff] }
 0x208   :  { %v12223_v22 = vpop.f32.mrf.mxu0 }
 0x209   :  { %9170 = vmatmul.mubr.msk.f32.gmra.mxu0 %vm530_vm1, %v242_v21  ;;  %v12246_v21 = vpop.f32.mrf.mxu1 }
 0x20a   :  { %9172 = vmatprep.mubr.msk.f32.mxu0 %vm530_vm1, %v243_v8  ;;  %v246_v8 = vld [vmem:[%s14820_s0 + $0x728] sm:$0xff] }
 0x20b   :  { %5529 = vxpose.xlu0.b32.cont [2/16] (narrow) %v12063_v49, 56  ;;  %4865 = vxpose.xlu1.b32.cont [10/16] (narrow) %v11849_v24, 56  ;;  %v245_v49 = vld [vmem:[%s14820_s0 + $0x720] sm:$0xff] }
 0x20c   :  { %v12232_v5 = vpop.f32.mrf.mxu0 }
 0x20d   :  { %9173 = vmatmul.mubr.msk.f32.gmra.mxu0 %vm530_vm1, %v244_v61  ;;  %v248_v61 = vld [vmem:[%s14820_s0 + $0x738] sm:$0xff] }
 0x20e   :  { %v12240_v24 = vpop.f32.mrf.mxu0  ;;  %9175 = vmatprep.mubr.msk.f32.mxu0 %vm530_vm1, %v245_v49  ;;  %v12262_v49 = vpop.f32.mrf.mxu1 }
 0x20f   :  { %5530 = vxpose.xlu0.b32.cont [3/16] (narrow) %v12110_v56, 56  ;;  %4866 = vxpose.xlu1.b32.cont [11/16] (narrow) %v11885_v23, 56  ;;  %v12253_v23 = vpop.trf.xlu0 }
 0x210   :  { %14852 = vst [vmem:[#allocation30_spill] sm:$0xff] %v12253_v23  ;;  %v12280_v48 = vpop.f32.mrf.mxu1 }
 0x211   :  { %v12255_v56 = vpop.f32.mrf.mxu0  ;;  %9176 = vmatmul.mubr.msk.f32.gmra.mxu0 %vm530_vm1, %v246_v8 }
 0x212   :  { %9178 = vmatprep.mubr.msk.f32.mxu0 %vm530_vm1, %v247_v41  ;;  %v250_v41 = vld [vmem:[%s14820_s0 + $0x748] sm:$0xff]  ;;  %v12300_v23 = vpop.f32.mrf.mxu1 }
 0x213   :  { %5531 = vxpose.xlu0.b32.cont [4/16] (narrow) %v12096_v40, 56  ;;  %4867 = vxpose.xlu1.b32.cont [12/16] (narrow) %v11872_v30, 56  ;;  %v12264_v3 = vpop.f32.mrf.mxu0  ;;  %v249_v30 = vld [vmem:[%s14820_s0 + $0x740] sm:$0xff]  ;;  %v12271_v40 = vpop.trf.xlu0 }
 0x214   :  { %14853 = vst [vmem:[#allocation31_spill] sm:$0xff] %v12271_v40  ;;  %v252_v40 = vld [vmem:[%s14820_s0 + $0x758] sm:$0xff] }
 0x215   :  { %v12273_v8 = vpop.f32.mrf.mxu0  ;;  %9179 = vmatmul.mubr.msk.f32.gmra.mxu0 %vm530_vm1, %v248_v61 }
 0x216   :  { %9181 = vmatprep.mubr.msk.f32.mxu0 %vm530_vm1, %v249_v30 }
 0x217   :  { %5532 = vxpose.xlu0.b32.cont [5/16] (narrow) %v12140_v44, 56  ;;  %4868 = vxpose.xlu1.b32.cont [13/16] (narrow) %v11908_v14, 56  ;;  %v12282_v13 = vpop.f32.mrf.mxu0  ;;  %v251_v14 = vld [vmem:[%s14820_s0 + $0x750] sm:$0xff]  ;;  %v12289_v44 = vpop.trf.xlu1 }
 0x218   :  { %14854 = vst [vmem:[#allocation32_spill] sm:$0xff] %v12289_v44  ;;  %v12291_v61 = vpop.trf.xlu0  ;;  %v9483_v44 = vpop.f32.mrf.mxu1 }
 0x219   :  { %14855 = vst [vmem:[#allocation33_spill] sm:$0xff] %v12291_v61  ;;  %v12293_v30 = vpop.f32.mrf.mxu0  ;;  %9182 = vmatmul.mubr.msk.f32.gmra.mxu0 %vm530_vm1, %v250_v41 }
 0x21a   :  { %9184 = vmatprep.mubr.msk.f32.mxu0 %vm530_vm1, %v251_v14  ;;  %v254_v14 = vld [vmem:[%s14820_s0 + $0x768] sm:$0xff] }
 0x21b   :  { %5533 = vxpose.xlu0.b32.cont [6/16] (narrow) %v12126_v17, 56  ;;  %4869 = vxpose.xlu1.b32.cont [14/16] (narrow) %v11895_v37, 56  ;;  %v12302_v58 = vpop.f32.mrf.mxu0  ;;  %v253_v37 = vld [vmem:[%s14820_s0 + $0x760] sm:$0xff]  ;;  %v12318_v61 = vpop.trf.xlu1 }
 0x21c   :  { %v12309_v17 = vpop.trf.xlu0  ;;  %14857 = vst [vmem:[#allocation35_spill] sm:$0xff] %v12318_v61 }
 0x21d   :  { %14856 = vst [vmem:[#allocation34_spill] sm:$0xff] %v12309_v17  ;;  %v12311_v41 = vpop.f32.mrf.mxu0  ;;  %9185 = vmatmul.mubr.msk.f32.gmra.mxu0 %vm530_vm1, %v252_v40  ;;  %v4297_v17 = vpop.f32.mrf.mxu1 }
 0x21e   :  { %9187 = vmatprep.mubr.msk.f32.mxu0 %vm530_vm1, %v253_v37  ;;  %v256_v37 = vld [vmem:[%s14820_s0 + $0x778] sm:$0xff] }
 0x21f   :  { %5534 = vxpose.xlu0.b32.cont [7/16] (narrow) %v12170_v33, 56  ;;  %4870 = vxpose.xlu1.b32.cont [15/16] (narrow) %v11930_v4, 56  ;;  %v12320_v35 = vpop.f32.mrf.mxu0  ;;  %v255_v4 = vld [vmem:[%s14820_s0 + $0x770] sm:$0xff]  ;;  %v9486_v9 = vpop.f32.mrf.mxu1 }
 0x220   :  { %v12327_v33 = vpop.trf.xlu0 }
 0x221   :  { %14858 = vst [vmem:[#allocation36_spill] sm:$0xff] %v12327_v33  ;;  %v12329_v40 = vpop.f32.mrf.mxu0  ;;  %9188 = vmatmul.mubr.msk.f32.gmra.mxu0 %vm530_vm1, %v254_v14 }
 0x222   :  { %14859 = vst [vmem:[#allocation37_spill] sm:$0xff] %v12329_v40  ;;  %9190 = vmatprep.mubr.msk.f32.mxu0 %vm530_vm1, %v255_v4  ;;  %v258_v4 = vld [vmem:[%s14820_s0 + $0x788] sm:$0xff] }
 0x223   :  { %5535 = vxpose.xlu0.b32.cont [8/16] (narrow) %v12156_v15, 56  ;;  %4871 = vxpose.xlu1.b32.end [16/16] (narrow) %v11917_v54, 56  ;;  %v12336_v61 = vpop.f32.mrf.mxu0  ;;  %v257_v15 = vld [vmem:[%s14820_s0 + $0x780] sm:$0xff]  ;;  %v12342_v54 = vpop.trf.xlu1 }
 0x224   :  { %14860 = vst [vmem:[#allocation38_spill] sm:$0xff] %v12342_v54  ;;  %v12344_v33 = vpop.trf.xlu0  ;;  %v4307_v54 = vpop.f32.mrf.mxu1 }
 0x225   :  { %14861 = vst [vmem:[#allocation39_spill] sm:$0xff] %v12344_v33  ;;  %v12346_v14 = vpop.f32.mrf.mxu0  ;;  %9191 = vmatmul.mubr.msk.f32.gmra.mxu0 %vm530_vm1, %v256_v37 }
 0x226   :  { %14862 = vst [vmem:[#allocation40_spill] sm:$0xff] %v12346_v14  ;;  %9193 = vmatprep.mubr.msk.f32.mxu0 %vm530_vm1, %v257_v15  ;;  %v260_v15 = vld [vmem:[%s14820_s0 + $0x798] sm:$0xff] }
 0x227   :  { %5536 = vxpose.xlu0.b32.cont [9/16] (narrow) %v12200_v20, 56  ;;  %5560 = vxpose.xlu1.b32.start [1/16] (narrow) %v4297_v17, 56  ;;  %v12353_v47 = vpop.f32.mrf.mxu0  ;;  %v259_v20 = vld [vmem:[%s14820_s0 + $0x790] sm:$0xff]  ;;  %v12364_v37 = vpop.trf.xlu1 }
 0x228   :  { %14863 = vst [vmem:[#allocation41_spill] sm:$0xff] %v12353_v47  ;;  %v12359_v17 = vpop.trf.xlu0  ;;  %14865 = vst [vmem:[#allocation43_spill] sm:$0xff] %v12364_v37  ;;  %v9489_v37 = vpop.f32.mrf.mxu1 }
 0x229   :  { %14864 = vst [vmem:[#allocation42_spill] sm:$0xff] %v12359_v17  ;;  %v12361_v33 = vpop.f32.mrf.mxu0  ;;  %9194 = vmatmul.mubr.msk.f32.gmra.mxu0 %vm530_vm1, %v258_v4 }
 0x22a   :  { %9196 = vmatprep.mubr.msk.f32.mxu0 %vm530_vm1, %v259_v20  ;;  %v262_v20 = vld [vmem:[%s14820_s0 + $0x7a8] sm:$0xff]  ;;  %v4317_v47 = vpop.f32.mrf.mxu1 }
 0x22b   :  { %5537 = vxpose.xlu0.b32.cont [10/16] (narrow) %v12186_v43, 56  ;;  %5561 = vxpose.xlu1.b32.cont [2/16] (narrow) %v9483_v44, 56  ;;  %v12370_v14 = vpop.f32.mrf.mxu0  ;;  %v261_v43 = vld [vmem:[%s14820_s0 + $0x7a0] sm:$0xff] }
 0x22c   :  { %v12376_v44 = vpop.trf.xlu0 }
 0x22d   :  { %14866 = vst [vmem:[#allocation44_spill] sm:$0xff] %v12376_v44  ;;  %v12378_v4 = vpop.f32.mrf.mxu0  ;;  %9197 = vmatmul.mubr.msk.f32.gmra.mxu0 %vm530_vm1, %v260_v15 }
 0x22e   :  { %9199 = vmatprep.mubr.msk.f32.mxu0 %vm530_vm1, %v261_v43  ;;  %v264_v43 = vld [vmem:[%s14820_s0 + $0x7b8] sm:$0xff] }
 0x22f   :  { %5538 = vxpose.xlu0.b32.cont [11/16] (narrow) %v12230_v1, 56  ;;  %5562 = vxpose.xlu1.b32.cont [3/16] (narrow) %v4307_v54, 56  ;;  %v12385_v17 = vpop.f32.mrf.mxu0  ;;  %v263_v1 = vld [vmem:[%s14820_s0 + $0x7b0] sm:$0xff]  ;;  %v12391_v54 = vpop.trf.xlu1 }
 0x230   :  { %14867 = vst [vmem:[#allocation45_spill] sm:$0xff] %v12391_v54  ;;  %v12393_v44 = vpop.trf.xlu0 }
 0x231   :  { %14868 = vst [vmem:[#allocation46_spill] sm:$0xff] %v12393_v44  ;;  %v12395_v15 = vpop.f32.mrf.mxu0  ;;  %9200 = vmatmul.mubr.msk.f32.gmra.mxu0 %vm530_vm1, %v262_v20  ;;  %v9492_v44 = vpop.f32.mrf.mxu1 }
 0x232   :  { %14869 = vst [vmem:[#allocation47_spill] sm:$0xff] %v12395_v15  ;;  %9202 = vmatprep.mubr.msk.f32.mxu0 %vm530_vm1, %v263_v1  ;;  %v266_v1 = vld [vmem:[%s14820_s0 + $0x7c8] sm:$0xff] }
 0x233   :  { %5539 = vxpose.xlu0.b32.cont [12/16] (narrow) %v12216_v39, 56  ;;  %5563 = vxpose.xlu1.b32.cont [4/16] (narrow) %v9486_v9, 56  ;;  %v12402_v40 = vpop.f32.mrf.mxu0  ;;  %v265_v9 = vld [vmem:[%s14820_s0 + $0x7c0] sm:$0xff]  ;;  %v12413_v20 = vpop.trf.xlu1 }
 0x234   :  { %v12408_v39 = vpop.trf.xlu0  ;;  %14871 = vst [vmem:[#allocation49_spill] sm:$0xff] %v12413_v20  ;;  %v4327_v20 = vpop.f32.mrf.mxu1 }
 0x235   :  { %14870 = vst [vmem:[#allocation48_spill] sm:$0xff] %v12408_v39  ;;  %v12410_v54 = vpop.f32.mrf.mxu0  ;;  %9203 = vmatmul.mubr.msk.f32.gmra.mxu0 %vm530_vm1, %v264_v43 }
 0x236   :  { %9205 = vmatprep.mubr.msk.f32.mxu0 %vm530_vm1, %v265_v9  ;;  %v268_v9 = vld [vmem:[%s14820_s0 + $0x7d8] sm:$0xff] }
 0x237   :  { %5540 = vxpose.xlu0.b32.cont [13/16] (narrow) %v12262_v49, 56  ;;  %5564 = vxpose.xlu1.b32.cont [5/16] (narrow) %v4317_v47, 56  ;;  %v12419_v15 = vpop.f32.mrf.mxu0  ;;  %v267_v47 = vld [vmem:[%s14820_s0 + $0x7d0] sm:$0xff] }
 0x238   :  { %v12425_v49 = vpop.trf.xlu0 }
 0x239   :  { %14872 = vst [vmem:[#allocation50_spill] sm:$0xff] %v12425_v49  ;;  %v12427_v43 = vpop.f32.mrf.mxu0  ;;  %9206 = vmatmul.mubr.msk.f32.gmra.mxu0 %vm530_vm1, %v266_v1 }
 0x23a   :  { %14873 = vst [vmem:[#allocation51_spill] sm:$0xff] %v12427_v43  ;;  %9208 = vmatprep.mubr.msk.f32.mxu0 %vm530_vm1, %v267_v47  ;;  %v270_v47 = vld [vmem:[%s14820_s0 + $0x7e8] sm:$0xff]  ;;  %v9495_v43 = vpop.f32.mrf.mxu1 }
 0x23b   :  { %5541 = vxpose.xlu0.b32.cont [14/16] (narrow) %v12246_v21, 56  ;;  %5565 = vxpose.xlu1.b32.cont [6/16] (narrow) %v9489_v37, 56  ;;  %v12434_v39 = vpop.f32.mrf.mxu0  ;;  %v269_v21 = vld [vmem:[%s14820_s0 + $0x7e0] sm:$0xff]  ;;  %v12440_v37 = vpop.trf.xlu1 }
 0x23c   :  { %14874 = vst [vmem:[#allocation52_spill] sm:$0xff] %v12434_v39  ;;  %14875 = vst [vmem:[#allocation53_spill] sm:$0xff] %v12440_v37  ;;  %v12442_v49 = vpop.trf.xlu0  ;;  %v4337_v37 = vpop.f32.mrf.mxu1 }
 0x23d   :  { %14876 = vst [vmem:[#allocation54_spill] sm:$0xff] %v12442_v49  ;;  %v12444_v1 = vpop.f32.mrf.mxu0  ;;  %9209 = vmatmul.mubr.msk.f32.gmra.mxu0 %vm530_vm1, %v268_v9 }
 0x23e   :  { %14877 = vst [vmem:[#allocation55_spill] sm:$0xff] %v12444_v1  ;;  %9211 = vmatprep.mubr.msk.f32.mxu0 %vm530_vm1, %v269_v21  ;;  %v272_v21 = vld [vmem:[%s14820_s0 + $0x7f8] sm:$0xff] }
 0x23f   :  { %5542 = vxpose.xlu0.b32.cont [15/16] (narrow) %v12300_v23, 56  ;;  %5566 = vxpose.xlu1.b32.cont [7/16] (narrow) %v4327_v20, 56  ;;  %v12451_v39 = vpop.f32.mrf.mxu0  ;;  %v271_v23 = vld [vmem:[%s14820_s0 + $0x7f0] sm:$0xff]  ;;  %v12462_v9 = vpop.trf.xlu1 }
 0x240   :  { %14880 = vst [vmem:[#allocation58_spill] sm:$0xff] %v12462_v9 }
 0x241   :  { %v12459_v49 = vpop.f32.mrf.mxu0  ;;  %9212 = vmatmul.mubr.msk.f32.gmra.mxu0 %vm530_vm1, %v270_v47 }
 0x242   :  { %14879 = vst [vmem:[#allocation57_spill] sm:$0xff] %v12459_v49  ;;  %9214 = vmatprep.mubr.msk.f32.mxu0 %vm530_vm1, %v271_v23  ;;  %v274_v23 = vld [vmem:[%s14820_s0 + $0x808] sm:$0xff]  ;;  %v281_v49 = vld [vmem:[%s14820_s0 + $0x840] sm:$0xff] }
 0x243   :  { %5543 = vxpose.xlu0.b32.end [16/16] (narrow) %v12280_v48, 56  ;;  %5567 = vxpose.xlu1.b32.cont [8/16] (narrow) %v9492_v44, 56  ;;  %v12457_v20 = vpop.trf.xlu0  ;;  %v12468_v1 = vpop.f32.mrf.mxu0  ;;  %v273_v48 = vld [vmem:[%s14820_s0 + $0x800] sm:$0xff] }
 0x244   :  { %14878 = vst [vmem:[#allocation56_spill] sm:$0xff] %v12457_v20  ;;  %v9498_v20 = vpop.f32.mrf.mxu1 }
 0x245   :  { %v12474_v47 = vpop.f32.mrf.mxu0  ;;  %9215 = vmatmul.mubr.msk.f32.gmra.mxu0 %vm530_vm1, %v272_v21 }
 0x246   :  { %14881 = vst [vmem:[#allocation59_spill] sm:$0xff] %v12474_v47  ;;  %9217 = vmatprep.mubr.msk.f32.mxu0 %vm530_vm1, %v273_v48  ;;  %v276_v48 = vld [vmem:[%s14820_s0 + $0x818] sm:$0xff] }
 0x247   :  { %5568 = vxpose.xlu1.b32.cont [9/16] (narrow) %v4337_v37, 56  ;;  %4888 = vxpose.xlu0.b32.start [1/16] (narrow) %v11951_v60, 56  ;;  %v4841_v44 = vpop.trf.xlu0  ;;  %v12481_v9 = vpop.f32.mrf.mxu0  ;;  %v275_v37 = vld [vmem:[%s14820_s0 + $0x810] sm:$0xff] }
 0x248   :  { %9639 = vmatprep.mubr.f32.mxu1 %v4841_v44  ;;  %14882 = vst [vmem:[#allocation60_spill] sm:$0xff] %v12481_v9  ;;  %v12487_v60 = vpop.trf.xlu1  ;;  %v4347_v44 = vpop.f32.mrf.mxu1 }
 0x249   :  { %14883 = vst [vmem:[#allocation61_spill] sm:$0xff] %v12487_v60  ;;  %v12489_v21 = vpop.f32.mrf.mxu0  ;;  %9218 = vmatmul.mubr.msk.f32.gmra.mxu0 %vm530_vm1, %v274_v23 }
 0x24a   :  { %9220 = vmatprep.mubr.msk.f32.mxu0 %vm530_vm1, %v275_v37  ;;  %v278_v37 = vld [vmem:[%s14820_s0 + $0x828] sm:$0xff]  ;;  %v9501_v60 = vpop.f32.mrf.mxu1 }
 0x24b   :  { %5569 = vxpose.xlu1.b32.cont [10/16] (narrow) %v9495_v43, 56  ;;  %4889 = vxpose.xlu0.b32.cont [2/16] (narrow) %v11945_v32, 56  ;;  %v12496_v47 = vpop.f32.mrf.mxu0  ;;  %v277_v43 = vld [vmem:[%s14820_s0 + $0x820] sm:$0xff] }
 0x24c   :  { %v12505_v23 = vpop.trf.xlu1 }
 0x24d   :  { %v12502_v32 = vpop.f32.mrf.mxu0  ;;  %9221 = vmatmul.mubr.msk.f32.gmra.mxu0 %vm530_vm1, %v276_v48  ;;  %14884 = vst [vmem:[#allocation62_spill] sm:$0xff] %v12505_v23  ;;  %v280_v48 = vld [vmem:[%s14820_s0 + $0x838] sm:$0xff] }
 0x24e   :  { %9223 = vmatprep.mubr.msk.f32.mxu0 %vm530_vm1, %v277_v43  ;;  %v4357_v43 = vpop.f32.mrf.mxu1 }
 0x24f   :  { %5570 = vxpose.xlu1.b32.cont [11/16] (narrow) %v4347_v44, 56  ;;  %4890 = vxpose.xlu0.b32.cont [3/16] (narrow) %v11968_v62, 56  ;;  %v12511_v9 = vpop.f32.mrf.mxu0  ;;  %v279_v44 = vld [vmem:[%s14820_s0 + $0x830] sm:$0xff] }
 0x251   :  { %v12517_v62 = vpop.f32.mrf.mxu0  ;;  %9224 = vmatmul.mubr.msk.f32.gmra.mxu0 %vm530_vm1, %v278_v37  ;;  %v282_v37 = vld [vmem:[%s14820_s0 + $0x848] sm:$0xff] }
 0x252   :  { %14885 = vst [vmem:[#allocation63_spill] sm:$0xff] %v12517_v62  ;;  %9226 = vmatprep.mubr.msk.f32.mxu0 %vm530_vm1, %v279_v44  ;;  %v9504_v44 = vpop.f32.mrf.mxu1 }
 0x253   :  { %5571 = vxpose.xlu1.b32.cont [12/16] (narrow) %v9498_v20, 56  ;;  %4891 = vxpose.xlu0.b32.cont [4/16] (narrow) %v11962_v29, 56  ;;  %v12524_v23 = vpop.f32.mrf.mxu0  ;;  %v12530_v29 = vpop.trf.xlu1 }
 0x254   :  { %14886 = vst [vmem:[#allocation64_spill] sm:$0xff] %v12530_v29  ;;  %v4367_v29 = vpop.f32.mrf.mxu1 }
 0x255   :  { %v12532_v20 = vpop.f32.mrf.mxu0  ;;  %9227 = vmatmul.mubr.msk.f32.gmra.mxu0 %vm530_vm1, %v280_v48 }
 0x256   :  { %14887 = vst [vmem:[#allocation65_spill] sm:$0xff] %v12532_v20  ;;  %9229 = vmatprep.mubr.msk.f32.mxu0 %vm530_vm1, %v281_v49  ;;  %v284_v49 = vld [vmem:[%s14820_s0 + $0x858] sm:$0xff] }
 0x257   :  { %5572 = vxpose.xlu1.b32.cont [13/16] (narrow) %v4357_v43, 56  ;;  %4892 = vxpose.xlu0.b32.cont [5/16] (narrow) %v11983_v34, 56  ;;  %v12539_v62 = vpop.f32.mrf.mxu0  ;;  %v283_v43 = vld [vmem:[%s14820_s0 + $0x850] sm:$0xff]  ;;  %v12548_v48 = vpop.trf.xlu1 }
 0x258   :  { %14888 = vst [vmem:[#allocation66_spill] sm:$0xff] %v12548_v48  ;;  %v287_v48 = vld [vmem:[%s14820_s0 + $0x870] sm:$0xff] }
 0x259   :  { %v12545_v34 = vpop.f32.mrf.mxu0  ;;  %9230 = vmatmul.mubr.msk.f32.gmra.mxu0 %vm530_vm1, %v282_v37  ;;  %v286_v37 = vld [vmem:[%s14820_s0 + $0x868] sm:$0xff] }
 0x25a   :  { %9232 = vmatprep.mubr.msk.f32.mxu0 %vm530_vm1, %v283_v43 }
 0x25b   :  { %5573 = vxpose.xlu1.b32.cont [14/16] (narrow) %v9501_v60, 56  ;;  %4893 = vxpose.xlu0.b32.cont [6/16] (narrow) %v11975_v12, 56  ;;  %v12554_v20 = vpop.f32.mrf.mxu0  ;;  %v285_v60 = vld [vmem:[%s14820_s0 + $0x860] sm:$0xff] }
 0x25d   :  { %v12560_v12 = vpop.f32.mrf.mxu0  ;;  %9233 = vmatmul.mubr.msk.f32.gmra.mxu0 %vm530_vm1, %v284_v49  ;;  %v288_v49 = vld [vmem:[%s14820_s0 + $0x878] sm:$0xff] }
 0x25e   :  { %9235 = vmatprep.mubr.msk.f32.mxu0 %vm530_vm1, %v285_v60 }
 0x25f   :  { %5574 = vxpose.xlu1.b32.cont [15/16] (narrow) %v4367_v29, 56  ;;  %4894 = vxpose.xlu0.b32.cont [7/16] (narrow) %v11996_v11, 56  ;;  %v12567_v43 = vpop.f32.mrf.mxu0 }
 0x261   :  { %v12575_v29 = vpop.f32.mrf.mxu0  ;;  %9236 = vmatmul.mubr.msk.f32.gmra.mxu0 %vm530_vm1, %v286_v37 }
 0x262   :  { %9238 = vmatprep.mubr.msk.f32.mxu0 %vm530_vm1, %v287_v48  ;;  %v290_v48 = vld [vmem:[%s14820_s0 + $0x888] sm:$0xff] }
 0x263   :  { %5575 = vxpose.xlu1.b32.end [16/16] (narrow) %v9504_v44, 56  ;;  %4895 = vxpose.xlu0.b32.cont [8/16] (narrow) %v11990_v31, 56  ;;  %v12573_v11 = vpop.trf.xlu1  ;;  %v12582_v60 = vpop.f32.mrf.mxu0  ;;  %v289_v44 = vld [vmem:[%s14820_s0 + $0x880] sm:$0xff] }
 0x264   :  { %14889 = vst [vmem:[#allocation67_spill] sm:$0xff] %v12573_v11 }
 0x265   :  { %v12589_v11 = vpop.f32.mrf.mxu0  ;;  %9239 = vmatmul.mubr.msk.f32.gmra.mxu0 %vm530_vm1, %v288_v49  ;;  %v292_v49 = vld [vmem:[%s14820_s0 + $0x898] sm:$0xff] }
 0x266   :  { %9241 = vmatprep.mubr.msk.f32.mxu0 %vm530_vm1, %v289_v44 }
 0x267   :  { %4896 = vxpose.xlu0.b32.cont [9/16] (narrow) %v12011_v63, 56  ;;  %4920 = vxpose.xlu1.b32.start [1/16] (narrow) %v12071_v10, 56  ;;  %v4873_v31 = vpop.trf.xlu1  ;;  %v12596_v37 = vpop.f32.mrf.mxu0  ;;  %v291_v63 = vld [vmem:[%s14820_s0 + $0x890] sm:$0xff] }
 0x268   :  { %9640 = vmatmul.mubr.f32.gmra.mxu1 %v4873_v31  ;;  %v293_v31 = vld [vmem:[%s14820_s0 + $0x8a0] sm:$0xff] }
 0x269   :  { %v12603_v10 = vpop.f32.mrf.mxu0  ;;  %9242 = vmatmul.mubr.msk.f32.gmra.mxu0 %vm530_vm1, %v290_v48 }
 0x26a   :  { %9244 = vmatprep.mubr.msk.f32.mxu0 %vm530_vm1, %v291_v63  ;;  %v295_v63 = vld [vmem:[%s14820_s0 + $0x8b0] sm:$0xff] }
 0x26b   :  { %4897 = vxpose.xlu0.b32.cont [10/16] (narrow) %v12005_v52, 56  ;;  %4921 = vxpose.xlu1.b32.cont [2/16] (narrow) %v12061_v16, 56  ;;  %v12610_v44 = vpop.f32.mrf.mxu0  ;;  %v294_v16 = vld [vmem:[%s14820_s0 + $0x8a8] sm:$0xff] }
 0x26d   :  { %v12617_v52 = vpop.f32.mrf.mxu0  ;;  %9245 = vmatmul.mubr.msk.f32.gmra.mxu0 %vm530_vm1, %v292_v49 }
 0x26e   :  { %9247 = vmatprep.mubr.msk.f32.mxu0 %vm530_vm1, %v293_v31  ;;  %v297_v31 = vld [vmem:[%s14820_s0 + $0x8c0] sm:$0xff] }
 0x26f   :  { %4898 = vxpose.xlu0.b32.cont [11/16] (narrow) %v12026_v42, 56  ;;  %4922 = vxpose.xlu1.b32.cont [3/16] (narrow) %v12087_v19, 56  ;;  %v12624_v48 = vpop.f32.mrf.mxu0  ;;  %v296_v19 = vld [vmem:[%s14820_s0 + $0x8b8] sm:$0xff] }
 0x271   :  { %v12631_v42 = vpop.f32.mrf.mxu0  ;;  %9248 = vmatmul.mubr.msk.f32.gmra.mxu0 %vm530_vm1, %v294_v16 }
 0x272   :  { %9250 = vmatprep.mubr.msk.f32.mxu0 %vm530_vm1, %v295_v63  ;;  %v299_v63 = vld [vmem:[%s14820_s0 + $0x8d0] sm:$0xff] }
 0x273   :  { %4899 = vxpose.xlu0.b32.cont [12/16] (narrow) %v12018_v0, 56  ;;  %4923 = vxpose.xlu1.b32.cont [4/16] (narrow) %v12078_v46, 56  ;;  %v12638_v49 = vpop.f32.mrf.mxu0  ;;  %v298_v0 = vld [vmem:[%s14820_s0 + $0x8c8] sm:$0xff] }
 0x275   :  { %v12645_v46 = vpop.f32.mrf.mxu0  ;;  %9251 = vmatmul.mubr.msk.f32.gmra.mxu0 %vm530_vm1, %v296_v19 }
 0x276   :  { %9253 = vmatprep.mubr.msk.f32.mxu0 %vm530_vm1, %v297_v31  ;;  %v301_v31 = vld [vmem:[%s14820_s0 + $0x8e0] sm:$0xff] }
 0x277   :  { %4900 = vxpose.xlu0.b32.cont [13/16] (narrow) %v12039_v51, 56  ;;  %4924 = vxpose.xlu1.b32.cont [5/16] (narrow) %v12103_v18, 56  ;;  %v12652_v16 = vpop.f32.mrf.mxu0  ;;  %v300_v18 = vld [vmem:[%s14820_s0 + $0x8d8] sm:$0xff] }
 0x279   :  { %v12659_v51 = vpop.f32.mrf.mxu0  ;;  %9254 = vmatmul.mubr.msk.f32.gmra.mxu0 %vm530_vm1, %v298_v0 }
 0x27a   :  { %9256 = vmatprep.mubr.msk.f32.mxu0 %vm530_vm1, %v299_v63  ;;  %v303_v63 = vld [vmem:[%s14820_s0 + $0x8f0] sm:$0xff] }
 0x27b   :  { %4901 = vxpose.xlu0.b32.cont [14/16] (narrow) %v12033_v38, 56  ;;  %4925 = vxpose.xlu1.b32.cont [6/16] (narrow) %v12094_v26, 56  ;;  %v12666_v19 = vpop.f32.mrf.mxu0  ;;  %v302_v26 = vld [vmem:[%s14820_s0 + $0x8e8] sm:$0xff] }
 0x27d   :  { %v12673_v38 = vpop.f32.mrf.mxu0  ;;  %9257 = vmatmul.mubr.msk.f32.gmra.mxu0 %vm530_vm1, %v300_v18 }
 0x27e   :  { %9259 = vmatprep.mubr.msk.f32.mxu0 %vm530_vm1, %v301_v31  ;;  %v305_v31 = vld [vmem:[%s14820_s0 + $0x900] sm:$0xff] }
 0x27f   :  { %4902 = vxpose.xlu0.b32.cont [15/16] (narrow) %v12054_v55, 56  ;;  %4926 = vxpose.xlu1.b32.cont [7/16] (narrow) %v12120_v27, 56  ;;  %v12680_v0 = vpop.f32.mrf.mxu0  ;;  %v304_v27 = vld [vmem:[%s14820_s0 + $0x8f8] sm:$0xff] }
 0x281   :  { %v12687_v55 = vpop.f32.mrf.mxu0  ;;  %9260 = vmatmul.mubr.msk.f32.gmra.mxu0 %vm530_vm1, %v302_v26 }
 0x282   :  { %9262 = vmatprep.mubr.msk.f32.mxu0 %vm530_vm1, %v303_v63  ;;  %v307_v63 = vld [vmem:[%s14820_s0 + $0x910] sm:$0xff] }
 0x283   :  { %4903 = vxpose.xlu0.b32.end [16/16] (narrow) %v12048_v53, 56  ;;  %4927 = vxpose.xlu1.b32.cont [8/16] (narrow) %v12115_v59, 56  ;;  %v12694_v18 = vpop.f32.mrf.mxu0  ;;  %v306_v53 = vld [vmem:[%s14820_s0 + $0x908] sm:$0xff] }
 0x285   :  { %v12701_v59 = vpop.f32.mrf.mxu0  ;;  %9263 = vmatmul.mubr.msk.f32.gmra.mxu0 %vm530_vm1, %v304_v27 }
 0x286   :  { %9265 = vmatprep.mubr.msk.f32.mxu0 %vm530_vm1, %v305_v31  ;;  %v309_v31 = vld [vmem:[%s14820_s0 + $0x920] sm:$0xff] }
 0x287   :  { %4928 = vxpose.xlu1.b32.cont [9/16] (narrow) %v12145_v28, 56  ;;  %4952 = vxpose.xlu0.b32.start [1/16] (narrow) %v12223_v22, 56  ;;  %v12708_v26 = vpop.f32.mrf.mxu0  ;;  %v308_v22 = vld [vmem:[%s14820_s0 + $0x918] sm:$0xff] }
 0x289   :  { %v12715_v28 = vpop.f32.mrf.mxu0  ;;  %9266 = vmatmul.mubr.msk.f32.gmra.mxu0 %vm530_vm1, %v306_v53 }
 0x28a   :  { %9268 = vmatprep.mubr.msk.f32.mxu0 %vm530_vm1, %v307_v63  ;;  %v311_v63 = vld [vmem:[%s14820_s0 + $0x930] sm:$0xff] }
 0x28b   :  { %4929 = vxpose.xlu1.b32.cont [10/16] (narrow) %v12134_v57, 56  ;;  %4953 = vxpose.xlu0.b32.cont [2/16] (narrow) %v12211_v36, 56  ;;  %v12722_v27 = vpop.f32.mrf.mxu0  ;;  %v310_v36 = vld [vmem:[%s14820_s0 + $0x928] sm:$0xff] }
 0x28d   :  { %v12729_v57 = vpop.f32.mrf.mxu0  ;;  %9269 = vmatmul.mubr.msk.f32.gmra.mxu0 %vm530_vm1, %v308_v22  ;;  %v312_v22 = vld [vmem:[%s14820_s0 + $0x938] sm:$0xff] }
 0x28e   :  { %9271 = vmatprep.mubr.msk.f32.mxu0 %vm530_vm1, %v309_v31 }
 0x28f   :  { %4930 = vxpose.xlu1.b32.cont [11/16] (narrow) %v12163_v7, 56  ;;  %4954 = vxpose.xlu0.b32.cont [3/16] (narrow) %v12240_v24, 56  ;;  %v12736_v53 = vpop.f32.mrf.mxu0  ;;  %v12743_v7 = vpop.trf.xlu0 }
 0x290   :  { %14890 = vst [vmem:[#allocation68_spill] sm:$0xff] %v12743_v7 }
 0x291   :  { %v12745_v24 = vpop.f32.mrf.mxu0  ;;  %9272 = vmatmul.mubr.msk.f32.gmra.mxu0 %vm530_vm1, %v310_v36  ;;  %v314_v36 = vld [vmem:[%s14820_s0 + $0x948] sm:$0xff] }
 0x292   :  { %9274 = vmatprep.mubr.msk.f32.mxu0 %vm530_vm1, %v311_v63 }
 0x293   :  { %4931 = vxpose.xlu1.b32.cont [12/16] (narrow) %v12154_v2, 56  ;;  %4955 = vxpose.xlu0.b32.cont [4/16] (narrow) %v12232_v5, 56  ;;  %v12752_v31 = vpop.f32.mrf.mxu0  ;;  %v313_v2 = vld [vmem:[%s14820_s0 + $0x940] sm:$0xff]  ;;  %v12759_v5 = vpop.trf.xlu0 }
 0x294   :  { %14891 = vst [vmem:[#allocation69_spill] sm:$0xff] %v12759_v5 }
 0x295   :  { %v12761_v7 = vpop.f32.mrf.mxu0  ;;  %9275 = vmatmul.mubr.msk.f32.gmra.mxu0 %vm530_vm1, %v312_v22 }
 0x296   :  { %14892 = vst [vmem:[#allocation70_spill] sm:$0xff] %v12761_v7  ;;  %9277 = vmatprep.mubr.msk.f32.mxu0 %vm530_vm1, %v313_v2  ;;  %v316_v2 = vld [vmem:[%s14820_s0 + $0x958] sm:$0xff] }
 0x297   :  { %4932 = vxpose.xlu1.b32.cont [13/16] (narrow) %v12180_v6, 56  ;;  %4956 = vxpose.xlu0.b32.cont [5/16] (narrow) %v12264_v3, 56  ;;  %v12768_v63 = vpop.f32.mrf.mxu0  ;;  %v315_v6 = vld [vmem:[%s14820_s0 + $0x950] sm:$0xff]  ;;  %v12775_v3 = vpop.trf.xlu1 }
 0x298   :  { %14893 = vst [vmem:[#allocation71_spill] sm:$0xff] %v12775_v3  ;;  %v12777_v5 = vpop.trf.xlu0 }
 0x299   :  { %14894 = vst [vmem:[#allocation72_spill] sm:$0xff] %v12777_v5  ;;  %v12779_v22 = vpop.f32.mrf.mxu0  ;;  %9278 = vmatmul.mubr.msk.f32.gmra.mxu0 %vm530_vm1, %v314_v36  ;;  %v318_v36 = vld [vmem:[%s14820_s0 + $0x968] sm:$0xff] }
 0x29a   :  { %9280 = vmatprep.mubr.msk.f32.mxu0 %vm530_vm1, %v315_v6 }
 0x29b   :  { %4933 = vxpose.xlu1.b32.cont [14/16] (narrow) %v12175_v45, 56  ;;  %4957 = vxpose.xlu0.b32.cont [6/16] (narrow) %v12255_v56, 56  ;;  %v12786_v7 = vpop.f32.mrf.mxu0  ;;  %v317_v45 = vld [vmem:[%s14820_s0 + $0x960] sm:$0xff]  ;;  %v12802_v6 = vpop.trf.xlu1 }
 0x29c   :  { %v12793_v56 = vpop.trf.xlu0  ;;  %14896 = vst [vmem:[#allocation74_spill] sm:$0xff] %v12802_v6 }
 0x29d   :  { %14895 = vst [vmem:[#allocation73_spill] sm:$0xff] %v12793_v56  ;;  %v12795_v5 = vpop.f32.mrf.mxu0  ;;  %9281 = vmatmul.mubr.msk.f32.gmra.mxu0 %vm530_vm1, %v316_v2 }
 0x29e   :  { %9283 = vmatprep.mubr.msk.f32.mxu0 %vm530_vm1, %v317_v45  ;;  %v320_v45 = vld [vmem:[%s14820_s0 + $0x978] sm:$0xff] }
 0x29f   :  { %4934 = vxpose.xlu1.b32.cont [15/16] (narrow) %v12202_v50, 56  ;;  %4958 = vxpose.xlu0.b32.cont [7/16] (narrow) %v12282_v13, 56  ;;  %v12804_v3 = vpop.f32.mrf.mxu0  ;;  %v319_v13 = vld [vmem:[%s14820_s0 + $0x970] sm:$0xff] }
 0x2a0   :  { %v12811_v50 = vpop.trf.xlu0 }
 0x2a1   :  { %14897 = vst [vmem:[#allocation75_spill] sm:$0xff] %v12811_v50  ;;  %v12813_v2 = vpop.f32.mrf.mxu0  ;;  %9284 = vmatmul.mubr.msk.f32.gmra.mxu0 %vm530_vm1, %v318_v36 }
 0x2a2   :  { %9286 = vmatprep.mubr.msk.f32.mxu0 %vm530_vm1, %v319_v13  ;;  %v322_v13 = vld [vmem:[%s14820_s0 + $0x988] sm:$0xff] }
 0x2a3   :  { %4935 = vxpose.xlu1.b32.end [16/16] (narrow) %v12194_v25, 56  ;;  %4959 = vxpose.xlu0.b32.cont [8/16] (narrow) %v12273_v8, 56  ;;  %v12820_v56 = vpop.f32.mrf.mxu0  ;;  %v321_v25 = vld [vmem:[%s14820_s0 + $0x980] sm:$0xff]  ;;  %v12827_v8 = vpop.trf.xlu1 }
 0x2a4   :  { %14898 = vst [vmem:[#allocation76_spill] sm:$0xff] %v12827_v8  ;;  %v12829_v50 = vpop.trf.xlu0 }
 0x2a5   :  { %14899 = vst [vmem:[#allocation77_spill] sm:$0xff] %v12829_v50  ;;  %v12831_v36 = vpop.f32.mrf.mxu0  ;;  %9287 = vmatmul.mubr.msk.f32.gmra.mxu0 %vm530_vm1, %v320_v45 }
 0x2a6   :  { %14900 = vst [vmem:[#allocation78_spill] sm:$0xff] %v12831_v36  ;;  %9289 = vmatprep.mubr.msk.f32.mxu0 %vm530_vm1, %v321_v25  ;;  %v324_v25 = vld [vmem:[%s14820_s0 + $0x998] sm:$0xff] }
 0x2a7   :  { %4960 = vxpose.xlu0.b32.cont [9/16] (narrow) %v12302_v58, 56  ;;  %4984 = vxpose.xlu1.b32.start [1/16] (narrow) %v12370_v14, 56  ;;  %v12838_v6 = vpop.f32.mrf.mxu0  ;;  %v323_v58 = vld [vmem:[%s14820_s0 + $0x990] sm:$0xff]  ;;  %v12850_v45 = vpop.trf.xlu1  ;;  %v14913_v36 = vld [vmem:[#allocation41_spill] sm:$0xff] }
 0x2a8   :  { %v12845_v14 = vpop.trf.xlu0  ;;  %14902 = vst [vmem:[#allocation80_spill] sm:$0xff] %v12850_v45 }
 0x2a9   :  { %14901 = vst [vmem:[#allocation79_spill] sm:$0xff] %v12845_v14  ;;  %v12847_v50 = vpop.f32.mrf.mxu0  ;;  %9290 = vmatmul.mubr.msk.f32.gmra.mxu0 %vm530_vm1, %v322_v13 }
 0x2aa   :  { %9292 = vmatprep.mubr.msk.f32.mxu0 %vm530_vm1, %v323_v58  ;;  %v326_v58 = vld [vmem:[%s14820_s0 + $0x9a8] sm:$0xff] }
 0x2ab   :  { %4961 = vxpose.xlu0.b32.cont [10/16] (narrow) %v12293_v30, 56  ;;  %4985 = vxpose.xlu1.b32.cont [2/16] (narrow) %v12361_v33, 56  ;;  %v12856_v8 = vpop.f32.mrf.mxu0  ;;  %v325_v30 = vld [vmem:[%s14820_s0 + $0x9a0] sm:$0xff] }
 0x2ac   :  { %v12863_v33 = vpop.trf.xlu0 }
 0x2ad   :  { %14903 = vst [vmem:[#allocation81_spill] sm:$0xff] %v12863_v33  ;;  %v12865_v13 = vpop.f32.mrf.mxu0  ;;  %9293 = vmatmul.mubr.msk.f32.gmra.mxu0 %vm530_vm1, %v324_v25 }
 0x2ae   :  { %9295 = vmatprep.mubr.msk.f32.mxu0 %vm530_vm1, %v325_v30  ;;  %v328_v30 = vld [vmem:[%s14820_s0 + $0x9b8] sm:$0xff] }
 0x2af   :  { %4962 = vxpose.xlu0.b32.cont [11/16] (narrow) %v12320_v35, 56  ;;  %4986 = vxpose.xlu1.b32.cont [3/16] (narrow) %v12385_v17, 56  ;;  %v12872_v45 = vpop.f32.mrf.mxu0  ;;  %v327_v35 = vld [vmem:[%s14820_s0 + $0x9b0] sm:$0xff]  ;;  %v12879_v17 = vpop.trf.xlu1 }
 0x2b0   :  { %14904 = vst [vmem:[#allocation82_spill] sm:$0xff] %v12879_v17  ;;  %v12881_v33 = vpop.trf.xlu0 }
 0x2b1   :  { %14905 = vst [vmem:[#allocation83_spill] sm:$0xff] %v12881_v33  ;;  %v12883_v25 = vpop.f32.mrf.mxu0  ;;  %9296 = vmatmul.mubr.msk.f32.gmra.mxu0 %vm530_vm1, %v326_v58 }
 0x2b2   :  { %9298 = vmatprep.mubr.msk.f32.mxu0 %vm530_vm1, %v327_v35  ;;  %v330_v35 = vld [vmem:[%s14820_s0 + $0x9c8] sm:$0xff] }
 0x2b3   :  { %4963 = vxpose.xlu0.b32.cont [12/16] (narrow) %v12311_v41, 56  ;;  %4987 = vxpose.xlu1.b32.cont [4/16] (narrow) %v12378_v4, 56  ;;  %v12890_v14 = vpop.f32.mrf.mxu0  ;;  %v329_v41 = vld [vmem:[%s14820_s0 + $0x9c0] sm:$0xff]  ;;  %v12902_v58 = vpop.trf.xlu1 }
 0x2b4   :  { %v12897_v4 = vpop.trf.xlu0  ;;  %14908 = vst [vmem:[#allocation86_spill] sm:$0xff] %v12902_v58 }
 0x2b5   :  { %14906 = vst [vmem:[#allocation84_spill] sm:$0xff] %v12897_v4  ;;  %v12899_v17 = vpop.f32.mrf.mxu0  ;;  %9299 = vmatmul.mubr.msk.f32.gmra.mxu0 %vm530_vm1, %v328_v30  ;;  %v14910_v4 = vld [vmem:[#allocation47_spill] sm:$0xff] }
 0x2b6   :  { %14907 = vst [vmem:[#allocation85_spill] sm:$0xff] %v12899_v17  ;;  %9301 = vmatprep.mubr.msk.f32.mxu0 %vm530_vm1, %v329_v41  ;;  %v332_v41 = vld [vmem:[%s14820_s0 + $0x9d8] sm:$0xff] }
 0x2b7   :  { %4964 = vxpose.xlu0.b32.cont [13/16] (narrow) %v12336_v61, 56  ;;  %4988 = vxpose.xlu1.b32.cont [5/16] (narrow) %v12402_v40, 56  ;;  %v12908_v33 = vpop.f32.mrf.mxu0  ;;  %v331_v61 = vld [vmem:[%s14820_s0 + $0x9d0] sm:$0xff]  ;;  %v14909_v40 = vld [vmem:[#allocation37_spill] sm:$0xff] }
 0x2b8   :  { %v12915_v17 = vpop.trf.xlu0 }
 0x2b9   :  { %14911 = vst [vmem:[#allocation37_spill] sm:$0xff] %v12915_v17  ;;  %v12917_v30 = vpop.f32.mrf.mxu0  ;;  %9302 = vmatmul.mubr.msk.f32.gmra.mxu0 %vm530_vm1, %v330_v35 }
 0x2ba   :  { %14912 = vst [vmem:[#allocation47_spill] sm:$0xff] %v12917_v30  ;;  %9304 = vmatprep.mubr.msk.f32.mxu0 %vm530_vm1, %v331_v61  ;;  %v334_v61 = vld [vmem:[%s14820_s0 + $0x9e8] sm:$0xff] }
 0x2bb   :  { %4965 = vxpose.xlu0.b32.cont [14/16] (narrow) %v14909_v40, 56  ;;  %4989 = vxpose.xlu1.b32.cont [6/16] (narrow) %v14910_v4, 56  ;;  %v12924_v58 = vpop.f32.mrf.mxu0  ;;  %v333_v40 = vld [vmem:[%s14820_s0 + $0x9e0] sm:$0xff]  ;;  %v12931_v4 = vpop.trf.xlu1 }
 0x2bc   :  { %14914 = vst [vmem:[#allocation41_spill] sm:$0xff] %v12931_v4  ;;  %v12933_v17 = vpop.trf.xlu0 }
 0x2bd   :  { %14915 = vst [vmem:[#allocation87_spill] sm:$0xff] %v12933_v17  ;;  %v12935_v35 = vpop.f32.mrf.mxu0  ;;  %9305 = vmatmul.mubr.msk.f32.gmra.mxu0 %vm530_vm1, %v332_v41 }
 0x2be   :  { %14916 = vst [vmem:[#allocation88_spill] sm:$0xff] %v12935_v35  ;;  %9307 = vmatprep.mubr.msk.f32.mxu0 %vm530_vm1, %v333_v40  ;;  %v336_v40 = vld [vmem:[%s14820_s0 + $0x9f8] sm:$0xff] }
 0x2bf   :  { %4966 = vxpose.xlu0.b32.cont [15/16] (narrow) %v14913_v36, 56  ;;  %4990 = vxpose.xlu1.b32.cont [7/16] (narrow) %v12419_v15, 56  ;;  %v12942_v30 = vpop.f32.mrf.mxu0  ;;  %v335_v15 = vld [vmem:[%s14820_s0 + $0x9f0] sm:$0xff]  ;;  %v12954_v41 = vpop.trf.xlu1 }
 0x2c0   :  { %v14917_v36 = vld [vmem:[#allocation40_spill] sm:$0xff]  ;;  %14920 = vst [vmem:[#allocation90_spill] sm:$0xff] %v12954_v41 }
 0x2c1   :  { %v12951_v4 = vpop.f32.mrf.mxu0  ;;  %9308 = vmatmul.mubr.msk.f32.gmra.mxu0 %vm530_vm1, %v334_v61 }
 0x2c2   :  { %14919 = vst [vmem:[#allocation89_spill] sm:$0xff] %v12951_v4  ;;  %9310 = vmatprep.mubr.msk.f32.mxu0 %vm530_vm1, %v335_v15  ;;  %v338_v15 = vld [vmem:[%s14820_s0 + $0xa08] sm:$0xff] }
 0x2c3   :  { %4967 = vxpose.xlu0.b32.end [16/16] (narrow) %v14917_v36, 56  ;;  %4991 = vxpose.xlu1.b32.cont [8/16] (narrow) %v12410_v54, 56  ;;  %v12949_v17 = vpop.trf.xlu0  ;;  %v12960_v35 = vpop.f32.mrf.mxu0  ;;  %v337_v54 = vld [vmem:[%s14820_s0 + $0xa00] sm:$0xff]  ;;  %v14921_v36 = vld [vmem:[#allocation52_spill] sm:$0xff]  ;;  %v14924_v4 = vld [vmem:[#allocation51_spill] sm:$0xff] }
 0x2c4   :  { %14918 = vst [vmem:[#allocation40_spill] sm:$0xff] %v12949_v17 }
 0x2c5   :  { %v12967_v61 = vpop.f32.mrf.mxu0  ;;  %9311 = vmatmul.mubr.msk.f32.gmra.mxu0 %vm530_vm1, %v336_v40 }
 0x2c6   :  { %14922 = vst [vmem:[#allocation52_spill] sm:$0xff] %v12967_v61  ;;  %9313 = vmatprep.mubr.msk.f32.mxu0 %vm530_vm1, %v337_v54  ;;  %v14927_v61 = vld [vmem:[#allocation55_spill] sm:$0xff] }
 0x2c7   :  { %4992 = vxpose.xlu1.b32.cont [9/16] (narrow) %v14921_v36, 56  ;;  %5016 = vxpose.xlu0.b32.start [1/16] (narrow) %v12496_v47, 56  ;;  %v4905_v17 = vpop.trf.xlu0  ;;  %v12974_v41 = vpop.f32.mrf.mxu0  ;;  %v339_v36 = vld [vmem:[%s14820_s0 + $0xa10] sm:$0xff] }
 0x2c8   :  { %9642 = vmatprep.mubr.f32.mxu1 %v4905_v17  ;;  %14923 = vst [vmem:[#allocation91_spill] sm:$0xff] %v12974_v41  ;;  %v12981_v47 = vpop.trf.xlu1  ;;  %v340_v17 = vld [vmem:[%s14820_s0 + $0xa18] sm:$0xff] }
 0x2c9   :  { %14925 = vst [vmem:[#allocation51_spill] sm:$0xff] %v12981_v47  ;;  %v12983_v40 = vpop.f32.mrf.mxu0  ;;  %9314 = vmatmul.mubr.msk.f32.gmra.mxu0 %vm530_vm1, %v338_v15  ;;  %v14931_v41 = vld [vmem:[#allocation57_spill] sm:$0xff] }
 0x2ca   :  { %9316 = vmatprep.mubr.msk.f32.mxu0 %vm530_vm1, %v339_v36  ;;  %v342_v36 = vld [vmem:[%s14820_s0 + $0xa28] sm:$0xff] }
 0x2cb   :  { %4993 = vxpose.xlu1.b32.cont [10/16] (narrow) %v14924_v4, 56  ;;  %5017 = vxpose.xlu0.b32.cont [2/16] (narrow) %v12489_v21, 56  ;;  %v12990_v54 = vpop.f32.mrf.mxu0  ;;  %v341_v4 = vld [vmem:[%s14820_s0 + $0xa20] sm:$0xff] }
 0x2cc   :  { %v13000_v15 = vpop.trf.xlu1 }
 0x2cd   :  { %v12997_v21 = vpop.f32.mrf.mxu0  ;;  %9317 = vmatmul.mubr.msk.f32.gmra.mxu0 %vm530_vm1, %v340_v17  ;;  %14926 = vst [vmem:[#allocation92_spill] sm:$0xff] %v13000_v15  ;;  %v344_v17 = vld [vmem:[%s14820_s0 + $0xa38] sm:$0xff]  ;;  %v345_v15 = vld [vmem:[%s14820_s0 + $0xa40] sm:$0xff] }
 0x2ce   :  { %9319 = vmatprep.mubr.msk.f32.mxu0 %vm530_vm1, %v341_v4 }
 0x2cf   :  { %4994 = vxpose.xlu1.b32.cont [11/16] (narrow) %v12451_v39, 56  ;;  %5018 = vxpose.xlu0.b32.cont [3/16] (narrow) %v12511_v9, 56  ;;  %v13006_v47 = vpop.f32.mrf.mxu0  ;;  %v343_v39 = vld [vmem:[%s14820_s0 + $0xa30] sm:$0xff] }
 0x2d1   :  { %v13013_v9 = vpop.f32.mrf.mxu0  ;;  %9320 = vmatmul.mubr.msk.f32.gmra.mxu0 %vm530_vm1, %v342_v36  ;;  %v346_v36 = vld [vmem:[%s14820_s0 + $0xa48] sm:$0xff] }
 0x2d2   :  { %9322 = vmatprep.mubr.msk.f32.mxu0 %vm530_vm1, %v343_v39 }
 0x2d3   :  { %4995 = vxpose.xlu1.b32.cont [12/16] (narrow) %v14927_v61, 56  ;;  %5019 = vxpose.xlu0.b32.cont [4/16] (narrow) %v12502_v32, 56  ;;  %v13020_v4 = vpop.f32.mrf.mxu0  ;;  %v13027_v32 = vpop.trf.xlu1 }
 0x2d4   :  { %14928 = vst [vmem:[#allocation55_spill] sm:$0xff] %v13027_v32 }
 0x2d5   :  { %v13029_v61 = vpop.f32.mrf.mxu0  ;;  %9323 = vmatmul.mubr.msk.f32.gmra.mxu0 %vm530_vm1, %v344_v17 }
 0x2d6   :  { %14929 = vst [vmem:[#allocation93_spill] sm:$0xff] %v13029_v61  ;;  %9325 = vmatprep.mubr.msk.f32.mxu0 %vm530_vm1, %v345_v15  ;;  %v348_v15 = vld [vmem:[%s14820_s0 + $0xa58] sm:$0xff] }
 0x2d7   :  { %4996 = vxpose.xlu1.b32.cont [13/16] (narrow) %v12468_v1, 56  ;;  %5020 = vxpose.xlu0.b32.cont [5/16] (narrow) %v12524_v23, 56  ;;  %v13036_v39 = vpop.f32.mrf.mxu0  ;;  %v347_v1 = vld [vmem:[%s14820_s0 + $0xa50] sm:$0xff]  ;;  %v14932_v23 = vld [vmem:[#allocation63_spill] sm:$0xff]  ;;  %v13046_v17 = vpop.trf.xlu1 }
 0x2d8   :  { %14930 = vst [vmem:[#allocation94_spill] sm:$0xff] %v13036_v39  ;;  %14934 = vst [vmem:[#allocation63_spill] sm:$0xff] %v13046_v17  ;;  %v14935_v39 = vld [vmem:[#allocation60_spill] sm:$0xff] }
 0x2d9   :  { %v13043_v32 = vpop.f32.mrf.mxu0  ;;  %9326 = vmatmul.mubr.msk.f32.gmra.mxu0 %vm530_vm1, %v346_v36  ;;  %v350_v36 = vld [vmem:[%s14820_s0 + $0xa68] sm:$0xff]  ;;  %v351_v17 = vld [vmem:[%s14820_s0 + $0xa70] sm:$0xff] }
 0x2da   :  { %14933 = vst [vmem:[#allocation57_spill] sm:$0xff] %v13043_v32  ;;  %9328 = vmatprep.mubr.msk.f32.mxu0 %vm530_vm1, %v347_v1  ;;  %v14938_v32 = vld [vmem:[#allocation59_spill] sm:$0xff] }
 0x2db   :  { %4997 = vxpose.xlu1.b32.cont [14/16] (narrow) %v14931_v41, 56  ;;  %5021 = vxpose.xlu0.b32.cont [6/16] (narrow) %v14932_v23, 56  ;;  %v13052_v61 = vpop.f32.mrf.mxu0  ;;  %v349_v41 = vld [vmem:[%s14820_s0 + $0xa60] sm:$0xff] }
 0x2dd   :  { %v13059_v23 = vpop.f32.mrf.mxu0  ;;  %9329 = vmatmul.mubr.msk.f32.gmra.mxu0 %vm530_vm1, %v348_v15  ;;  %v352_v15 = vld [vmem:[%s14820_s0 + $0xa78] sm:$0xff] }
 0x2de   :  { %14936 = vst [vmem:[#allocation60_spill] sm:$0xff] %v13059_v23  ;;  %9331 = vmatprep.mubr.msk.f32.mxu0 %vm530_vm1, %v349_v41  ;;  %v13082_v41 = vpop.trf.xlu0 }
 0x2df   :  { %4998 = vxpose.xlu1.b32.cont [15/16] (narrow) %v14935_v39, 56  ;;  %5022 = vxpose.xlu0.b32.cont [7/16] (narrow) %v12539_v62, 56  ;;  %v13066_v1 = vpop.f32.mrf.mxu0  ;;  %v14939_v39 = vld [vmem:[#allocation65_spill] sm:$0xff] }
 0x2e0   :  { %14937 = vst [vmem:[#allocation95_spill] sm:$0xff] %v13066_v1  ;;  %14941 = vst [vmem:[#allocation65_spill] sm:$0xff] %v13082_v41 }
 0x2e1   :  { %v13075_v23 = vpop.f32.mrf.mxu0  ;;  %9332 = vmatmul.mubr.msk.f32.gmra.mxu0 %vm530_vm1, %v350_v36 }
 0x2e2   :  { %9334 = vmatprep.mubr.msk.f32.mxu0 %vm530_vm1, %v351_v17  ;;  %v354_v17 = vld [vmem:[%s14820_s0 + $0xa88] sm:$0xff] }
 0x2e3   :  { %4999 = vxpose.xlu1.b32.end [16/16] (narrow) %v14938_v32, 56  ;;  %5023 = vxpose.xlu0.b32.cont [8/16] (narrow) %v14939_v39, 56  ;;  %v13073_v62 = vpop.trf.xlu1  ;;  %v13084_v1 = vpop.f32.mrf.mxu0  ;;  %v353_v32 = vld [vmem:[%s14820_s0 + $0xa80] sm:$0xff] }
 0x2e4   :  { %14940 = vst [vmem:[#allocation59_spill] sm:$0xff] %v13073_v62 }
 0x2e5   :  { %v13091_v36 = vpop.f32.mrf.mxu0  ;;  %9335 = vmatmul.mubr.msk.f32.gmra.mxu0 %vm530_vm1, %v352_v15  ;;  %v356_v15 = vld [vmem:[%s14820_s0 + $0xa98] sm:$0xff] }
 0x2e6   :  { %9337 = vmatprep.mubr.msk.f32.mxu0 %vm530_vm1, %v353_v32 }
 0x2e7   :  { %5024 = vxpose.xlu0.b32.cont [9/16] (narrow) %v12554_v20, 56  ;;  %5048 = vxpose.xlu1.b32.start [1/16] (narrow) %v12610_v44, 56  ;;  %v4937_v39 = vpop.trf.xlu1  ;;  %v13098_v62 = vpop.f32.mrf.mxu0  ;;  %v355_v20 = vld [vmem:[%s14820_s0 + $0xa90] sm:$0xff] }
 0x2e8   :  { %9643 = vmatmul.mubr.f32.gmra.mxu1 %v4937_v39  ;;  %v13105_v44 = vpop.trf.xlu0 }
 0x2e9   :  { %14942 = vst [vmem:[#allocation96_spill] sm:$0xff] %v13105_v44  ;;  %v13107_v39 = vpop.f32.mrf.mxu0  ;;  %9338 = vmatmul.mubr.msk.f32.gmra.mxu0 %vm530_vm1, %v354_v17 }
 0x2ea   :  { %9340 = vmatprep.mubr.msk.f32.mxu0 %vm530_vm1, %v355_v20  ;;  %v358_v20 = vld [vmem:[%s14820_s0 + $0xaa8] sm:$0xff] }
 0x2eb   :  { %5025 = vxpose.xlu0.b32.cont [10/16] (narrow) %v12545_v34, 56  ;;  %5049 = vxpose.xlu1.b32.cont [2/16] (narrow) %v12603_v10, 56  ;;  %v13114_v32 = vpop.f32.mrf.mxu0  ;;  %v357_v34 = vld [vmem:[%s14820_s0 + $0xaa0] sm:$0xff] }
 0x2ec   :  { %v13124_v17 = vpop.trf.xlu0 }
 0x2ed   :  { %v13121_v10 = vpop.f32.mrf.mxu0  ;;  %9341 = vmatmul.mubr.msk.f32.gmra.mxu0 %vm530_vm1, %v356_v15  ;;  %14943 = vst [vmem:[#allocation97_spill] sm:$0xff] %v13124_v17 }
 0x2ee   :  { %9343 = vmatprep.mubr.msk.f32.mxu0 %vm530_vm1, %v357_v34  ;;  %v359_v34 = vld [vmem:[%s14820_s0 + $0xab0] sm:$0xff] }
 0x2ef   :  { %5026 = vxpose.xlu0.b32.cont [11/16] (narrow) %v12567_v43, 56  ;;  %5050 = vxpose.xlu1.b32.cont [3/16] (narrow) %v12624_v48, 56  ;;  %v13130_v44 = vpop.f32.mrf.mxu0 }
 0x2f0   :  { %v13141_v15 = vpop.trf.xlu0 }
 0x2f1   :  { %v13134_v43 = vpop.f32.mrf.mxu0  ;;  %9344 = vmatmul.mubr.msk.f32.gmra.mxu0 %vm530_vm1, %v358_v20  ;;  %14944 = vst [vmem:[#allocation98_spill] sm:$0xff] %v13141_v15 }
 0x2f2   :  { %9346 = vmatprep.mubr.msk.f32.mxu0 %vm530_vm1, %v359_v34  ;;  %v361_v34 = vld [vmem:[%s14820_s0 + $0xac0] sm:$0xff] }
 0x2f3   :  { %5027 = vxpose.xlu0.b32.cont [12/16] (narrow) %v12560_v12, 56  ;;  %5051 = vxpose.xlu1.b32.cont [4/16] (narrow) %v12617_v52, 56  ;;  %v13137_v48 = vpop.f32.mrf.mxu0  ;;  %v360_v12 = vld [vmem:[%s14820_s0 + $0xab8] sm:$0xff] }
 0x2f5   :  { %v13149_v52 = vpop.f32.mrf.mxu0  ;;  %9347 = vmatmul.mubr.msk.f32.gmra.mxu0 %vm530_vm1, %v360_v12 }
 0x2f6   :  { %9349 = vmatprep.mubr.msk.f32.mxu0 %vm530_vm1, %v361_v34 }
 0x2f7   :  { %5028 = vxpose.xlu0.b32.cont [13/16] (narrow) %v12582_v60, 56  ;;  %5052 = vxpose.xlu1.b32.cont [5/16] (narrow) %v12638_v49, 56  ;;  %v13153_v20 = vpop.f32.mrf.mxu0  ;;  %v13159_v49 = vpop.trf.xlu0 }
 0x2f8   :  { %14945 = vst [vmem:[#allocation99_spill] sm:$0xff] %v13159_v49  ;;  %v13183_v49 = vpop.trf.xlu1 }
 0x2f9   :  { %v13157_v60 = vpop.f32.mrf.mxu0  ;;  %14947 = vst [vmem:[#allocation101_spill] sm:$0xff] %v13183_v49 }
 0x2fb   :  { %5029 = vxpose.xlu0.b32.cont [14/16] (narrow) %v12575_v29, 56  ;;  %5053 = vxpose.xlu1.b32.cont [6/16] (narrow) %v12631_v42, 56  ;;  %v13161_v15 = vpop.f32.mrf.mxu0  ;;  %v362_v29 = vld [vmem:[%s14820_s0 + $0xac8] sm:$0xff] }
 0x2fc   :  { %9350 = vmatmul.mubr.msk.f32.gmra.mxu0 %vm530_vm1, %v362_v29  ;;  %v363_v29 = vld [vmem:[%s14820_s0 + $0xad0] sm:$0xff] }
 0x2fd   :  { %v13171_v12 = vpop.f32.mrf.mxu0  ;;  %9352 = vmatprep.mubr.msk.f32.mxu0 %vm530_vm1, %v363_v29 }
 0x2ff   :  { %5030 = vxpose.xlu0.b32.cont [15/16] (narrow) %v12596_v37, 56  ;;  %5054 = vxpose.xlu1.b32.cont [7/16] (narrow) %v12652_v16, 56  ;;  %v13175_v42 = vpop.f32.mrf.mxu0 }
 0x301   :  { %v13181_v16 = vpop.f32.mrf.mxu0 }
 0x303   :  { %5031 = vxpose.xlu0.b32.end [16/16] (narrow) %v12589_v11, 56  ;;  %5055 = vxpose.xlu1.b32.cont [8/16] (narrow) %v12645_v46, 56  ;;  %v13179_v37 = vpop.trf.xlu0  ;;  %v13185_v17 = vpop.f32.mrf.mxu0  ;;  %v364_v11 = vld [vmem:[%s14820_s0 + $0xad8] sm:$0xff] }
 0x304   :  { %14946 = vst [vmem:[#allocation100_spill] sm:$0xff] %v13179_v37  ;;  %9353 = vmatmul.mubr.msk.f32.gmra.mxu0 %vm530_vm1, %v364_v11 }
 0x305   :  { %v13195_v46 = vpop.f32.mrf.mxu0 }
 0x307   :  { %5056 = vxpose.xlu1.b32.cont [9/16] (narrow) %v12666_v19, 56  ;;  %5080 = vxpose.xlu0.b32.start [1/16] (narrow) %v12722_v27, 56  ;;  %v4969_v34 = vpop.trf.xlu0  ;;  %v13199_v37 = vpop.f32.mrf.mxu0 }
 0x308   :  { %9645 = vmatprep.mubr.f32.mxu1 %v4969_v34  ;;  %v13203_v19 = vpop.trf.xlu1  ;;  %v365_v34 = vld [vmem:[%s14820_s0 + $0xae0] sm:$0xff] }
 0x309   :  { %14948 = vst [vmem:[#allocation102_spill] sm:$0xff] %v13203_v19  ;;  %v13205_v27 = vpop.f32.mrf.mxu0  ;;  %9355 = vmatprep.mubr.msk.f32.mxu0 %vm530_vm1, %v365_v34  ;;  %v367_v34 = vld [vmem:[%s14820_s0 + $0xaf0] sm:$0xff] }
 0x30b   :  { %5057 = vxpose.xlu1.b32.cont [10/16] (narrow) %v12659_v51, 56  ;;  %5081 = vxpose.xlu0.b32.cont [2/16] (narrow) %v12715_v28, 56  ;;  %v13207_v49 = vpop.f32.mrf.mxu0  ;;  %v366_v51 = vld [vmem:[%s14820_s0 + $0xae8] sm:$0xff]  ;;  %v13267_v41 = vpop.trf.xlu0 }
 0x30c   :  { %v13220_v28 = vpop.trf.xlu1  ;;  %9356 = vmatmul.mubr.msk.f32.gmra.mxu0 %vm530_vm1, %v366_v51 }
 0x30d   :  { %v13217_v29 = vpop.f32.mrf.mxu0  ;;  %14949 = vst [vmem:[#allocation103_spill] sm:$0xff] %v13220_v28  ;;  %9358 = vmatprep.mubr.msk.f32.mxu0 %vm530_vm1, %v367_v34 }
 0x30f   :  { %5058 = vxpose.xlu1.b32.cont [11/16] (narrow) %v12680_v0, 56  ;;  %5082 = vxpose.xlu0.b32.cont [3/16] (narrow) %v12736_v53, 56  ;;  %v13223_v11 = vpop.f32.mrf.mxu0 }
 0x310   :  { %v13233_v19 = vpop.trf.xlu1 }
 0x311   :  { %v13227_v0 = vpop.f32.mrf.mxu0  ;;  %14950 = vst [vmem:[#allocation104_spill] sm:$0xff] %v13233_v19 }
 0x313   :  { %5059 = vxpose.xlu1.b32.cont [12/16] (narrow) %v12673_v38, 56  ;;  %5083 = vxpose.xlu0.b32.cont [4/16] (narrow) %v12729_v57, 56  ;;  %v13229_v53 = vpop.f32.mrf.mxu0  ;;  %v368_v38 = vld [vmem:[%s14820_s0 + $0xaf8] sm:$0xff] }
 0x314   :  { %9359 = vmatmul.mubr.msk.f32.gmra.mxu0 %vm530_vm1, %v368_v38  ;;  %v14953_v38 = vld [vmem:[#allocation70_spill] sm:$0xff] }
 0x315   :  { %v13241_v51 = vpop.f32.mrf.mxu0 }
 0x317   :  { %5060 = vxpose.xlu1.b32.cont [13/16] (narrow) %v12694_v18, 56  ;;  %5084 = vxpose.xlu0.b32.cont [5/16] (narrow) %v12752_v31, 56  ;;  %v13245_v57 = vpop.f32.mrf.mxu0  ;;  %v13251_v31 = vpop.trf.xlu1 }
 0x318   :  { %14951 = vst [vmem:[#allocation105_spill] sm:$0xff] %v13251_v31 }
 0x319   :  { %v13249_v18 = vpop.f32.mrf.mxu0 }
 0x31b   :  { %5061 = vxpose.xlu1.b32.cont [14/16] (narrow) %v12687_v55, 56  ;;  %5085 = vxpose.xlu0.b32.cont [6/16] (narrow) %v12745_v24, 56  ;;  %v13253_v19 = vpop.f32.mrf.mxu0 }
 0x31d   :  { %v13257_v28 = vpop.f32.mrf.mxu0 }
 0x31e   :  { %14952 = vst [vmem:[#allocation106_spill] sm:$0xff] %v13257_v28 }
 0x31f   :  { %5062 = vxpose.xlu1.b32.cont [15/16] (narrow) %v12708_v26, 56  ;;  %5086 = vxpose.xlu0.b32.cont [7/16] (narrow) %v12768_v63, 56  ;;  %v13259_v34 = vpop.f32.mrf.mxu0 }
 0x321   :  { %v13265_v24 = vpop.f32.mrf.mxu0 }
 0x323   :  { %5063 = vxpose.xlu1.b32.end [16/16] (narrow) %v12701_v59, 56  ;;  %5087 = vxpose.xlu0.b32.cont [8/16] (narrow) %v14953_v38, 56  ;;  %v13263_v55 = vpop.trf.xlu1  ;;  %v13269_v31 = vpop.f32.mrf.mxu0 }
 0x324   :  { %14954 = vst [vmem:[#allocation70_spill] sm:$0xff] %v13263_v55  ;;  %v13279_v59 = vpop.trf.xlu0 }
 0x325   :  { %v13273_v63 = vpop.f32.mrf.mxu0  ;;  %14955 = vst [vmem:[#allocation107_spill] sm:$0xff] %v13279_v59 }
 0x327   :  { %5088 = vxpose.xlu0.b32.cont [9/16] (narrow) %v12786_v7, 56  ;;  %5112 = vxpose.xlu1.b32.start [1/16] (narrow) %v12856_v8, 56  ;;  %v5001_v26 = vpop.trf.xlu1  ;;  %v13275_v28 = vpop.f32.mrf.mxu0 }
 0x328   :  { %9646 = vmatmul.mubr.f32.gmra.mxu1 %v5001_v26  ;;  %v13289_v8 = vpop.trf.xlu0 }
 0x329   :  { %v13281_v38 = vpop.f32.mrf.mxu0  ;;  %14956 = vst [vmem:[#allocation108_spill] sm:$0xff] %v13289_v8 }
 0x32b   :  { %5089 = vxpose.xlu0.b32.cont [10/16] (narrow) %v12779_v22, 56  ;;  %5113 = vxpose.xlu1.b32.cont [2/16] (narrow) %v12847_v50, 56  ;;  %v13283_v55 = vpop.f32.mrf.mxu0  ;;  %v13319_v59 = vpop.trf.xlu1 }
 0x32d   :  { %v13287_v7 = vpop.f32.mrf.mxu0 }
 0x32f   :  { %5090 = vxpose.xlu0.b32.cont [11/16] (narrow) %v12804_v3, 56  ;;  %5114 = vxpose.xlu1.b32.cont [3/16] (narrow) %v12872_v45, 56  ;;  %v13291_v26 = vpop.f32.mrf.mxu0  ;;  %v13301_v3 = vpop.trf.xlu0 }
 0x330   :  { %14957 = vst [vmem:[#allocation109_spill] sm:$0xff] %v13301_v3 }
 0x331   :  { %v13295_v22 = vpop.f32.mrf.mxu0 }
 0x333   :  { %5091 = vxpose.xlu0.b32.cont [12/16] (narrow) %v12795_v5, 56  ;;  %5115 = vxpose.xlu1.b32.cont [4/16] (narrow) %v12865_v13, 56  ;;  %v13297_v50 = vpop.f32.mrf.mxu0  ;;  %v13307_v8 = vpop.trf.xlu0 }
 0x334   :  { %14958 = vst [vmem:[#allocation110_spill] sm:$0xff] %v13307_v8 }
 0x335   :  { %v13303_v45 = vpop.f32.mrf.mxu0 }
 0x337   :  { %5092 = vxpose.xlu0.b32.cont [13/16] (narrow) %v12820_v56, 56  ;;  %5116 = vxpose.xlu1.b32.cont [5/16] (narrow) %v12890_v14, 56  ;;  %v13309_v5 = vpop.f32.mrf.mxu0  ;;  %v14959_v56 = vld [vmem:[#allocation78_spill] sm:$0xff]  ;;  %v14960_v14 = vld [vmem:[#allocation85_spill] sm:$0xff] }
 0x339   :  { %v13313_v13 = vpop.f32.mrf.mxu0 }
 0x33b   :  { %5093 = vxpose.xlu0.b32.cont [14/16] (narrow) %v12813_v2, 56  ;;  %5117 = vxpose.xlu1.b32.cont [6/16] (narrow) %v12883_v25, 56  ;;  %v13321_v2 = vpop.f32.mrf.mxu0 }
 0x33f   :  { %5094 = vxpose.xlu0.b32.cont [15/16] (narrow) %v12838_v6, 56  ;;  %5118 = vxpose.xlu1.b32.cont [7/16] (narrow) %v12908_v33, 56  ;;  %v13325_v6 = vpop.f32.mrf.mxu0  ;;  %v14962_v33 = vld [vmem:[#allocation47_spill] sm:$0xff] }
 0x343   :  { %5095 = vxpose.xlu0.b32.end [16/16] (narrow) %v14959_v56, 56  ;;  %5119 = vxpose.xlu1.b32.cont [8/16] (narrow) %v14960_v14, 56  ;;  %v13317_v3 = vpop.trf.xlu0  ;;  %v13329_v56 = vpop.trf.xlu1 }
 0x344   :  { %14961 = vst [vmem:[#allocation78_spill] sm:$0xff] %v13317_v3  ;;  %14963 = vst [vmem:[#allocation85_spill] sm:$0xff] %v13329_v56  ;;  %v13331_v14 = vpop.f32.mrf.mxu0 }
 0x347   :  { %5120 = vxpose.xlu1.b32.cont [9/16] (narrow) %v12924_v58, 56  ;;  %5144 = vxpose.xlu0.b32.start [1/16] (narrow) %v12990_v54, 56  ;;  %v5033_v25 = vpop.trf.xlu0  ;;  %v13335_v3 = vpop.trf.xlu1  ;;  %v14965_v54 = vld [vmem:[#allocation88_spill] sm:$0xff] }
 0x348   :  { %9648 = vmatprep.mubr.f32.mxu1 %v5033_v25  ;;  %14964 = vst [vmem:[#allocation47_spill] sm:$0xff] %v13335_v3  ;;  %v13337_v58 = vpop.f32.mrf.mxu0 }
 0x34a   :  { %v13341_v25 = vpop.f32.mrf.mxu0 }
 0x34b   :  { %5121 = vxpose.xlu1.b32.cont [10/16] (narrow) %v14962_v33, 56  ;;  %5145 = vxpose.xlu0.b32.cont [2/16] (narrow) %v12983_v40, 56  ;;  %v13345_v40 = vpop.trf.xlu1  ;;  %v13363_v56 = vpop.trf.xlu0 }
 0x34c   :  { %14966 = vst [vmem:[#allocation88_spill] sm:$0xff] %v13345_v40  ;;  %v13347_v33 = vpop.f32.mrf.mxu0 }
 0x34e   :  { %v13353_v8 = vpop.f32.mrf.mxu0 }
 0x34f   :  { %5122 = vxpose.xlu1.b32.cont [11/16] (narrow) %v12942_v30, 56  ;;  %5146 = vxpose.xlu0.b32.cont [3/16] (narrow) %v13006_v47, 56  ;;  %v14967_v30 = vld [vmem:[#allocation89_spill] sm:$0xff]  ;;  %v13351_v47 = vpop.trf.xlu1 }
 0x350   :  { %14968 = vst [vmem:[#allocation89_spill] sm:$0xff] %v13351_v47  ;;  %v13357_v3 = vpop.f32.mrf.mxu0  ;;  %v14975_v47 = vld [vmem:[#allocation95_spill] sm:$0xff] }
 0x353   :  { %5123 = vxpose.xlu1.b32.cont [12/16] (narrow) %v14965_v54, 56  ;;  %5147 = vxpose.xlu0.b32.cont [4/16] (narrow) %v12997_v21, 56  ;;  %v14969_v54 = vld [vmem:[#allocation91_spill] sm:$0xff]  ;;  %v14970_v21 = vld [vmem:[#allocation94_spill] sm:$0xff] }
 0x357   :  { %5124 = vxpose.xlu1.b32.cont [13/16] (narrow) %v12960_v35, 56  ;;  %5148 = vxpose.xlu0.b32.cont [5/16] (narrow) %v13020_v4, 56  ;;  %v14971_v35 = vld [vmem:[#allocation52_spill] sm:$0xff]  ;;  %v14972_v4 = vld [vmem:[#allocation93_spill] sm:$0xff] }
 0x35b   :  { %5125 = vxpose.xlu1.b32.cont [14/16] (narrow) %v14967_v30, 56  ;;  %5149 = vxpose.xlu0.b32.cont [6/16] (narrow) %v13013_v9, 56  ;;  %v13365_v30 = vpop.f32.mrf.mxu0 }
 0x35f   :  { %5126 = vxpose.xlu1.b32.cont [15/16] (narrow) %v14969_v54, 56  ;;  %5150 = vxpose.xlu0.b32.cont [7/16] (narrow) %v14970_v21, 56  ;;  %v13369_v54 = vpop.f32.mrf.mxu0  ;;  %v14974_v21 = vld [vmem:[#allocation57_spill] sm:$0xff] }
 0x363   :  { %5127 = vxpose.xlu1.b32.end [16/16] (narrow) %v14971_v35, 56  ;;  %5151 = vxpose.xlu0.b32.cont [8/16] (narrow) %v14972_v4, 56  ;;  %v13361_v40 = vpop.trf.xlu1  ;;  %v13373_v35 = vpop.trf.xlu0 }
 0x364   :  { %14973 = vst [vmem:[#allocation91_spill] sm:$0xff] %v13361_v40  ;;  %v13375_v4 = vpop.f32.mrf.mxu0 }
 0x367   :  { %5152 = vxpose.xlu0.b32.cont [9/16] (narrow) %v13052_v61, 56  ;;  %5176 = vxpose.xlu1.b32.start [1/16] (narrow) %v13114_v32, 56  ;;  %v5065_v9 = vpop.trf.xlu1  ;;  %v13379_v40 = vpop.trf.xlu0  ;;  %v14976_v32 = vld [vmem:[#allocation60_spill] sm:$0xff] }
 0x368   :  { %9649 = vmatmul.mubr.f32.gmra.mxu1 %v5065_v9  ;;  %v13381_v61 = vpop.f32.mrf.mxu0 }
 0x36a   :  { %v13385_v9 = vpop.f32.mrf.mxu0 }
 0x36b   :  { %5153 = vxpose.xlu0.b32.cont [10/16] (narrow) %v14974_v21, 56  ;;  %5177 = vxpose.xlu1.b32.cont [2/16] (narrow) %v13107_v39, 56  ;;  %v13389_v39 = vpop.trf.xlu0 }
 0x36c   :  { %v13391_v21 = vpop.f32.mrf.mxu0 }
 0x36f   :  { %5154 = vxpose.xlu0.b32.cont [11/16] (narrow) %v14975_v47, 56  ;;  %5178 = vxpose.xlu1.b32.cont [3/16] (narrow) %v13130_v44, 56  ;;  %v13395_v44 = vpop.trf.xlu0  ;;  %v13397_v47 = vpop.f32.mrf.mxu0 }
 0x370   :  { %14977 = vst [vmem:[#allocation94_spill] sm:$0xff] %v13395_v44 }
 0x373   :  { %5155 = vxpose.xlu0.b32.cont [12/16] (narrow) %v14976_v32, 56  ;;  %5179 = vxpose.xlu1.b32.cont [4/16] (narrow) %v13121_v10, 56  ;;  %v13401_v10 = vpop.f32.mrf.mxu0 }
 0x377   :  { %5156 = vxpose.xlu0.b32.cont [13/16] (narrow) %v13084_v1, 56  ;;  %5180 = vxpose.xlu1.b32.cont [5/16] (narrow) %v13137_v48, 56  ;;  %v13407_v48 = vpop.trf.xlu1 }
 0x37b   :  { %5157 = vxpose.xlu0.b32.cont [14/16] (narrow) %v13075_v23, 56  ;;  %5181 = vxpose.xlu1.b32.cont [6/16] (narrow) %v13134_v43, 56  ;;  %v13409_v23 = vpop.f32.mrf.mxu0 }
 0x37f   :  { %5158 = vxpose.xlu0.b32.cont [15/16] (narrow) %v13098_v62, 56  ;;  %5182 = vxpose.xlu1.b32.cont [7/16] (narrow) %v13153_v20, 56  ;;  %v13413_v62 = vpop.f32.mrf.mxu0 }
 0x383   :  { %5159 = vxpose.xlu0.b32.end [16/16] (narrow) %v13091_v36, 56  ;;  %5183 = vxpose.xlu1.b32.cont [8/16] (narrow) %v13149_v52, 56  ;;  %v13405_v1 = vpop.trf.xlu0  ;;  %v13417_v36 = vpop.trf.xlu1 }
 0x384   :  { %14978 = vst [vmem:[#allocation52_spill] sm:$0xff] %v13405_v1  ;;  %v13419_v52 = vpop.f32.mrf.mxu0 }
 0x387   :  { %5184 = vxpose.xlu1.b32.cont [9/16] (narrow) %v13161_v15, 56  ;;  %5208 = vxpose.xlu0.b32.start [1/16] (narrow) %v13207_v49, 56  ;;  %v5097_v43 = vpop.trf.xlu0  ;;  %v13423_v20 = vpop.trf.xlu1 }
 0x388   :  { %9651 = vmatprep.mubr.f32.mxu1 %v5097_v43  ;;  %v13425_v15 = vpop.f32.mrf.mxu0 }
 0x38a   :  { %v13429_v49 = vpop.f32.mrf.mxu0 }
 0x38b   :  { %5185 = vxpose.xlu1.b32.cont [10/16] (narrow) %v13157_v60, 56  ;;  %5209 = vxpose.xlu0.b32.cont [2/16] (narrow) %v13205_v27, 56  ;;  %v13433_v60 = vpop.trf.xlu1 }
 0x38c   :  { %v13435_v27 = vpop.f32.mrf.mxu0 }
 0x38f   :  { %5186 = vxpose.xlu1.b32.cont [11/16] (narrow) %v13175_v42, 56  ;;  %5210 = vxpose.xlu0.b32.cont [3/16] (narrow) %v13223_v11, 56  ;;  %v13439_v42 = vpop.trf.xlu1  ;;  %v13441_v11 = vpop.f32.mrf.mxu0 }
 0x390   :  { %14979 = vst [vmem:[#allocation93_spill] sm:$0xff] %v13439_v42 }
 0x393   :  { %5187 = vxpose.xlu1.b32.cont [12/16] (narrow) %v13171_v12, 56  ;;  %5211 = vxpose.xlu0.b32.cont [4/16] (narrow) %v13217_v29, 56  ;;  %v13445_v12 = vpop.f32.mrf.mxu0  ;;  %v13451_v29 = vpop.trf.xlu0 }
 0x397   :  { %5188 = vxpose.xlu1.b32.cont [13/16] (narrow) %v13185_v17, 56  ;;  %5212 = vxpose.xlu0.b32.cont [5/16] (narrow) %v13229_v53, 56 }
 0x39b   :  { %5189 = vxpose.xlu1.b32.cont [14/16] (narrow) %v13181_v16, 56  ;;  %5213 = vxpose.xlu0.b32.cont [6/16] (narrow) %v13227_v0, 56  ;;  %v13453_v16 = vpop.f32.mrf.mxu0 }
 0x39f   :  { %5190 = vxpose.xlu1.b32.cont [15/16] (narrow) %v13199_v37, 56  ;;  %5214 = vxpose.xlu0.b32.cont [7/16] (narrow) %v13245_v57, 56  ;;  %v13457_v37 = vpop.f32.mrf.mxu0  ;;  %v14981_v57 = vld [vmem:[#allocation106_spill] sm:$0xff] }
 0x3a1   :  { %v13463_v53 = vpop.f32.mrf.mxu0 }
 0x3a3   :  { %5191 = vxpose.xlu1.b32.end [16/16] (narrow) %v13195_v46, 56  ;;  %5215 = vxpose.xlu0.b32.cont [8/16] (narrow) %v13241_v51, 56  ;;  %v13449_v17 = vpop.trf.xlu1  ;;  %v13461_v46 = vpop.trf.xlu0 }
 0x3a4   :  { %14980 = vst [vmem:[#allocation57_spill] sm:$0xff] %v13449_v17 }
 0x3a7   :  { %5216 = vxpose.xlu0.b32.cont [9/16] (narrow) %v13253_v19, 56  ;;  %5240 = vxpose.xlu1.b32.start [1/16] (narrow) %v13283_v55, 56  ;;  %v5129_v0 = vpop.trf.xlu1  ;;  %v13467_v51 = vpop.trf.xlu0 }
 0x3a8   :  { %9652 = vmatmul.mubr.f32.gmra.mxu1 %v5129_v0  ;;  %v13469_v19 = vpop.f32.mrf.mxu0 }
 0x3aa   :  { %v13473_v55 = vpop.f32.mrf.mxu0 }
 0x3ab   :  { %5217 = vxpose.xlu0.b32.cont [10/16] (narrow) %v13249_v18, 56  ;;  %5241 = vxpose.xlu1.b32.cont [2/16] (narrow) %v13281_v38, 56  ;;  %v13477_v18 = vpop.trf.xlu0 }
 0x3ac   :  { %v13479_v38 = vpop.f32.mrf.mxu0 }
 0x3af   :  { %5218 = vxpose.xlu0.b32.cont [11/16] (narrow) %v13259_v34, 56  ;;  %5242 = vxpose.xlu1.b32.cont [3/16] (narrow) %v13291_v26, 56  ;;  %v13483_v34 = vpop.trf.xlu0  ;;  %v13485_v26 = vpop.f32.mrf.mxu0 }
 0x3b0   :  { %14982 = vst [vmem:[#allocation95_spill] sm:$0xff] %v13483_v34 }
 0x3b3   :  { %5219 = vxpose.xlu0.b32.cont [12/16] (narrow) %v14981_v57, 56  ;;  %5243 = vxpose.xlu1.b32.cont [4/16] (narrow) %v13287_v7, 56  ;;  %v13489_v7 = vpop.f32.mrf.mxu0 }
 0x3b7   :  { %5220 = vxpose.xlu0.b32.cont [13/16] (narrow) %v13269_v31, 56  ;;  %5244 = vxpose.xlu1.b32.cont [5/16] (narrow) %v13297_v50, 56  ;;  %v13495_v50 = vpop.trf.xlu1 }
 0x3bb   :  { %5221 = vxpose.xlu0.b32.cont [14/16] (narrow) %v13265_v24, 56  ;;  %5245 = vxpose.xlu1.b32.cont [6/16] (narrow) %v13295_v22, 56  ;;  %v13497_v24 = vpop.f32.mrf.mxu0 }
 0x3bf   :  { %5222 = vxpose.xlu0.b32.cont [15/16] (narrow) %v13275_v28, 56  ;;  %5246 = vxpose.xlu1.b32.cont [7/16] (narrow) %v13309_v5, 56  ;;  %v13501_v28 = vpop.f32.mrf.mxu0 }
 0x3c3   :  { %5223 = vxpose.xlu0.b32.end [16/16] (narrow) %v13273_v63, 56  ;;  %5247 = vxpose.xlu1.b32.cont [8/16] (narrow) %v13303_v45, 56  ;;  %v13493_v31 = vpop.trf.xlu0  ;;  %v13505_v63 = vpop.trf.xlu1 }
 0x3c4   :  { %14983 = vst [vmem:[#allocation60_spill] sm:$0xff] %v13493_v31  ;;  %v13507_v45 = vpop.f32.mrf.mxu0 }
 0x3c7   :  { %5248 = vxpose.xlu1.b32.cont [9/16] (narrow) %v13321_v2, 56  ;;  %5272 = vxpose.xlu0.b32.start [1/16] (narrow) %v13365_v30, 56  ;;  %v5161_v22 = vpop.trf.xlu0  ;;  %v13511_v5 = vpop.trf.xlu1 }
 0x3c8   :  { %9654 = vmatprep.mubr.f32.mxu1 %v5161_v22  ;;  %v13513_v2 = vpop.f32.mrf.mxu0 }
 0x3ca   :  { %v13517_v30 = vpop.f32.mrf.mxu0 }
 0x3cb   :  { %5249 = vxpose.xlu1.b32.cont [10/16] (narrow) %v13313_v13, 56  ;;  %5273 = vxpose.xlu0.b32.cont [2/16] (narrow) %v13357_v3, 56  ;;  %v13521_v3 = vpop.trf.xlu1 }
 0x3cc   :  { %14984 = vst [vmem:[#allocation106_spill] sm:$0xff] %v13521_v3  ;;  %v13523_v13 = vpop.f32.mrf.mxu0 }
 0x3cf   :  { %5250 = vxpose.xlu1.b32.cont [11/16] (narrow) %v13331_v14, 56  ;;  %5274 = vxpose.xlu0.b32.cont [3/16] (narrow) %v13375_v4, 56  ;;  %v13527_v14 = vpop.trf.xlu1  ;;  %v13529_v4 = vpop.f32.mrf.mxu0 }
 0x3d0   :  { %14985 = vst [vmem:[#allocation111_spill] sm:$0xff] %v13527_v14 }
 0x3d3   :  { %5251 = vxpose.xlu1.b32.cont [12/16] (narrow) %v13325_v6, 56  ;;  %5275 = vxpose.xlu0.b32.cont [4/16] (narrow) %v13369_v54, 56  ;;  %v13533_v6 = vpop.f32.mrf.mxu1 }
 0x3d7   :  { %5252 = vxpose.xlu1.b32.cont [13/16] (narrow) %v13341_v25, 56  ;;  %5276 = vxpose.xlu0.b32.cont [5/16] (narrow) %v13385_v9, 56  ;;  %v9315_v25 = vpop.f32.mrf.mxu0 }
 0x3d9   :  { %v3737_v32 = vpop.f32.mrf.mxu0 }
 0x3db   :  { %5253 = vxpose.xlu1.b32.cont [14/16] (narrow) %v13337_v58, 56  ;;  %5277 = vxpose.xlu0.b32.cont [6/16] (narrow) %v13381_v61, 56  ;;  %v13539_v58 = vpop.trf.xlu0  ;;  %v13541_v61 = vpop.f32.mrf.mxu1 }
 0x3df   :  { %5254 = vxpose.xlu1.b32.cont [15/16] (narrow) %v13353_v8, 56  ;;  %5278 = vxpose.xlu0.b32.cont [7/16] (narrow) %v13397_v47, 56  ;;  %v13545_v8 = vpop.f32.mrf.mxu1  ;;  %v9318_v47 = vpop.f32.mrf.mxu0 }
 0x3e1   :  { %v3747_v43 = vpop.f32.mrf.mxu0 }
 0x3e3   :  { %v13535_v54 = vpop.trf.xlu1  ;;  %5255 = vxpose.xlu1.b32.end [16/16] (narrow) %v13347_v33, 56  ;;  %5279 = vxpose.xlu0.b32.cont [8/16] (narrow) %v13391_v21, 56  ;;  %v13549_v33 = vpop.trf.xlu0 }
 0x3e4   :  { %14986 = vst [vmem:[#allocation112_spill] sm:$0xff] %v13535_v54  ;;  %v13551_v21 = vpop.f32.mrf.mxu1  ;;  %v9321_v0 = vpop.f32.mrf.mxu0 }
 0x3e7   :  { %v5193_v9 = vpop.trf.xlu1  ;;  %5280 = vxpose.xlu0.b32.cont [9/16] (narrow) %v13409_v23, 56  ;;  %5304 = vxpose.xlu1.b32.start [1/16] (narrow) %v13453_v16, 56  ;;  %v13555_v23 = vpop.trf.xlu0 }
 0x3e8   :  { %9655 = vmatmul.mubr.f32.gmra.mxu1 %v5193_v9  ;;  %v13557_v16 = vpop.f32.mrf.mxu1 }
 0x3eb   :  { %5281 = vxpose.xlu0.b32.cont [10/16] (narrow) %v13401_v10, 56  ;;  %5305 = vxpose.xlu1.b32.cont [2/16] (narrow) %v13445_v12, 56  ;;  %v13561_v10 = vpop.f32.mrf.mxu1  ;;  %v3757_v12 = vpop.f32.mrf.mxu0 }
 0x3ec   :  { %v13565_v57 = vpop.trf.xlu0 }
 0x3ed   :  { %14987 = vst [vmem:[#allocation113_spill] sm:$0xff] %v13565_v57 }
 0x3ef   :  { %5282 = vxpose.xlu0.b32.cont [11/16] (narrow) %v13419_v52, 56  ;;  %5306 = vxpose.xlu1.b32.cont [3/16] (narrow) %v13463_v53, 56  ;;  %v13567_v52 = vpop.f32.mrf.mxu1  ;;  %v9324_v53 = vpop.f32.mrf.mxu0 }
 0x3f0   :  { %v13571_v22 = vpop.trf.xlu0 }
 0x3f1   :  { %14988 = vst [vmem:[#allocation114_spill] sm:$0xff] %v13571_v22 }
 0x3f3   :  { %5283 = vxpose.xlu0.b32.cont [12/16] (narrow) %v13413_v62, 56  ;;  %5307 = vxpose.xlu1.b32.cont [4/16] (narrow) %v13457_v37, 56  ;;  %v13573_v62 = vpop.f32.mrf.mxu1  ;;  %v3767_v37 = vpop.f32.mrf.mxu0 }
 0x3f7   :  { %5284 = vxpose.xlu0.b32.cont [13/16] (narrow) %v13429_v49, 56  ;;  %5308 = vxpose.xlu1.b32.cont [5/16] (narrow) %v13473_v55, 56  ;;  %v13577_v49 = vpop.f32.mrf.mxu1  ;;  %v9327_v55 = vpop.f32.mrf.mxu0 }
 0x3f9   :  { %v3777_v31 = vpop.f32.mrf.mxu0 }
 0x3fb   :  { %5285 = vxpose.xlu0.b32.cont [14/16] (narrow) %v13425_v15, 56  ;;  %5309 = vxpose.xlu1.b32.cont [6/16] (narrow) %v13469_v19, 56  ;;  %v13583_v15 = vpop.trf.xlu1  ;;  %v13585_v19 = vpop.f32.mrf.mxu1 }
 0x3fc   :  { %v9330_v22 = vpop.f32.mrf.mxu0 }
 0x3ff   :  { %5286 = vxpose.xlu0.b32.cont [15/16] (narrow) %v13441_v11, 56  ;;  %5310 = vxpose.xlu1.b32.cont [7/16] (narrow) %v13485_v26, 56  ;;  %v13588_v26 = vpop.f32.mrf.mxu1 }
 0x403   :  { %5287 = vxpose.xlu0.b32.end [16/16] (narrow) %v13435_v27, 56  ;;  %5311 = vxpose.xlu1.b32.cont [8/16] (narrow) %v13479_v38, 56  ;;  %v13581_v9 = vpop.trf.xlu0  ;;  %v13591_v27 = vpop.trf.xlu1 }
 0x404   :  { %14989 = vst [vmem:[#allocation115_spill] sm:$0xff] %v13581_v9  ;;  %v13593_v38 = vpop.f32.mrf.mxu1  ;;  %v3787_v9 = vpop.f32.mrf.mxu0 }
 0x407   :  { %5312 = vxpose.xlu1.b32.cont [9/16] (narrow) %v13497_v24, 56  ;;  %5336 = vxpose.xlu0.b32.start [1/16] (narrow) %v3737_v32, 56  ;;  %v5225_v11 = vpop.trf.xlu0  ;;  %v13596_v14 = vpop.trf.xlu1 }
 0x408   :  { %9657 = vmatprep.mubr.f32.mxu1 %v5225_v11  ;;  %v13598_v24 = vpop.f32.mrf.mxu1  ;;  %v9333_v32 = vpop.f32.mrf.mxu0 }
 0x40a   :  { %v13601_v11 = vpop.f32.mrf.mxu1 }
 0x40b   :  { %5313 = vxpose.xlu1.b32.cont [10/16] (narrow) %v13489_v7, 56  ;;  %5337 = vxpose.xlu0.b32.cont [2/16] (narrow) %v9315_v25, 56  ;;  %v3797_v7 = vpop.f32.mrf.mxu0  ;;  %v13604_v25 = vpop.trf.xlu1 }
 0x40c   :  { %14990 = vst [vmem:[#allocation116_spill] sm:$0xff] %v13604_v25  ;;  %v13606_v1 = vpop.f32.mrf.mxu1  ;;  %v13619_v42 = vpop.trf.xlu0 }
 0x40e   :  { %v13611_v34 = vpop.f32.mrf.mxu1 }
 0x40f   :  { %5314 = vxpose.xlu1.b32.cont [11/16] (narrow) %v13507_v45, 56  ;;  %5338 = vxpose.xlu0.b32.cont [3/16] (narrow) %v3747_v43, 56  ;;  %v9336_v45 = vpop.f32.mrf.mxu0  ;;  %v13609_v43 = vpop.trf.xlu1 }
 0x410   :  { %14991 = vst [vmem:[#allocation117_spill] sm:$0xff] %v13609_v43 }
 0x413   :  { %5315 = vxpose.xlu1.b32.cont [12/16] (narrow) %v13501_v28, 56  ;;  %5339 = vxpose.xlu0.b32.cont [4/16] (narrow) %v9318_v47, 56  ;;  %v3807_v28 = vpop.f32.mrf.mxu0  ;;  %v13614_v47 = vpop.f32.mrf.mxu1 }
 0x417   :  { %5316 = vxpose.xlu1.b32.cont [13/16] (narrow) %v13517_v30, 56  ;;  %5340 = vxpose.xlu0.b32.cont [5/16] (narrow) %v3757_v12, 56  ;;  %v9339_v30 = vpop.f32.mrf.mxu0 }
 0x41b   :  { %5317 = vxpose.xlu1.b32.cont [14/16] (narrow) %v13513_v2, 56  ;;  %5341 = vxpose.xlu0.b32.cont [6/16] (narrow) %v9321_v0, 56  ;;  %v13621_v2 = vpop.f32.mrf.mxu1  ;;  %v3817_v0 = vpop.f32.mrf.mxu0 }
 0x41d   :  { %v13623_v44 = vpop.f32.mrf.mxu1 }
 0x41f   :  { %5318 = vxpose.xlu1.b32.cont [15/16] (narrow) %v13529_v4, 56  ;;  %5342 = vxpose.xlu0.b32.cont [7/16] (narrow) %v3767_v37, 56  ;;  %v9342_v4 = vpop.f32.mrf.mxu0  ;;  %v13625_v37 = vpop.trf.xlu0 }
 0x423   :  { %v13616_v12 = vpop.trf.xlu1  ;;  %5319 = vxpose.xlu1.b32.end [16/16] (narrow) %v13523_v13, 56  ;;  %5343 = vxpose.xlu0.b32.cont [8/16] (narrow) %v9324_v53, 56  ;;  %v3827_v13 = vpop.f32.mrf.mxu0 }
 0x424   :  { %14992 = vst [vmem:[#allocation118_spill] sm:$0xff] %v13616_v12  ;;  %v13627_v12 = vpop.f32.mrf.mxu1  ;;  %v13629_v53 = vpop.trf.xlu0 }
 0x425   :  { %v9345_v54 = vpop.f32.mrf.mxu0 }
 0x426   :  { %v13631_v25 = vpop.f32.mrf.mxu1 }
 0x427   :  { %v5257_v43 = vpop.trf.xlu1  ;;  %5344 = vxpose.xlu0.b32.cont [9/16] (narrow) %v3777_v31, 56  ;;  %5368 = vxpose.xlu1.b32.start [1/16] (narrow) %v3817_v0, 56 }
 0x428   :  { %9658 = vmatmul.mubr.f32.gmra.mxu1 %v5257_v43  ;;  %v13633_v31 = vpop.f32.mrf.mxu1  ;;  %v3837_v43 = vpop.f32.mrf.mxu0 }
 0x42a   :  { %v9348_v0 = vpop.f32.mrf.mxu0 }
 0x42b   :  { %5345 = vxpose.xlu0.b32.cont [10/16] (narrow) %v9327_v55, 56  ;;  %5369 = vxpose.xlu1.b32.cont [2/16] (narrow) %v9339_v30, 56  ;;  %v13635_v55 = vpop.trf.xlu0  ;;  %v13637_v30 = vpop.f32.mrf.mxu1 }
 0x42c   :  { %14993 = vst [vmem:[#allocation119_spill] sm:$0xff] %v13635_v55  ;;  %v3847_v57 = vpop.f32.mrf.mxu0 }
 0x42f   :  { %5346 = vxpose.xlu0.b32.cont [11/16] (narrow) %v3787_v9, 56  ;;  %5370 = vxpose.xlu1.b32.cont [3/16] (narrow) %v3827_v13, 56  ;;  %v13639_v9 = vpop.trf.xlu0  ;;  %v13641_v13 = vpop.f32.mrf.mxu1 }
 0x430   :  { %14994 = vst [vmem:[#allocation120_spill] sm:$0xff] %v13639_v9 }
 0x433   :  { %5347 = vxpose.xlu0.b32.cont [12/16] (narrow) %v9330_v22, 56  ;;  %5371 = vxpose.xlu1.b32.cont [4/16] (narrow) %v9342_v4, 56  ;;  %v13643_v22 = vpop.f32.mrf.mxu1  ;;  %v9351_v4 = vpop.f32.mrf.mxu0 }
 0x435   :  { %v13649_v55 = vpop.f32.mrf.mxu1 }
 0x437   :  { %5348 = vxpose.xlu0.b32.cont [13/16] (narrow) %v3797_v7, 56  ;;  %5372 = vxpose.xlu1.b32.cont [5/16] (narrow) %v3837_v43, 56  ;;  %v13647_v43 = vpop.trf.xlu1  ;;  %v13652_v9 = vpop.f32.mrf.mxu1 }
 0x43b   :  { %5349 = vxpose.xlu0.b32.cont [14/16] (narrow) %v9333_v32, 56  ;;  %5373 = vxpose.xlu1.b32.cont [6/16] (narrow) %v9345_v54, 56  ;;  %v3857_v32 = vpop.f32.mrf.mxu0 }
 0x43f   :  { %5350 = vxpose.xlu0.b32.cont [15/16] (narrow) %v3807_v28, 56  ;;  %5374 = vxpose.xlu1.b32.cont [7/16] (narrow) %v3847_v57, 56  ;;  %v9354_v57 = vpop.f32.mrf.mxu0  ;;  %v13657_v28 = vpop.f32.mrf.mxu1 }
 0x443   :  { %5351 = vxpose.xlu0.b32.end [16/16] (narrow) %v9336_v45, 56  ;;  %5375 = vxpose.xlu1.b32.cont [8/16] (narrow) %v9348_v0, 56  ;;  %v13645_v7 = vpop.trf.xlu0  ;;  %v13655_v45 = vpop.trf.xlu1 }
 0x444   :  { %14995 = vst [vmem:[#allocation121_spill] sm:$0xff] %v13645_v7  ;;  %v3867_v0 = vpop.f32.mrf.mxu0 }
 0x447   :  { %5592 = vxpose.xlu0.b32.start [1/16] (narrow) %v13541_v61, 56  ;;  %5376 = vxpose.xlu1.b32.cont [9/16] (narrow) %v3857_v32, 56  ;;  %v5289_v54 = vpop.trf.xlu0  ;;  %v13660_v7 = vpop.trf.xlu1 }
 0x448   :  { %9660 = vmatprep.mubr.f32.mxu1 %v5289_v54  ;;  %v13662_v61 = vpop.f32.mrf.mxu1  ;;  %v9357_v32 = vpop.f32.mrf.mxu0 }
 0x44a   :  { %v13665_v54 = vpop.f32.mrf.mxu1 }
 0x44b   :  { %5593 = vxpose.xlu0.b32.cont [2/16] (narrow) %v13533_v6, 56  ;;  %5377 = vxpose.xlu1.b32.cont [10/16] (narrow) %v9351_v4, 56  ;;  %v3877_v6 = vpop.f32.mrf.mxu0  ;;  %v13668_v4 = vpop.trf.xlu1 }
 0x44c   :  { %14996 = vst [vmem:[#allocation122_spill] sm:$0xff] %v13668_v4  ;;  %v13670_v3 = vpop.f32.mrf.mxu1 }
 0x44e   :  { %v13675_v17 = vpop.f32.mrf.mxu1 }
 0x44f   :  { %5594 = vxpose.xlu0.b32.cont [3/16] (narrow) %v13551_v21, 56  ;;  %5378 = vxpose.xlu1.b32.cont [11/16] (narrow) %v3867_v0, 56  ;;  %v9360_v21 = vpop.f32.mrf.mxu0  ;;  %v13673_v0 = vpop.trf.xlu1 }
 0x450   :  { %14997 = vst [vmem:[#allocation123_spill] sm:$0xff] %v13673_v0  ;;  %v15014_v0 = vld [vmem:[#allocation4_spill] sm:$0xff] }
 0x453   :  { %5595 = vxpose.xlu0.b32.cont [4/16] (narrow) %v13545_v8, 56  ;;  %5379 = vxpose.xlu1.b32.cont [12/16] (narrow) %v9354_v57, 56  ;;  %v3887_v8 = vpop.f32.mrf.mxu0  ;;  %v13678_v57 = vpop.f32.mrf.mxu1 }
 0x455   :  { %v13685_v4 = vpop.f32.mrf.mxu1 }
 0x457   :  { %5596 = vxpose.xlu0.b32.cont [5/16] (narrow) %v13561_v10, 56  ;;  %5380 = vxpose.xlu1.b32.cont [13/16] (narrow) %v3877_v6, 56  ;;  %v13683_v6 = vpop.trf.xlu0 }
 0x45b   :  { %5597 = vxpose.xlu0.b32.cont [6/16] (narrow) %v13557_v16, 56  ;;  %5381 = vxpose.xlu1.b32.cont [14/16] (narrow) %v9357_v32, 56  ;;  %v13689_v32 = vpop.f32.mrf.mxu1 }
 0x45f   :  { %5598 = vxpose.xlu0.b32.cont [7/16] (narrow) %v13573_v62, 56  ;;  %5382 = vxpose.xlu1.b32.cont [15/16] (narrow) %v3887_v8, 56  ;;  %v13693_v62 = vpop.trf.xlu0 }
 0x463   :  { %v13680_v10 = vpop.trf.xlu1  ;;  %5599 = vxpose.xlu0.b32.cont [8/16] (narrow) %v13567_v52, 56  ;;  %5383 = vxpose.xlu1.b32.end [16/16] (narrow) %v9360_v21, 56  ;;  %v7965_v52 = vld [vmem:[%s14821_s1 + $0xf8] sm:$0xff]  ;;  %v7964_v21 = vld [vmem:[%s14821_s1 + $0xf0] sm:$0xff] }
 0x464   :  { %9681 = vmatprep.subr.mxu1 %v7965_v52 }
 0x465   :  { %9682 = vmatpush3.msra.mxu1 %v7965_v52 }
 0x466   :  { %9683 = vmatprep.subr.mxu1 %v7964_v21 }
 0x467   :  { %v5321_v16 = vpop.trf.xlu1  ;;  %5600 = vxpose.xlu0.b32.cont [9/16] (narrow) %v13585_v19, 56  ;;  %5624 = vxpose.xlu1.b32.start [1/16] (narrow) %v13621_v2, 56  ;;  %v13701_v19 = vpop.f32.mrf.mxu1  ;;  %v7962_v2 = vld [vmem:[%s14821_s1 + $0xe0] sm:$0xff] }
 0x468   :  { %9661 = vmatmul.mubr.f32.gmra.mxu1 %v5321_v16  ;;  %v7960_v16 = vld [vmem:[%s14821_s1 + $0xd0] sm:$0xff] }
 0x469   :  { %9684 = vmatpush3.msra.mxu1 %v7964_v21  ;;  %v13713_v8 = vpop.f32.mrf.mxu1 }
 0x46b   :  { %5601 = vxpose.xlu0.b32.cont [10/16] (narrow) %v13577_v49, 56  ;;  %5625 = vxpose.xlu1.b32.cont [2/16] (narrow) %v13614_v47, 56  ;;  %v7963_v49 = vld [vmem:[%s14821_s1 + $0xe8] sm:$0xff]  ;;  %v13708_v47 = vpop.trf.xlu0 }
 0x46c   :  { %9685 = vmatprep.subr.mxu1 %v7963_v49 }
 0x46d   :  { %9686 = vmatpush3.msra.mxu1 %v7963_v49  ;;  %v7957_v49 = vld [vmem:[%s14821_s1 + $0xb8] sm:$0xff] }
 0x46e   :  { %9687 = vmatprep.subr.mxu1 %v7962_v2 }
 0x46f   :  { %5602 = vxpose.xlu0.b32.cont [11/16] (narrow) %v13593_v38, 56  ;;  %5626 = vxpose.xlu1.b32.cont [3/16] (narrow) %v13627_v12, 56  ;;  %v7961_v38 = vld [vmem:[%s14821_s1 + $0xd8] sm:$0xff]  ;;  %v13720_v12 = vpop.f32.mrf.mxu1 }
 0x470   :  { %9688 = vmatpush3.msra.mxu1 %v7962_v2 }
 0x471   :  { %9689 = vmatprep.subr.mxu1 %v7961_v38  ;;  %v13732_v52 = vpop.f32.mrf.mxu1 }
 0x472   :  { %9690 = vmatpush3.msra.mxu1 %v7961_v38 }
 0x473   :  { %5603 = vxpose.xlu0.b32.cont [12/16] (narrow) %v13588_v26, 56  ;;  %5627 = vxpose.xlu1.b32.cont [4/16] (narrow) %v13623_v44, 56  ;;  %v13727_v26 = vpop.trf.xlu0  ;;  %v7959_v44 = vld [vmem:[%s14821_s1 + $0xc8] sm:$0xff]  ;;  %v4567_v21 = vpop.f32.mrf.mxu1 }
 0x474   :  { %9691 = vmatprep.subr.mxu1 %v7960_v16 }
 0x475   :  { %9692 = vmatpush3.msra.mxu1 %v7960_v16  ;;  %v7954_v16 = vld [vmem:[%s14821_s1 + $0xa0] sm:$0xff] }
 0x476   :  { %9693 = vmatprep.subr.mxu1 %v7959_v44 }
 0x477   :  { %5604 = vxpose.xlu0.b32.cont [13/16] (narrow) %v13601_v11, 56  ;;  %5628 = vxpose.xlu1.b32.cont [5/16] (narrow) %v13633_v31, 56  ;;  %v7958_v11 = vld [vmem:[%s14821_s1 + $0xc0] sm:$0xff]  ;;  %v13739_v31 = vpop.trf.xlu0 }
 0x478   :  { %14998 = vst [vmem:[#allocation124_spill] sm:$0xff] %v13739_v31  ;;  %9694 = vmatpush3.msra.mxu1 %v7959_v44 }
 0x479   :  { %9695 = vmatprep.subr.mxu1 %v7958_v11 }
 0x47a   :  { %9696 = vmatpush3.msra.mxu1 %v7958_v11 }
 0x47b   :  { %5605 = vxpose.xlu0.b32.cont [14/16] (narrow) %v13598_v24, 56  ;;  %5629 = vxpose.xlu1.b32.cont [6/16] (narrow) %v13631_v25, 56  ;;  %v7956_v24 = vld [vmem:[%s14821_s1 + $0xb0] sm:$0xff]  ;;  %v13749_v25 = vpop.f32.mrf.mxu1 }
 0x47c   :  { %9697 = vmatprep.subr.mxu1 %v7957_v49 }
 0x47d   :  { %9698 = vmatpush3.msra.mxu1 %v7957_v49  ;;  %v4577_v38 = vpop.f32.mrf.mxu1  ;;  %v7951_v49 = vld [vmem:[%s14821_s1 + $0x88] sm:$0xff] }
 0x47e   :  { %9699 = vmatprep.subr.mxu1 %v7956_v24 }
 0x47f   :  { %5606 = vxpose.xlu0.b32.cont [15/16] (narrow) %v13611_v34, 56  ;;  %5630 = vxpose.xlu1.b32.cont [7/16] (narrow) %v13641_v13, 56  ;;  %v7955_v34 = vld [vmem:[%s14821_s1 + $0xa8] sm:$0xff]  ;;  %v13758_v13 = vpop.trf.xlu1  ;;  %v9570_v44 = vpop.f32.mrf.mxu1 }
 0x480   :  { %9700 = vmatpush3.msra.mxu1 %v7956_v24 }
 0x481   :  { %9701 = vmatprep.subr.mxu1 %v7955_v34 }
 0x482   :  { %9702 = vmatpush3.msra.mxu1 %v7955_v34 }
 0x483   :  { %5607 = vxpose.xlu0.b32.end [16/16] (narrow) %v13606_v1, 56  ;;  %5631 = vxpose.xlu1.b32.cont [8/16] (narrow) %v13637_v30, 56  ;;  %v13753_v2 = vpop.trf.xlu0  ;;  %v7953_v30 = vld [vmem:[%s14821_s1 + $0x98] sm:$0xff]  ;;  %v13770_v11 = vpop.trf.xlu1 }
 0x484   :  { %14999 = vst [vmem:[#allocation125_spill] sm:$0xff] %v13753_v2  ;;  %9703 = vmatprep.subr.mxu1 %v7954_v16 }
 0x485   :  { %9704 = vmatpush3.msra.mxu1 %v7954_v16 }
 0x486   :  { %9705 = vmatprep.subr.mxu1 %v7953_v30 }
 0x487   :  { %5656 = vxpose.xlu0.b32.start [1/16] (narrow) %v13685_v4, 56  ;;  %5632 = vxpose.xlu1.b32.cont [9/16] (narrow) %v13649_v55, 56  ;;  %v5353_v1 = vpop.trf.xlu0  ;;  %v7952_v55 = vld [vmem:[%s14821_s1 + $0x90] sm:$0xff]  ;;  %v4587_v4 = vpop.f32.mrf.mxu1 }
 0x488   :  { %9663 = vmatprep.mubr.f32.mxu1 %v5353_v1  ;;  %9706 = vmatpush3.msra.mxu1 %v7953_v30  ;;  %v15002_v1 = vld [vmem:[#allocation21_spill] sm:$0xff] }
 0x489   :  { %9707 = vmatprep.subr.mxu1 %v7952_v55 }
 0x48a   :  { %9708 = vmatpush3.msra.mxu1 %v7952_v55  ;;  %v15004_v55 = vld [vmem:[#allocation53_spill] sm:$0xff] }
 0x48b   :  { %5657 = vxpose.xlu0.b32.cont [2/16] (narrow) %v13678_v57, 56  ;;  %5633 = vxpose.xlu1.b32.cont [10/16] (narrow) %v13643_v22, 56  ;;  %v13780_v22 = vpop.trf.xlu1  ;;  %v9573_v57 = vpop.f32.mrf.mxu1 }
 0x48c   :  { %9709 = vmatprep.subr.mxu1 %v7951_v49 }
 0x48d   :  { %9710 = vmatpush3.msra.mxu1 %v7951_v49  ;;  %v4597_v24 = vpop.f32.mrf.mxu1 }
 0x48f   :  { %5658 = vxpose.xlu0.b32.cont [3/16] (narrow) %v13701_v19, 56  ;;  %5634 = vxpose.xlu1.b32.cont [11/16] (narrow) %v13657_v28, 56  ;;  %v13786_v34 = vpop.trf.xlu1  ;;  %v9576_v19 = vpop.f32.mrf.mxu1 }
 0x491   :  { %v4607_v16 = vpop.f32.mrf.mxu1 }
 0x493   :  { %5659 = vxpose.xlu0.b32.cont [4/16] (narrow) %v13689_v32, 56  ;;  %5635 = vxpose.xlu1.b32.cont [12/16] (narrow) %v13652_v9, 56  ;;  %v13790_v28 = vpop.trf.xlu1  ;;  %v9579_v32 = vpop.f32.mrf.mxu1 }
 0x494   :  { %15000 = vst [vmem:[#allocation126_spill] sm:$0xff] %v13790_v28 }
 0x497   :  { %5660 = vxpose.xlu0.b32.cont [5/16] (narrow) %v13720_v12, 56  ;;  %5636 = vxpose.xlu1.b32.cont [13/16] (narrow) %v13665_v54, 56  ;;  %v7950_v54 = vld [vmem:[%s14821_s1 + $0x80] sm:$0xff] }
 0x498   :  { %9711 = vmatprep.subr.mxu1 %v7950_v54 }
 0x499   :  { %9712 = vmatpush3.msra.mxu1 %v7950_v54  ;;  %v15006_v54 = vld [vmem:[#allocation41_spill] sm:$0xff] }
 0x49b   :  { %5661 = vxpose.xlu0.b32.cont [6/16] (narrow) %v13713_v8, 56  ;;  %5637 = vxpose.xlu1.b32.cont [14/16] (narrow) %v13662_v61, 56  ;;  %v13800_v8 = vpop.trf.xlu0  ;;  %v4617_v61 = vpop.f32.mrf.mxu1 }
 0x49f   :  { %5662 = vxpose.xlu0.b32.cont [7/16] (narrow) %v4567_v21, 56  ;;  %5638 = vxpose.xlu1.b32.cont [15/16] (narrow) %v13675_v17, 56  ;;  %v15001_v17 = vld [vmem:[#allocation13_spill] sm:$0xff] }
 0x4a0   :  { %v13809_v21 = vld [vmem:[%s14821_s1 + $0x178] sm:$0xff] }
 0x4a1   :  { %9761 = vmatprep.subr.mxu1 %v13809_v21 }
 0x4a3   :  { %5663 = vxpose.xlu0.b32.cont [8/16] (narrow) %v13732_v52, 56  ;;  %5639 = vxpose.xlu1.b32.end [16/16] (narrow) %v13670_v3, 56  ;;  %v13795_v9 = vpop.trf.xlu1  ;;  %v9582_v52 = vpop.f32.mrf.mxu1 }
 0x4a4   :  { %v13804_v3 = vpop.trf.xlu0 }
 0x4a5   :  { %v4627_v30 = vpop.f32.mrf.mxu1 }
 0x4a7   :  { %5664 = vxpose.xlu0.b32.cont [9/16] (narrow) %v4577_v38, 56  ;;  %5688 = vxpose.xlu1.b32.start [1/16] (narrow) %v4617_v61, 56  ;;  %v5385_v12 = vpop.trf.xlu1  ;;  %v15003_v38 = vld [vmem:[#allocation42_spill] sm:$0xff] }
 0x4a8   :  { %9664 = vmatmul.mubr.f32.gmra.mxu1 %v5385_v12  ;;  %v13816_v49 = vpop.trf.xlu0 }
 0x4a9   :  { %9666 = vmatprep.mubr.f32.mxu1 %v15001_v17 }
 0x4ab   :  { %5665 = vxpose.xlu0.b32.cont [10/16] (narrow) %v13749_v25, 56  ;;  %5689 = vxpose.xlu1.b32.cont [2/16] (narrow) %v9579_v32, 56  ;;  %v15005_v25 = vld [vmem:[#allocation79_spill] sm:$0xff]  ;;  %v9585_v32 = vpop.f32.mrf.mxu1 }
 0x4ac   :  { %9667 = vmatmul.mubr.f32.gmra.mxu1 %v15002_v1  ;;  %v13819_v12 = vpop.trf.xlu0 }
 0x4ad   :  { %9669 = vmatprep.mubr.f32.mxu1 %v15003_v38  ;;  %v4637_v61 = vpop.f32.mrf.mxu1 }
 0x4af   :  { %5666 = vxpose.xlu0.b32.cont [11/16] (narrow) %v4587_v4, 56  ;;  %5690 = vxpose.xlu1.b32.cont [3/16] (narrow) %v4627_v30, 56  ;;  %v9588_v17 = vpop.f32.mrf.mxu1 }
 0x4b0   :  { %9670 = vmatmul.mubr.f32.gmra.mxu1 %v15004_v55  ;;  %v13821_v4 = vpop.trf.xlu0 }
 0x4b1   :  { %9672 = vmatprep.mubr.f32.mxu1 %v15005_v25  ;;  %15007 = vst [vmem:[#allocation13_spill] sm:$0xff] %v13821_v4  ;;  %v4647_v1 = vpop.f32.mrf.mxu1 }
 0x4b3   :  { %5667 = vxpose.xlu0.b32.cont [12/16] (narrow) %v9570_v44, 56  ;;  %5691 = vxpose.xlu1.b32.cont [4/16] (narrow) %v9582_v52, 56  ;;  %v9591_v38 = vpop.f32.mrf.mxu1  ;;  %v13825_v52 = vpop.trf.xlu1 }
 0x4b4   :  { %9673 = vmatmul.mubr.f32.gmra.mxu1 %v15006_v54 }
 0x4b5   :  { %v4657_v30 = vpop.f32.mrf.mxu1 }
 0x4b7   :  { %5668 = vxpose.xlu0.b32.cont [13/16] (narrow) %v4597_v24, 56  ;;  %5692 = vxpose.xlu1.b32.cont [5/16] (narrow) %v4637_v61, 56  ;;  %v9594_v55 = vpop.f32.mrf.mxu1 }
 0x4b9   :  { %v4667_v25 = vpop.f32.mrf.mxu1 }
 0x4bb   :  { %5669 = vxpose.xlu0.b32.cont [14/16] (narrow) %v9573_v57, 56  ;;  %5693 = vxpose.xlu1.b32.cont [6/16] (narrow) %v9585_v32, 56  ;;  %v13827_v57 = vpop.trf.xlu1 }
 0x4bf   :  { %5670 = vxpose.xlu0.b32.cont [15/16] (narrow) %v4607_v16, 56  ;;  %5694 = vxpose.xlu1.b32.cont [7/16] (narrow) %v4647_v1, 56  ;;  %v13829_v32 = vpop.trf.xlu1  ;;  %v9597_v16 = vpop.f32.mrf.mxu1 }
 0x4c3   :  { %5671 = vxpose.xlu0.b32.end [16/16] (narrow) %v9576_v19, 56  ;;  %5695 = vxpose.xlu1.b32.cont [8/16] (narrow) %v9588_v17, 56  ;;  %v13823_v44 = vpop.trf.xlu0  ;;  %v4677_v19 = vpop.f32.mrf.mxu1 }
 0x4c4   :  { %15008 = vst [vmem:[#allocation21_spill] sm:$0xff] %v13823_v44  ;;  %v13831_v54 = vpop.trf.xlu1 }
 0x4c5   :  { %v9600_v61 = vpop.f32.mrf.mxu1 }
 0x4c7   :  { %5696 = vxpose.xlu1.b32.cont [9/16] (narrow) %v4657_v30, 56  ;;  %v5609_v24 = vpop.trf.xlu0  ;;  %v4687_v1 = vpop.f32.mrf.mxu1 }
 0x4c8   :  { %9675 = vmatprep.mubr.f32.mxu1 %v5609_v24  ;;  %v13833_v17 = vpop.trf.xlu1 }
 0x4c9   :  { %15009 = vst [vmem:[#allocation42_spill] sm:$0xff] %v13833_v17 }
 0x4cb   :  { %5697 = vxpose.xlu1.b32.cont [10/16] (narrow) %v9591_v38, 56  ;;  %v13837_v30 = vpop.trf.xlu0 }
 0x4cf   :  { %5698 = vxpose.xlu1.b32.cont [11/16] (narrow) %v4667_v25, 56  ;;  %v13839_v25 = vpop.trf.xlu0 }
 0x4d3   :  { %5699 = vxpose.xlu1.b32.cont [12/16] (narrow) %v9594_v55, 56  ;;  %v13841_v55 = vpop.trf.xlu0 }
 0x4d7   :  { %5700 = vxpose.xlu1.b32.cont [13/16] (narrow) %v4677_v19, 56  ;;  %v13843_v19 = vpop.trf.xlu0 }
 0x4db   :  { %5701 = vxpose.xlu1.b32.cont [14/16] (narrow) %v9597_v16, 56  ;;  %v13845_v44 = vpop.trf.xlu0 }
 0x4dc   :  { %15010 = vst [vmem:[#allocation53_spill] sm:$0xff] %v13845_v44  ;;  %v7980_v44 = vld [vmem:[%s14821_s1 + $0x170] sm:$0xff] }
 0x4df   :  { %5702 = vxpose.xlu1.b32.cont [15/16] (narrow) %v4687_v1, 56 }
 0x4e3   :  { %5703 = vxpose.xlu1.b32.end [16/16] (narrow) %v9600_v61, 56  ;;  %v13835_v38 = vpop.trf.xlu1 }
 0x4e7   :  { %v5641_v24 = vpop.trf.xlu1 }
 0x4e8   :  { %9676 = vmatmul.mubr.f32.gmra.mxu1 %v5641_v24 }
 0x4eb   :  { %v13849_v17 = vpop.trf.xlu1 }
 0x4ef   :  { %v13851_v61 = vpop.trf.xlu1 }
 0x4f3   :  { %v13853_v2 = vpop.trf.xlu1 }
 0x4f7   :  { %v13855_v4 = vpop.trf.xlu1 }
 0x4fb   :  { %v13857_v24 = vpop.trf.xlu1 }
 0x4fc   :  { %15012 = vst [vmem:[#allocation41_spill] sm:$0xff] %v13857_v24  ;;  %v7979_v24 = vld [vmem:[%s14821_s1 + $0x168] sm:$0xff] }
 0x503   :  { %v13847_v16 = vpop.trf.xlu0 }
 0x504   :  { %15011 = vst [vmem:[#allocation79_spill] sm:$0xff] %v13847_v16  ;;  %v15015_v16 = vld [vmem:[#allocation6_spill] sm:$0xff] }
 0x507   :  { %v5673_v1 = vpop.trf.xlu0 }
 0x508   :  { %9678 = vmatprep.mubr.f32.mxu1 %v5673_v1  ;;  %v15016_v1 = vld [vmem:[#allocation30_spill] sm:$0xff] }
 0x523   :  { %v13859_v28 = vpop.trf.xlu1 }
 0x524   :  { %15013 = vst [vmem:[#allocation127_spill] sm:$0xff] %v13859_v28  ;;  %v15018_v28 = vld [vmem:[#allocation68_spill] sm:$0xff] }
 0x527   :  { %v5705_v31 = vpop.trf.xlu1 }
 0x528   :  { %9679 = vmatmul.mubr.f32.gmra.mxu1 %v5705_v31  ;;  %v15017_v31 = vld [vmem:[#allocation32_spill] sm:$0xff] }
 0x529   :  { %9713 = vmatprep.mubr.f32.mxu1 %v15014_v0  ;;  %v7978_v0 = vld [vmem:[%s14821_s1 + $0x160] sm:$0xff] }
 0x52c   :  { %9714 = vmatmul.mubr.f32.vlgmr.msra.gmra.mxu1 %v15015_v16  ;;  %v15019_v16 = vld [vmem:[#allocation71_spill] sm:$0xff] }
 0x52d   :  { %9762 = vmatpush3.msra.mxu1 %v13809_v21  ;;  %9716 = vmatprep.mubr.f32.mxu1 %v15016_v1  ;;  %v7977_v21 = vld [vmem:[%s14821_s1 + $0x158] sm:$0xff] }
 0x52e   :  { %9763 = vmatprep.subr.mxu1 %v7980_v44  ;;  %v15020_v1 = vld [vmem:[#allocation65_spill] sm:$0xff] }
 0x52f   :  { %9764 = vmatpush3.msra.mxu1 %v7980_v44  ;;  %v7976_v44 = vld [vmem:[%s14821_s1 + $0x150] sm:$0xff] }
 0x530   :  { %9717 = vmatmul.mubr.f32.gmra.mxu1 %v15017_v31  ;;  %9765 = vmatprep.subr.mxu1 %v7979_v24  ;;  %v7973_v31 = vld [vmem:[%s14821_s1 + $0x138] sm:$0xff] }
 0x531   :  { %9719 = vmatprep.mubr.f32.mxu1 %v15018_v28  ;;  %9766 = vmatpush3.msra.mxu1 %v7979_v24  ;;  %v7975_v28 = vld [vmem:[%s14821_s1 + $0x148] sm:$0xff]  ;;  %v7974_v24 = vld [vmem:[%s14821_s1 + $0x140] sm:$0xff] }
 0x532   :  { %9767 = vmatprep.subr.mxu1 %v7978_v0 }
 0x533   :  { %9768 = vmatpush3.msra.mxu1 %v7978_v0  ;;  %v15021_v0 = vld [vmem:[#allocation101_spill] sm:$0xff] }
 0x534   :  { %9720 = vmatmul.mubr.f32.gmra.mxu1 %v15019_v16  ;;  %9769 = vmatprep.subr.mxu1 %v7977_v21  ;;  %v15025_v16 = vld [vmem:[#allocation58_spill] sm:$0xff] }
 0x535   :  { %9722 = vmatprep.mubr.f32.mxu1 %v15020_v1  ;;  %9770 = vmatpush3.msra.mxu1 %v7977_v21  ;;  %v7972_v21 = vld [vmem:[%s14821_s1 + $0x130] sm:$0xff]  ;;  %v15026_v1 = vld [vmem:[#allocation81_spill] sm:$0xff] }
 0x536   :  { %9771 = vmatprep.subr.mxu1 %v7976_v44 }
 0x537   :  { %9772 = vmatpush3.msra.mxu1 %v7976_v44  ;;  %v7970_v44 = vld [vmem:[%s14821_s1 + $0x120] sm:$0xff] }
 0x538   :  { %9723 = vmatmul.mubr.f32.gmra.mxu1 %v15021_v0  ;;  %9773 = vmatprep.subr.mxu1 %v7975_v28  ;;  %v15031_v0 = vld [vmem:[#allocation35_spill] sm:$0xff] }
 0x539   :  { %9725 = vmatprep.mubr.f32.mxu1 %v13267_v41  ;;  %9774 = vmatpush3.msra.mxu1 %v7975_v28  ;;  %v7971_v41 = vld [vmem:[%s14821_s1 + $0x128] sm:$0xff]  ;;  %v15029_v28 = vld [vmem:[#allocation9_spill] sm:$0xff] }
 0x53a   :  { %9775 = vmatprep.subr.mxu1 %v7974_v24 }
 0x53b   :  { %9776 = vmatpush3.msra.mxu1 %v7974_v24  ;;  %v15030_v24 = vld [vmem:[#allocation31_spill] sm:$0xff] }
 0x53c   :  { %9726 = vmatmul.mubr.f32.gmra.mxu1 %v13319_v59  ;;  %9777 = vmatprep.subr.mxu1 %v7973_v31  ;;  %v7969_v59 = vld [vmem:[%s14821_s1 + $0x118] sm:$0xff] }
 0x53d   :  { %9728 = vmatprep.mubr.f32.mxu1 %v13363_v56  ;;  %9778 = vmatpush3.msra.mxu1 %v7973_v31  ;;  %v7968_v56 = vld [vmem:[%s14821_s1 + $0x110] sm:$0xff]  ;;  %v15032_v31 = vld [vmem:[#allocation69_spill] sm:$0xff] }
 0x53e   :  { %9779 = vmatprep.subr.mxu1 %v7972_v21 }
 0x53f   :  { %9780 = vmatpush3.msra.mxu1 %v7972_v21  ;;  %v7993_v21 = vld [vmem:[%s14821_s1 + $0x1d8] sm:$0xff] }
 0x540   :  { %9729 = vmatmul.mubr.f32.gmra.mxu1 %v13407_v48  ;;  %9781 = vmatprep.subr.mxu1 %v7971_v41  ;;  %v7967_v48 = vld [vmem:[%s14821_s1 + $0x108] sm:$0xff] }
 0x541   :  { %9731 = vmatprep.mubr.f32.mxu1 %v13451_v29  ;;  %9782 = vmatpush3.msra.mxu1 %v7971_v41  ;;  %v7966_v29 = vld [vmem:[%s14821_s1 + $0x100] sm:$0xff]  ;;  %v7992_v41 = vld [vmem:[%s14821_s1 + $0x1d0] sm:$0xff] }
 0x542   :  { %9783 = vmatprep.subr.mxu1 %v7970_v44 }
 0x543   :  { %9784 = vmatpush3.msra.mxu1 %v7970_v44  ;;  %v15033_v44 = vld [vmem:[#allocation74_spill] sm:$0xff] }
 0x544   :  { %9732 = vmatmul.mubr.f32.gmra.mxu1 %v13495_v50  ;;  %9785 = vmatprep.subr.mxu1 %v7969_v59  ;;  %v7997_v50 = vld [vmem:[%s14821_s1 + $0x1f8] sm:$0xff] }
 0x545   :  { %9734 = vmatprep.mubr.f32.mxu1 %v13539_v58  ;;  %9786 = vmatpush3.msra.mxu1 %v7969_v59  ;;  %v15022_v58 = vld [vmem:[#allocation15_spill] sm:$0xff]  ;;  %v15034_v59 = vld [vmem:[#allocation96_spill] sm:$0xff] }
 0x546   :  { %9787 = vmatprep.subr.mxu1 %v7968_v56 }
 0x547   :  { %9788 = vmatpush3.msra.mxu1 %v7968_v56  ;;  %v7991_v56 = vld [vmem:[%s14821_s1 + $0x1c8] sm:$0xff] }
 0x548   :  { %9735 = vmatmul.mubr.f32.gmra.mxu1 %v13583_v15  ;;  %9789 = vmatprep.subr.mxu1 %v7967_v48  ;;  %v15024_v15 = vld [vmem:[#allocation44_spill] sm:$0xff] }
 0x549   :  { %9737 = vmatprep.mubr.f32.mxu1 %v13619_v42  ;;  %9790 = vmatpush3.msra.mxu1 %v7967_v48  ;;  %v15023_v42 = vld [vmem:[#allocation24_spill] sm:$0xff]  ;;  %v7990_v48 = vld [vmem:[%s14821_s1 + $0x1c0] sm:$0xff] }
 0x54a   :  { %9791 = vmatprep.subr.mxu1 %v7966_v29 }
 0x54b   :  { %9792 = vmatpush3.msra.mxu1 %v7966_v29  ;;  %v15035_v29 = vld [vmem:[#allocation102_spill] sm:$0xff] }
 0x54c   :  { %9738 = vmatmul.mubr.f32.gmra.mxu1 %v13647_v43  ;;  %9841 = vmatprep.subr.mxu1 %v7997_v50  ;;  %v15027_v43 = vld [vmem:[#allocation90_spill] sm:$0xff] }
 0x54d   :  { %9740 = vmatprep.mubr.f32.mxu1 %v13683_v6  ;;  %v5674_v6 = vpop.trf.xlu0 }
 0x550   :  { %9741 = vmatmul.mubr.f32.gmra.mxu1 %v13758_v13  ;;  %v5706_v13 = vpop.trf.xlu1 }
 0x551   :  { %9743 = vmatprep.mubr.f32.mxu1 %v13800_v8  ;;  %v15028_v8 = vld [vmem:[#allocation5_spill] sm:$0xff] }
 0x554   :  { %9744 = vmatmul.mubr.f32.gmra.mxu1 %v13825_v52  ;;  %v7996_v52 = vld [vmem:[%s14821_s1 + $0x1f0] sm:$0xff] }
 0x555   :  { %9746 = vmatprep.mubr.f32.mxu1 %v15022_v58  ;;  %v7989_v58 = vld [vmem:[%s14821_s1 + $0x1b8] sm:$0xff] }
 0x558   :  { %9747 = vmatmul.mubr.f32.gmra.mxu1 %v15023_v42  ;;  %v7988_v42 = vld [vmem:[%s14821_s1 + $0x1b0] sm:$0xff] }
 0x559   :  { %9749 = vmatprep.mubr.f32.mxu1 %v15024_v15  ;;  %v15037_v15 = vld [vmem:[#allocation85_spill] sm:$0xff] }
 0x55c   :  { %9750 = vmatmul.mubr.f32.gmra.mxu1 %v15025_v16  ;;  %v7987_v16 = vld [vmem:[%s14821_s1 + $0x1a8] sm:$0xff] }
 0x55d   :  { %9752 = vmatprep.mubr.f32.mxu1 %v15026_v1  ;;  %v7986_v1 = vld [vmem:[%s14821_s1 + $0x1a0] sm:$0xff] }
 0x560   :  { %9753 = vmatmul.mubr.f32.gmra.mxu1 %v15027_v43  ;;  %v7984_v43 = vld [vmem:[%s14821_s1 + $0x190] sm:$0xff] }
 0x561   :  { %9755 = vmatprep.mubr.f32.mxu1 %v13837_v30  ;;  %v7995_v30 = vld [vmem:[%s14821_s1 + $0x1e8] sm:$0xff] }
 0x564   :  { %9756 = vmatmul.mubr.f32.gmra.mxu1 %v13849_v17  ;;  %v7994_v17 = vld [vmem:[%s14821_s1 + $0x1e0] sm:$0xff] }
 0x565   :  { %9758 = vmatprep.mubr.f32.mxu1 %v5674_v6  ;;  %v14000_v6 = vpop.f32.mrf.mxu1 }
 0x568   :  { %9759 = vmatmul.mubr.f32.gmra.mxu1 %v5706_v13 }
 0x569   :  { %9793 = vmatprep.mubr.f32.mxu1 %v15028_v8  ;;  %v15038_v8 = vld [vmem:[#allocation17_spill] sm:$0xff] }
 0x56c   :  { %9794 = vmatmul.mubr.f32.vlgmr.msra.gmra.mxu1 %v15029_v28  ;;  %v15040_v28 = vld [vmem:[#allocation46_spill] sm:$0xff] }
 0x56d   :  { %9842 = vmatpush3.msra.mxu1 %v7997_v50  ;;  %9796 = vmatprep.mubr.f32.mxu1 %v15030_v24  ;;  %v15036_v50 = vld [vmem:[#allocation107_spill] sm:$0xff]  ;;  %v15041_v24 = vld [vmem:[#allocation61_spill] sm:$0xff] }
 0x56e   :  { %9843 = vmatprep.subr.mxu1 %v7996_v52 }
 0x56f   :  { %9844 = vmatpush3.msra.mxu1 %v7996_v52 }
 0x570   :  { %9797 = vmatmul.mubr.f32.gmra.mxu1 %v15031_v0  ;;  %9845 = vmatprep.subr.mxu1 %v7995_v30 }
 0x571   :  { %9799 = vmatprep.mubr.f32.mxu1 %v15032_v31  ;;  %9846 = vmatpush3.msra.mxu1 %v7995_v30  ;;  %v5707_v31 = vpop.trf.xlu1 }
 0x572   :  { %9847 = vmatprep.subr.mxu1 %v7994_v17 }
 0x573   :  { %9848 = vmatpush3.msra.mxu1 %v7994_v17  ;;  %v15043_v17 = vld [vmem:[#allocation51_spill] sm:$0xff] }
 0x574   :  { %9800 = vmatmul.mubr.f32.gmra.mxu1 %v15033_v44  ;;  %9849 = vmatprep.subr.mxu1 %v7993_v21 }
 0x575   :  { %9802 = vmatprep.mubr.f32.mxu1 %v15034_v59  ;;  %9850 = vmatpush3.msra.mxu1 %v7993_v21  ;;  %v8012_v59 = vld [vmem:[%s14821_s1 + $0x270] sm:$0xff] }
 0x576   :  { %9851 = vmatprep.subr.mxu1 %v7992_v41 }
 0x577   :  { %9852 = vmatpush3.msra.mxu1 %v7992_v41  ;;  %v15044_v41 = vld [vmem:[#allocation7_spill] sm:$0xff] }
 0x578   :  { %9803 = vmatmul.mubr.f32.gmra.mxu1 %v15035_v29  ;;  %9853 = vmatprep.subr.mxu1 %v7991_v56  ;;  %v8010_v29 = vld [vmem:[%s14821_s1 + $0x260] sm:$0xff] }
 0x579   :  { %9805 = vmatprep.mubr.f32.mxu1 %v15036_v50  ;;  %9854 = vmatpush3.msra.mxu1 %v7991_v56 }
 0x57a   :  { %9855 = vmatprep.subr.mxu1 %v7990_v48 }
 0x57b   :  { %9856 = vmatpush3.msra.mxu1 %v7990_v48  ;;  %v15046_v48 = vld [vmem:[#allocation33_spill] sm:$0xff] }
 0x57c   :  { %9806 = vmatmul.mubr.f32.gmra.mxu1 %v15037_v15  ;;  %9857 = vmatprep.subr.mxu1 %v7989_v58  ;;  %v8009_v15 = vld [vmem:[%s14821_s1 + $0x258] sm:$0xff] }
 0x57d   :  { %9808 = vmatprep.mubr.f32.mxu1 %v13373_v35  ;;  %9858 = vmatpush3.msra.mxu1 %v7989_v58  ;;  %v7985_v35 = vld [vmem:[%s14821_s1 + $0x198] sm:$0xff]  ;;  %v15047_v58 = vld [vmem:[#allocation38_spill] sm:$0xff] }
 0x57e   :  { %9859 = vmatprep.subr.mxu1 %v7988_v42 }
 0x57f   :  { %9860 = vmatpush3.msra.mxu1 %v7988_v42  ;;  %v15048_v42 = vld [vmem:[#allocation72_spill] sm:$0xff] }
 0x580   :  { %9809 = vmatmul.mubr.f32.gmra.mxu1 %v13417_v36  ;;  %9861 = vmatprep.subr.mxu1 %v7987_v16  ;;  %v7983_v36 = vld [vmem:[%s14821_s1 + $0x188] sm:$0xff] }
 0x581   :  { %9811 = vmatprep.mubr.f32.mxu1 %v13461_v46  ;;  %9862 = vmatpush3.msra.mxu1 %v7987_v16  ;;  %v7982_v46 = vld [vmem:[%s14821_s1 + $0x180] sm:$0xff] }
 0x582   :  { %9863 = vmatprep.subr.mxu1 %v7986_v1 }
 0x583   :  { %9864 = vmatpush3.msra.mxu1 %v7986_v1  ;;  %v8008_v1 = vld [vmem:[%s14821_s1 + $0x250] sm:$0xff] }
 0x584   :  { %9812 = vmatmul.mubr.f32.gmra.mxu1 %v13505_v63  ;;  %9865 = vmatprep.subr.mxu1 %v7985_v35  ;;  %v8013_v63 = vld [vmem:[%s14821_s1 + $0x278] sm:$0xff] }
 0x585   :  { %9814 = vmatprep.mubr.f32.mxu1 %v13549_v33  ;;  %9866 = vmatpush3.msra.mxu1 %v7985_v35  ;;  %v14007_v33 = vpop.f32.mrf.mxu1  ;;  %v15049_v35 = vld [vmem:[#allocation76_spill] sm:$0xff] }
 0x586   :  { %9867 = vmatprep.subr.mxu1 %v7984_v43 }
 0x587   :  { %9868 = vmatpush3.msra.mxu1 %v7984_v43  ;;  %v14011_v13 = vpop.f32.mrf.mxu1  ;;  %v15050_v43 = vld [vmem:[#allocation97_spill] sm:$0xff] }
 0x588   :  { %9815 = vmatmul.mubr.f32.gmra.mxu1 %v13591_v27  ;;  %9869 = vmatprep.subr.mxu1 %v7983_v36 }
 0x589   :  { %9817 = vmatprep.mubr.f32.mxu1 %v13625_v37  ;;  %9870 = vmatpush3.msra.mxu1 %v7983_v36  ;;  %v14015_v27 = vpop.f32.mrf.mxu1  ;;  %v8007_v36 = vld [vmem:[%s14821_s1 + $0x248] sm:$0xff] }
 0x58a   :  { %9871 = vmatprep.subr.mxu1 %v7982_v46 }
 0x58b   :  { %9872 = vmatpush3.msra.mxu1 %v7982_v46  ;;  %v14017_v37 = vpop.f32.mrf.mxu1 }
 0x58c   :  { %9818 = vmatmul.mubr.f32.gmra.mxu1 %v13655_v45  ;;  %9921 = vmatprep.subr.mxu1 %v8013_v63  ;;  %v15039_v45 = vld [vmem:[#allocation25_spill] sm:$0xff] }
 0x58d   :  { %9820 = vmatprep.mubr.f32.mxu1 %v13693_v62  ;;  %v14021_v52 = vpop.f32.mrf.mxu1 }
 0x58f   :  { %v14025_v62 = vpop.f32.mrf.mxu1 }
 0x590   :  { %9821 = vmatmul.mubr.f32.gmra.mxu1 %v13770_v11  ;;  %v15042_v11 = vld [vmem:[#allocation83_spill] sm:$0xff] }
 0x591   :  { %9823 = vmatprep.mubr.f32.mxu1 %v13804_v3  ;;  %v14029_v3 = vpop.f32.mrf.mxu1 }
 0x593   :  { %v14031_v30 = vpop.f32.mrf.mxu1 }
 0x594   :  { %9824 = vmatmul.mubr.f32.gmra.mxu1 %v13827_v57  ;;  %v5675_v57 = vpop.trf.xlu0 }
 0x595   :  { %9826 = vmatprep.mubr.f32.mxu1 %v15038_v8  ;;  %v14035_v0 = vpop.f32.mrf.mxu1 }
 0x597   :  { %v14038_v21 = vpop.f32.mrf.mxu1 }
 0x598   :  { %9827 = vmatmul.mubr.f32.gmra.mxu1 %v15039_v45  ;;  %v15051_v45 = vld [vmem:[#allocation103_spill] sm:$0xff] }
 0x599   :  { %9829 = vmatprep.mubr.f32.mxu1 %v15040_v28  ;;  %v14041_v44 = vpop.f32.mrf.mxu1  ;;  %v15052_v28 = vld [vmem:[#allocation108_spill] sm:$0xff] }
 0x59b   :  { %v14046_v56 = vpop.f32.mrf.mxu1 }
 0x59c   :  { %9830 = vmatmul.mubr.f32.gmra.mxu1 %v15041_v24  ;;  %v8005_v24 = vld [vmem:[%s14821_s1 + $0x238] sm:$0xff] }
 0x59d   :  { %9832 = vmatprep.mubr.f32.mxu1 %v15042_v11  ;;  %v14056_v50 = vpop.f32.mrf.mxu1  ;;  %v8004_v11 = vld [vmem:[%s14821_s1 + $0x230] sm:$0xff] }
 0x59f   :  { %v14063_v16 = vpop.f32.mrf.mxu1 }
 0x5a0   :  { %9833 = vmatmul.mubr.f32.gmra.mxu1 %v15043_v17 }
 0x5a1   :  { %9835 = vmatprep.mubr.f32.mxu1 %v13839_v25  ;;  %v15045_v25 = vld [vmem:[#allocation11_spill] sm:$0xff]  ;;  %v14073_v46 = vpop.f32.mrf.mxu1 }
 0x5a3   :  { %v14078_v8 = vpop.f32.mrf.mxu1 }
 0x5a4   :  { %9836 = vmatmul.mubr.f32.gmra.mxu1 %v13851_v61  ;;  %v8011_v61 = vld [vmem:[%s14821_s1 + $0x268] sm:$0xff] }
 0x5a5   :  { %9838 = vmatprep.mubr.f32.mxu1 %v5675_v57  ;;  %v14088_v17 = vpop.f32.mrf.mxu1  ;;  %v15053_v57 = vld [vmem:[#allocation47_spill] sm:$0xff] }
 0x5a8   :  { %9839 = vmatmul.mubr.f32.gmra.mxu1 %v5707_v31  ;;  %v8003_v31 = vld [vmem:[%s14821_s1 + $0x228] sm:$0xff] }
 0x5a9   :  { %9873 = vmatprep.mubr.f32.mxu1 %v15044_v41  ;;  %v14095_v41 = vpop.f32.mrf.mxu1 }
 0x5ac   :  { %9874 = vmatmul.mubr.f32.vlgmr.msra.gmra.mxu1 %v15045_v25  ;;  %v14105_v25 = vpop.f32.mrf.mxu1 }
 0x5ad   :  { %9922 = vmatpush3.msra.mxu1 %v8013_v63  ;;  %9876 = vmatprep.mubr.f32.mxu1 %v15046_v48  ;;  %v8006_v63 = vld [vmem:[%s14821_s1 + $0x240] sm:$0xff]  ;;  %v8000_v48 = vld [vmem:[%s14821_s1 + $0x210] sm:$0xff] }
 0x5ae   :  { %9923 = vmatprep.subr.mxu1 %v8012_v59 }
 0x5af   :  { %9924 = vmatpush3.msra.mxu1 %v8012_v59  ;;  %v8002_v59 = vld [vmem:[%s14821_s1 + $0x220] sm:$0xff] }
 0x5b0   :  { %9877 = vmatmul.mubr.f32.gmra.mxu1 %v15047_v58  ;;  %9925 = vmatprep.subr.mxu1 %v8011_v61 }
 0x5b1   :  { %9879 = vmatprep.mubr.f32.mxu1 %v15048_v42  ;;  %9926 = vmatpush3.msra.mxu1 %v8011_v61  ;;  %v14110_v61 = vpop.f32.mrf.mxu1 }
 0x5b2   :  { %9927 = vmatprep.subr.mxu1 %v8010_v29 }
 0x5b3   :  { %9928 = vmatpush3.msra.mxu1 %v8010_v29  ;;  %v14120_v29 = vpop.f32.mrf.mxu1 }
 0x5b4   :  { %9880 = vmatmul.mubr.f32.gmra.mxu1 %v15049_v35  ;;  %9929 = vmatprep.subr.mxu1 %v8009_v15  ;;  %v15058_v35 = vld [vmem:[#allocation84_spill] sm:$0xff] }
 0x5b5   :  { %9882 = vmatprep.mubr.f32.mxu1 %v15050_v43  ;;  %9930 = vmatpush3.msra.mxu1 %v8009_v15  ;;  %v15055_v15 = vld [vmem:[#allocation26_spill] sm:$0xff]  ;;  %v5676_v43 = vpop.trf.xlu0 }
 0x5b6   :  { %9931 = vmatprep.subr.mxu1 %v8008_v1 }
 0x5b7   :  { %9932 = vmatpush3.msra.mxu1 %v8008_v1 }
 0x5b8   :  { %9883 = vmatmul.mubr.f32.gmra.mxu1 %v15051_v45  ;;  %9933 = vmatprep.subr.mxu1 %v8007_v36 }
 0x5b9   :  { %9885 = vmatprep.mubr.f32.mxu1 %v15052_v28  ;;  %9934 = vmatpush3.msra.mxu1 %v8007_v36  ;;  %v5708_v36 = vpop.trf.xlu1  ;;  %v15060_v28 = vld [vmem:[#allocation8_spill] sm:$0xff] }
 0x5ba   :  { %9935 = vmatprep.subr.mxu1 %v8006_v63 }
 0x5bb   :  { %9936 = vmatpush3.msra.mxu1 %v8006_v63 }
 0x5bc   :  { %9886 = vmatmul.mubr.f32.gmra.mxu1 %v15053_v57  ;;  %9937 = vmatprep.subr.mxu1 %v8005_v24 }
 0x5bd   :  { %9888 = vmatprep.mubr.f32.mxu1 %v13379_v40  ;;  %9938 = vmatpush3.msra.mxu1 %v8005_v24  ;;  %v8001_v40 = vld [vmem:[%s14821_s1 + $0x218] sm:$0xff] }
 0x5be   :  { %9939 = vmatprep.subr.mxu1 %v8004_v11 }
 0x5bf   :  { %9940 = vmatpush3.msra.mxu1 %v8004_v11  ;;  %v15061_v11 = vld [vmem:[#allocation3_spill] sm:$0xff] }
 0x5c0   :  { %9889 = vmatmul.mubr.f32.gmra.mxu1 %v13423_v20  ;;  %9941 = vmatprep.subr.mxu1 %v8003_v31  ;;  %v7999_v20 = vld [vmem:[%s14821_s1 + $0x208] sm:$0xff]  ;;  %v5962_v57 = vadd.f32 %v14000_v6, %v15061_v11  ;;  %v15064_v6 = vld [vmem:[#allocation29_spill] sm:$0xff]  ;;  %v8024_v11 = vld [vmem:[%s14821_s1 + $0x2d0] sm:$0xff] }
 0x5c1   :  { %9891 = vmatprep.mubr.f32.mxu1 %v13467_v51  ;;  %9942 = vmatpush3.msra.mxu1 %v8003_v31  ;;  %v7998_v51 = vld [vmem:[%s14821_s1 + $0x200] sm:$0xff] }
 0x5c2   :  { %9943 = vmatprep.subr.mxu1 %v8002_v59 }
 0x5c3   :  { %9944 = vmatpush3.msra.mxu1 %v8002_v59 }
 0x5c4   :  { %9892 = vmatmul.mubr.f32.gmra.mxu1 %v13511_v5  ;;  %9945 = vmatprep.subr.mxu1 %v8001_v40  ;;  %v8029_v5 = vld [vmem:[%s14821_s1 + $0x2f8] sm:$0xff] }
 0x5c5   :  { %9894 = vmatprep.mubr.f32.mxu1 %v13555_v23  ;;  %9946 = vmatpush3.msra.mxu1 %v8001_v40  ;;  %v14127_v23 = vpop.f32.mrf.mxu1  ;;  %v15063_v40 = vld [vmem:[#allocation34_spill] sm:$0xff] }
 0x5c6   :  { %9947 = vmatprep.subr.mxu1 %v8000_v48 }
 0x5c7   :  { %9948 = vmatpush3.msra.mxu1 %v8000_v48  ;;  %v14131_v58 = vpop.f32.mrf.mxu1  ;;  %v8027_v48 = vld [vmem:[%s14821_s1 + $0x2e8] sm:$0xff] }
 0x5c8   :  { %9895 = vmatmul.mubr.f32.gmra.mxu1 %v13596_v14  ;;  %9949 = vmatprep.subr.mxu1 %v7999_v20 }
 0x5c9   :  { %9897 = vmatprep.mubr.f32.mxu1 %v13629_v53  ;;  %9950 = vmatpush3.msra.mxu1 %v7999_v20  ;;  %v14135_v14 = vpop.f32.mrf.mxu1  ;;  %v15054_v53 = vld [vmem:[#allocation18_spill] sm:$0xff] }
 0x5ca   :  { %9951 = vmatprep.subr.mxu1 %v7998_v51 }
 0x5cb   :  { %9952 = vmatpush3.msra.mxu1 %v7998_v51  ;;  %v14139_v42 = vpop.f32.mrf.mxu1  ;;  %v5964_v51 = vadd.f32 %v14011_v13, %v15064_v6  ;;  %v10085_v13 = vmov 0  }
 0x5cc   :  { %9898 = vmatmul.mubr.f32.gmra.mxu1 %v13660_v7  ;;  %10001 = vmatprep.subr.mxu1 %v8029_v5  ;;  %v15056_v7 = vld [vmem:[#allocation48_spill] sm:$0xff] }
 0x5cd   :  { %9900 = vmatprep.mubr.f32.mxu1 %v13708_v47  ;;  %v14143_v1 = vpop.f32.mrf.mxu1  ;;  %v15057_v47 = vld [vmem:[#allocation62_spill] sm:$0xff]  ;;  %10084 = vset.pattern.permute.xlu0 %v10085_v13 }
 0x5d0   :  { %9901 = vmatmul.mubr.f32.gmra.mxu1 %v13780_v22  ;;  %v14147_v22 = vpop.f32.mrf.mxu1 }
 0x5d1   :  { %9903 = vmatprep.mubr.f32.mxu1 %v13816_v49  ;;  %v15059_v49 = vld [vmem:[#allocation92_spill] sm:$0xff] }
 0x5d4   :  { %9904 = vmatmul.mubr.f32.gmra.mxu1 %v13829_v32  ;;  %v14151_v32 = vpop.f32.mrf.mxu1 }
 0x5d5   :  { %9906 = vmatprep.mubr.f32.mxu1 %v15054_v53  ;;  %v8026_v53 = vld [vmem:[%s14821_s1 + $0x2e0] sm:$0xff] }
 0x5d6   :  { %v14154_v63 = vpop.f32.mrf.mxu1 }
 0x5d8   :  { %9907 = vmatmul.mubr.f32.gmra.mxu1 %v15055_v15 }
 0x5d9   :  { %9909 = vmatprep.mubr.f32.mxu1 %v15056_v7  ;;  %v15065_v7 = vld [vmem:[#allocation43_spill] sm:$0xff] }
 0x5dc   :  { %9910 = vmatmul.mubr.f32.gmra.mxu1 %v15057_v47  ;;  %v15066_v47 = vld [vmem:[#allocation73_spill] sm:$0xff] }
 0x5dd   :  { %9912 = vmatprep.mubr.f32.mxu1 %v15058_v35  ;;  %v8025_v35 = vld [vmem:[%s14821_s1 + $0x2d8] sm:$0xff] }
 0x5e0   :  { %9913 = vmatmul.mubr.f32.gmra.mxu1 %v15059_v49 }
 0x5e1   :  { %9915 = vmatprep.mubr.f32.mxu1 %v13841_v55  ;;  %v8028_v55 = vld [vmem:[%s14821_s1 + $0x2f0] sm:$0xff] }
 0x5e4   :  { %9916 = vmatmul.mubr.f32.gmra.mxu1 %v13853_v2  ;;  %v15062_v2 = vld [vmem:[#allocation14_spill] sm:$0xff] }
 0x5e5   :  { %9918 = vmatprep.mubr.f32.mxu1 %v5676_v43  ;;  %v7363_v43 = vld [vmem:[%s14822_s3] sm:$0xff] }
 0x5e6   :  { %7366 = vperm.xlu0 %10084, %v7363_v43  }
 0x5e8   :  { %v14156_v45 = vpop.f32.mrf.mxu1  ;;  %9919 = vmatmul.mubr.f32.gmra.mxu1 %v5708_v36  ;;  %v15067_v36 = vld [vmem:[#allocation67_spill] sm:$0xff] }
 0x5e9   :  { %9953 = vmatprep.mubr.f32.mxu1 %v15060_v28  ;;  %v5966_v28 = vadd.f32 %v14017_v37, %v15067_v36  ;;  %v8020_v36 = vld [vmem:[%s14821_s1 + $0x2b0] sm:$0xff] }
 0x5ea   :  { %v14159_v24 = vpop.f32.mrf.mxu1 }
 0x5ec   :  { %v9715_v31 = vpop.f32.mrf.mxu1  ;;  %9954 = vmatmul.mubr.f32.vlgmr.msra.gmra.mxu1 %v15062_v2  ;;  %v15069_v2 = vld [vmem:[#allocation98_spill] sm:$0xff] }
 0x5ed   :  { %v14167_v59 = vadd.f32 %v9715_v31, %v5962_v57  ;;  %10002 = vmatpush3.msra.mxu1 %v8029_v5  ;;  %9956 = vmatprep.mubr.f32.mxu1 %v15063_v40  ;;  %v8023_v40 = vld [vmem:[%s14821_s1 + $0x2c8] sm:$0xff] }
 0x5ee   :  { %v14173_v20 = vpop.f32.mrf.mxu1  ;;  %10003 = vmatprep.subr.mxu1 %v8028_v55 }
 0x5ef   :  { %10004 = vmatpush3.msra.mxu1 %v8028_v55  ;;  %v15068_v55 = vld [vmem:[#allocation80_spill] sm:$0xff] }
 0x5f0   :  { %v9718_v15 = vpop.f32.mrf.mxu1  ;;  %9957 = vmatmul.mubr.f32.gmra.mxu1 %v15065_v7  ;;  %10005 = vmatprep.subr.mxu1 %v8027_v48 }
 0x5f1   :  { %v14181_v5 = vadd.f32 %v9718_v15, %v5964_v51  ;;  %9959 = vmatprep.mubr.f32.mxu1 %v15066_v47  ;;  %10006 = vmatpush3.msra.mxu1 %v8027_v48  ;;  %v15070_v48 = vld [vmem:[#allocation59_spill] sm:$0xff]  ;;  %v8022_v51 = vld [vmem:[%s14821_s1 + $0x2c0] sm:$0xff]  ;;  %v15071_v15 = vld [vmem:[#allocation104_spill] sm:$0xff] }
 0x5f2   :  { %v14187_v49 = vpop.f32.mrf.mxu1  ;;  %10007 = vmatprep.subr.mxu1 %v8026_v53  ;;  %v5968_v6 = vadd.f32 %v14025_v62, %v15070_v48  ;;  %v15072_v47 = vld [vmem:[#allocation109_spill] sm:$0xff]  ;;  %v15073_v62 = vld [vmem:[#allocation70_spill] sm:$0xff] }
 0x5f3   :  { %10008 = vmatpush3.msra.mxu1 %v8026_v53  ;;  %v5970_v43 = vadd.f32 %v14031_v30, %v15073_v62  ;;  %v15075_v30 = vld [vmem:[#allocation91_spill] sm:$0xff]  ;;  %v8018_v48 = vld [vmem:[%s14821_s1 + $0x2a0] sm:$0xff]  ;;  %v15078_v62 = vld [vmem:[#allocation113_spill] sm:$0xff] }
 0x5f4   :  { %v9721_v57 = vpop.f32.mrf.mxu1  ;;  %9960 = vmatmul.mubr.f32.gmra.mxu1 %v15068_v55  ;;  %10009 = vmatprep.subr.mxu1 %v8025_v35  ;;  %v8019_v55 = vld [vmem:[%s14821_s1 + $0x2a8] sm:$0xff] }
 0x5f5   :  { %v14198_v31 = vadd.f32 %v9721_v57, %v5966_v28  ;;  %9962 = vmatprep.mubr.f32.mxu1 %v15069_v2  ;;  %10010 = vmatpush3.msra.mxu1 %v8025_v35  ;;  %v8021_v35 = vld [vmem:[%s14821_s1 + $0x2b8] sm:$0xff] }
 0x5f6   :  { %v14204_v37 = vpop.f32.mrf.mxu1  ;;  %10011 = vmatprep.subr.mxu1 %v8024_v11 }
 0x5f7   :  { %10012 = vmatpush3.msra.mxu1 %v8024_v11  ;;  %v15074_v11 = vld [vmem:[#allocation88_spill] sm:$0xff] }
 0x5f8   :  { %v9724_v53 = vpop.f32.mrf.mxu1  ;;  %9963 = vmatmul.mubr.f32.gmra.mxu1 %v15071_v15  ;;  %10013 = vmatprep.subr.mxu1 %v8023_v40 }
 0x5f9   :  { %v14212_v7 = vadd.f32 %v9724_v53, %v5968_v6  ;;  %9965 = vmatprep.mubr.f32.mxu1 %v15072_v47  ;;  %10014 = vmatpush3.msra.mxu1 %v8023_v40  ;;  %v5972_v40 = vadd.f32 %v14038_v21, %v15075_v30  ;;  %v15076_v21 = vld [vmem:[#allocation57_spill] sm:$0xff]  ;;  %v15080_v30 = vld [vmem:[#allocation116_spill] sm:$0xff] }
 0x5fa   :  { %v14218_v13 = vpop.f32.mrf.mxu1  ;;  %10015 = vmatprep.subr.mxu1 %v8022_v51  ;;  %v5974_v15 = vadd.f32 %v14046_v56, %v15076_v21  ;;  %v15079_v56 = vld [vmem:[#allocation112_spill] sm:$0xff] }
 0x5fb   :  { %10016 = vmatpush3.msra.mxu1 %v8022_v51  ;;  %v8017_v51 = vld [vmem:[%s14821_s1 + $0x298] sm:$0xff] }
 0x5fc   :  { %v9727_v28 = vpop.f32.mrf.mxu1  ;;  %9966 = vmatmul.mubr.f32.gmra.mxu1 %v15074_v11  ;;  %10017 = vmatprep.subr.mxu1 %v8021_v35  ;;  %v8014_v11 = vld [vmem:[%s14821_s1 + $0x280] sm:$0xff] }
 0x5fd   :  { %v14226_v57 = vadd.f32 %v9727_v28, %v5970_v43  ;;  %9968 = vmatprep.mubr.f32.mxu1 %v13389_v39  ;;  %10018 = vmatpush3.msra.mxu1 %v8021_v35  ;;  %v15077_v35 = vld [vmem:[#allocation106_spill] sm:$0xff]  ;;  %v8015_v43 = vld [vmem:[%s14821_s1 + $0x288] sm:$0xff]  ;;  %v5976_v28 = vadd.f32 %v14063_v16, %v15079_v56  ;;  %v5982_v56 = vadd.f32 %v14110_v61, %v13795_v9  ;;  %v15088_v61 = vld [vmem:[#allocation49_spill] sm:$0xff] }
 0x5fe   :  { %v14232_v2 = vpop.f32.mrf.mxu1  ;;  %10019 = vmatprep.subr.mxu1 %v8020_v36 }
 0x5ff   :  { %10020 = vmatpush3.msra.mxu1 %v8020_v36 }
 0x600   :  { %v9730_v6 = vpop.f32.mrf.mxu1  ;;  %9969 = vmatmul.mubr.f32.gmra.mxu1 %v13433_v60  ;;  %10021 = vmatprep.subr.mxu1 %v8019_v55  ;;  %v8016_v60 = vld [vmem:[%s14821_s1 + $0x290] sm:$0xff] }
 0x601   :  { %v14240_v39 = vadd.f32 %v9730_v6, %v5972_v40  ;;  %9971 = vmatprep.mubr.f32.mxu1 %v13477_v18  ;;  %10022 = vmatpush3.msra.mxu1 %v8019_v55 }
 0x602   :  { %v14246_v53 = vpop.f32.mrf.mxu1  ;;  %10023 = vmatprep.subr.mxu1 %v8018_v48 }
 0x603   :  { %10024 = vmatpush3.msra.mxu1 %v8018_v48  ;;  %v15081_v48 = vld [vmem:[#allocation119_spill] sm:$0xff] }
 0x604   :  { %v9733_v47 = vpop.f32.mrf.mxu1  ;;  %9972 = vmatmul.mubr.f32.gmra.mxu1 %v15077_v35  ;;  %10025 = vmatprep.subr.mxu1 %v8017_v51  ;;  %v5980_v35 = vadd.f32 %v14095_v41, %v13680_v10  ;;  %v15085_v41 = vld [vmem:[#allocation19_spill] sm:$0xff] }
 0x605   :  { %v14254_v18 = vadd.f32 %v9733_v47, %v5974_v15  ;;  %9974 = vmatprep.mubr.f32.mxu1 %v15078_v62  ;;  %10026 = vmatpush3.msra.mxu1 %v8017_v51  ;;  %v15082_v51 = vld [vmem:[#allocation118_spill] sm:$0xff] }
 0x606   :  { %v14260_v36 = vpop.f32.mrf.mxu1  ;;  %10027 = vmatprep.subr.mxu1 %v8016_v60  ;;  %v5978_v16 = vadd.f32 %v14078_v8, %v15082_v51  ;;  %v15083_v15 = vld [vmem:[#allocation122_spill] sm:$0xff] }
 0x607   :  { %10028 = vmatpush3.msra.mxu1 %v8016_v60 }
 0x608   :  { %v9736_v55 = vpop.f32.mrf.mxu1  ;;  %9975 = vmatmul.mubr.f32.gmra.mxu1 %v15080_v30  ;;  %10029 = vmatprep.subr.mxu1 %v8015_v43  ;;  %v15086_v30 = vld [vmem:[#allocation27_spill] sm:$0xff] }
 0x609   :  { %v14268_v40 = vadd.f32 %v9736_v55, %v5976_v28  ;;  %9977 = vmatprep.mubr.f32.mxu1 %v15081_v48  ;;  %10030 = vmatpush3.msra.mxu1 %v8015_v43  ;;  %v15087_v48 = vld [vmem:[#allocation50_spill] sm:$0xff] }
 0x60a   :  { %v14271_v6 = vpop.f32.mrf.mxu1  ;;  %10031 = vmatprep.subr.mxu1 %v8014_v11 }
 0x60b   :  { %10032 = vmatpush3.msra.mxu1 %v8014_v11  ;;  %v15084_v11 = vld [vmem:[#allocation20_spill] sm:$0xff] }
 0x60c   :  { %v9739_v21 = vpop.f32.mrf.mxu1  ;;  %9978 = vmatmul.mubr.f32.gmra.mxu1 %v15083_v15  ;;  %v15090_v15 = vld [vmem:[#allocation37_spill] sm:$0xff] }
 0x60d   :  { %v14276_v60 = vadd.f32 %v9739_v21, %v5978_v16  ;;  %9980 = vmatprep.mubr.f32.mxu1 %v13727_v26  ;;  %v15089_v16 = vld [vmem:[#allocation64_spill] sm:$0xff] }
 0x60e   :  { %v14279_v47 = vpop.f32.mrf.mxu1 }
 0x610   :  { %v9742_v62 = vpop.f32.mrf.mxu1  ;;  %9981 = vmatmul.mubr.f32.gmra.mxu1 %v13786_v34  ;;  %v5984_v34 = vadd.f32 %v14127_v23, %v15085_v41  ;;  %v5677_v41 = vpop.trf.xlu0 }
 0x611   :  { %v14284_v43 = vadd.f32 %v9742_v62, %v5980_v35  ;;  %9983 = vmatprep.mubr.f32.mxu1 %v13819_v12  ;;  %v15091_v35 = vld [vmem:[#allocation86_spill] sm:$0xff] }
 0x612   :  { %v14287_v8 = vpop.f32.mrf.mxu1  ;;  %v5988_v62 = vadd.f32 %v14143_v1, %v15091_v35  ;;  %v5709_v1 = vpop.trf.xlu1 }
 0x614   :  { %v9745_v28 = vpop.f32.mrf.mxu1  ;;  %9984 = vmatmul.mubr.f32.gmra.mxu1 %v13831_v54  ;;  %v5986_v54 = vadd.f32 %v14135_v14, %v15088_v61  ;;  %v15093_v61 = vld [vmem:[#allocation127_spill] sm:$0xff] }
 0x615   :  { %v14292_v26 = vadd.f32 %v9745_v28, %v5982_v56  ;;  %9986 = vmatprep.mubr.f32.mxu1 %v15084_v11  ;;  %v15092_v28 = vld [vmem:[#allocation55_spill] sm:$0xff] }
 0x616   :  { %v14295_v10 = vpop.f32.mrf.mxu1 }
 0x618   :  { %v9748_v55 = vpop.f32.mrf.mxu1  ;;  %9987 = vmatmul.mubr.f32.gmra.mxu1 %v15086_v30 }
 0x619   :  { %v14300_v12 = vadd.f32 %v9748_v55, %v5984_v34  ;;  %9989 = vmatprep.mubr.f32.mxu1 %v15087_v48  ;;  %v5990_v34 = vadd.f32 %v14151_v32, %v13835_v38  ;;  %v15095_v38 = vld [vmem:[#allocation10_spill] sm:$0xff] }
 0x61a   :  { %v14303_v9 = vpop.f32.mrf.mxu1 }
 0x61c   :  { %v9751_v51 = vpop.f32.mrf.mxu1  ;;  %9990 = vmatmul.mubr.f32.gmra.mxu1 %v15089_v16 }
 0x61d   :  { %v14308_v21 = vadd.f32 %v9751_v51, %v5986_v54  ;;  %9992 = vmatprep.mubr.f32.mxu1 %v15090_v15  ;;  %v5992_v54 = vadd.f32 %v14156_v45, %v15093_v61 }
 0x61e   :  { %v14311_v23 = vpop.f32.mrf.mxu1 }
 0x620   :  { %v9754_v56 = vpop.f32.mrf.mxu1  ;;  %9993 = vmatmul.mubr.f32.gmra.mxu1 %v15092_v28  ;;  %v15097_v28 = vld [vmem:[#allocation16_spill] sm:$0xff] }
 0x621   :  { %v14316_v11 = vadd.f32 %v9754_v56, %v5988_v62  ;;  %9995 = vmatprep.mubr.f32.mxu1 %v13843_v19  ;;  %v15094_v19 = vld [vmem:[#allocation79_spill] sm:$0xff] }
 0x622   :  { %v14319_v14 = vpop.f32.mrf.mxu1  ;;  %v5991_v16 = vadd.f32 %v14159_v24, %v15094_v19 }
 0x624   :  { %v9757_v55 = vpop.f32.mrf.mxu1  ;;  %9996 = vmatmul.mubr.f32.gmra.mxu1 %v13855_v4  ;;  %v15096_v4 = vld [vmem:[#allocation2_spill] sm:$0xff] }
 0x625   :  { %v14324_v30 = vadd.f32 %v9757_v55, %v5990_v34  ;;  %9998 = vmatprep.mubr.f32.mxu1 %v5677_v41  ;;  %v5961_v35 = vadd.f32 %v14007_v33, %v15096_v4  ;;  %v15098_v34 = vld [vmem:[#allocation36_spill] sm:$0xff]  ;;  %v15099_v55 = vld [vmem:[#allocation23_spill] sm:$0xff]  ;;  %v15100_v33 = vld [vmem:[#allocation45_spill] sm:$0xff] }
 0x626   :  { %v14326_v48 = vpop.f32.mrf.mxu1 }
 0x627   :  { %v6235_v45 = vadd.f32 %v14173_v20, %v5961_v35  ;;  %v15101_v20 = vld [vmem:[#allocation75_spill] sm:$0xff] }
 0x628   :  { %v9760_v51 = vpop.f32.mrf.mxu1  ;;  %9999 = vmatmul.mubr.f32.gmra.mxu1 %v5709_v1  ;;  %v5963_v1 = vadd.f32 %v14015_v27, %v15099_v55  ;;  %v15103_v27 = vld [vmem:[#allocation82_spill] sm:$0xff] }
 0x629   :  { %v14332_v15 = vadd.f32 %v9760_v51, %v5992_v54  ;;  %10033 = vmatprep.mubr.f32.mxu1 %v15095_v38 }
 0x62a   :  { %v6226_v32 = vpop.f32.mrf.mxu1  ;;  %v6237_v51 = vadd.f32 %v14187_v49, %v5963_v1  ;;  %v15104_v49 = vld [vmem:[#allocation99_spill] sm:$0xff] }
 0x62b   :  { %v14337_v62 = vadd.f32 %v6226_v32, %v5991_v16  ;;  %v15102_v16 = vld [vmem:[#allocation56_spill] sm:$0xff] }
 0x62c   :  { %v9795_v56 = vpop.f32.mrf.mxu1  ;;  %10034 = vmatmul.mubr.f32.vlgmr.msra.gmra.mxu1 %v15097_v28  ;;  %v5965_v38 = vadd.f32 %v14021_v52, %v15102_v16  ;;  %v15105_v28 = vld [vmem:[#allocation40_spill] sm:$0xff]  ;;  %v15106_v52 = vld [vmem:[#allocation105_spill] sm:$0xff] }
 0x62d   :  { %v14342_v41 = vadd.f32 %v9795_v56, %v14167_v59  ;;  %10036 = vmatprep.mubr.f32.mxu1 %v15098_v34 }
 0x62e   :  { %v6350_v24 = vpop.f32.mrf.mxu1  ;;  %v6239_v35 = vadd.f32 %v14204_v37, %v5965_v38  ;;  %v15107_v37 = vld [vmem:[#allocation110_spill] sm:$0xff] }
 0x62f   :  { %v14347_v61 = vadd.f32 %v6350_v24, %v6235_v45  ;;  %v5967_v45 = vadd.f32 %v14029_v3, %v15105_v28  ;;  %v15109_v3 = vld [vmem:[#allocation89_spill] sm:$0xff]  ;;  %v15111_v38 = vld [vmem:[#allocation78_spill] sm:$0xff]  ;;  %v15114_v28 = vld [vmem:[#allocation52_spill] sm:$0xff] }
 0x630   :  { %v9798_v54 = vpop.f32.mrf.mxu1  ;;  %10037 = vmatmul.mubr.f32.gmra.mxu1 %v15100_v33 }
 0x631   :  { %v14352_v19 = vadd.f32 %v9798_v54, %v14181_v5  ;;  %10039 = vmatprep.mubr.f32.mxu1 %v15101_v20  ;;  %v6241_v55 = vadd.f32 %v14218_v13, %v5967_v45  ;;  %v15108_v54 = vld [vmem:[#allocation100_spill] sm:$0xff]  ;;  %v15110_v13 = vld [vmem:[#allocation94_spill] sm:$0xff]  ;;  %v5973_v45 = vadd.f32 %v14056_v50, %v15114_v28  ;;  %v15118_v50 = vld [vmem:[#allocation117_spill] sm:$0xff] }
 0x632   :  { %v6360_v59 = vpop.f32.mrf.mxu1  ;;  %v5969_v33 = vadd.f32 %v14035_v0, %v15108_v54  ;;  %v15112_v0 = vld [vmem:[#allocation93_spill] sm:$0xff] }
 0x633   :  { %v14357_v32 = vadd.f32 %v6360_v59, %v6237_v51 }
 0x634   :  { %v9801_v4 = vpop.f32.mrf.mxu1  ;;  %10040 = vmatmul.mubr.f32.gmra.mxu1 %v15103_v27  ;;  %v6243_v59 = vadd.f32 %v14232_v2, %v5969_v33  ;;  %v15113_v2 = vld [vmem:[#allocation95_spill] sm:$0xff] }
 0x635   :  { %v14362_v56 = vadd.f32 %v9801_v4, %v14198_v31  ;;  %10042 = vmatprep.mubr.f32.mxu1 %v15104_v49  ;;  %v5971_v4 = vadd.f32 %v14041_v44, %v15111_v38  ;;  %v15115_v44 = vld [vmem:[#allocation111_spill] sm:$0xff] }
 0x636   :  { %v6370_v5 = vpop.f32.mrf.mxu1 }
 0x637   :  { %v14367_v34 = vadd.f32 %v6370_v5, %v6239_v35  ;;  %v6245_v49 = vadd.f32 %v14246_v53, %v5971_v4  ;;  %v15116_v53 = vld [vmem:[#allocation114_spill] sm:$0xff] }
 0x638   :  { %v9804_v24 = vpop.f32.mrf.mxu1  ;;  %10043 = vmatmul.mubr.f32.gmra.mxu1 %v15106_v52 }
 0x639   :  { %v14372_v1 = vadd.f32 %v9804_v24, %v14212_v7  ;;  %10045 = vmatprep.mubr.f32.mxu1 %v15107_v37 }
 0x63a   :  { %v6380_v31 = vpop.f32.mrf.mxu1 }
 0x63b   :  { %v14377_v51 = vadd.f32 %v6380_v31, %v6241_v55  ;;  %v6247_v55 = vadd.f32 %v14260_v36, %v5973_v45  ;;  %v15117_v31 = vld [vmem:[#allocation60_spill] sm:$0xff] }
 0x63c   :  { %v9807_v20 = vpop.f32.mrf.mxu1  ;;  %10046 = vmatmul.mubr.f32.gmra.mxu1 %v15109_v3  ;;  %v5975_v54 = vadd.f32 %v14073_v46, %v15117_v31  ;;  %v15119_v36 = vld [vmem:[#allocation120_spill] sm:$0xff]  ;;  %v15121_v46 = vld [vmem:[#allocation123_spill] sm:$0xff] }
 0x63d   :  { %v14382_v16 = vadd.f32 %v9807_v20, %v14226_v57  ;;  %10048 = vmatprep.mubr.f32.mxu1 %v15110_v13  ;;  %v15120_v13 = vld [vmem:[#allocation115_spill] sm:$0xff] }
 0x63e   :  { %v6390_v7 = vpop.f32.mrf.mxu1  ;;  %v6249_v3 = vadd.f32 %v14271_v6, %v5975_v54  ;;  %v15122_v6 = vld [vmem:[#allocation124_spill] sm:$0xff] }
 0x63f   :  { %v14387_v27 = vadd.f32 %v6390_v7, %v6243_v59  ;;  %v5977_v7 = vadd.f32 %v14088_v17, %v15120_v13  ;;  %v15124_v17 = vld [vmem:[#allocation126_spill] sm:$0xff] }
 0x640   :  { %v9810_v35 = vpop.f32.mrf.mxu1  ;;  %10049 = vmatmul.mubr.f32.gmra.mxu1 %v15112_v0 }
 0x641   :  { %v14392_v5 = vadd.f32 %v9810_v35, %v14240_v39  ;;  %10051 = vmatprep.mubr.f32.mxu1 %v15113_v2  ;;  %v6251_v35 = vadd.f32 %v14279_v47, %v5977_v7  ;;  %v15125_v47 = vld [vmem:[#allocation13_spill] sm:$0xff]  ;;  %v15132_v7 = vld [vmem:[#allocation39_spill] sm:$0xff] }
 0x642   :  { %v6400_v57 = vpop.f32.mrf.mxu1 }
 0x643   :  { %v14397_v24 = vadd.f32 %v6400_v57, %v6245_v49  ;;  %v15123_v49 = vld [vmem:[#allocation121_spill] sm:$0xff] }
 0x644   :  { %v9813_v52 = vpop.f32.mrf.mxu1  ;;  %10052 = vmatmul.mubr.f32.gmra.mxu1 %v15115_v44  ;;  %v5979_v2 = vadd.f32 %v14105_v25, %v15123_v49  ;;  %v15126_v44 = vld [vmem:[#allocation125_spill] sm:$0xff]  ;;  %v15127_v25 = vld [vmem:[#allocation42_spill] sm:$0xff] }
 0x645   :  { %v14402_v37 = vadd.f32 %v9813_v52, %v14254_v18  ;;  %10054 = vmatprep.mubr.f32.mxu1 %v15116_v53  ;;  %v15135_v49 = vld [vmem:[#allocation77_spill] sm:$0xff] }
 0x646   :  { %v6410_v39 = vpop.f32.mrf.mxu1  ;;  %v6253_v45 = vadd.f32 %v14287_v8, %v5979_v2  ;;  %v15128_v8 = vld [vmem:[#allocation22_spill] sm:$0xff]  ;;  %v5987_v2 = vadd.f32 %v14147_v22, %v15135_v49 }
 0x647   :  { %v14407_v33 = vadd.f32 %v6410_v39, %v6247_v55  ;;  %v5981_v55 = vadd.f32 %v14120_v29, %v15126_v44  ;;  %v15130_v29 = vld [vmem:[#allocation28_spill] sm:$0xff]  ;;  %v15138_v44 = vld [vmem:[#allocation21_spill] sm:$0xff] }
 0x648   :  { %v9816_v20 = vpop.f32.mrf.mxu1  ;;  %10055 = vmatmul.mubr.f32.gmra.mxu1 %v15118_v50 }
 0x649   :  { %v14412_v59 = vadd.f32 %v9816_v20, %v14268_v40  ;;  %10057 = vmatprep.mubr.f32.mxu1 %v15119_v36  ;;  %v6255_v31 = vadd.f32 %v14295_v10, %v5981_v55  ;;  %v15129_v20 = vld [vmem:[#allocation12_spill] sm:$0xff]  ;;  %v15131_v10 = vld [vmem:[#allocation54_spill] sm:$0xff]  ;;  %v5989_v55 = vadd.f32 %v14154_v63, %v15138_v44 }
 0x64a   :  { %v6420_v18 = vpop.f32.mrf.mxu1  ;;  %v5983_v50 = vadd.f32 %v14131_v58, %v15129_v20  ;;  %v15133_v58 = vld [vmem:[#allocation66_spill] sm:$0xff] }
 0x64b   :  { %v14417_v38 = vadd.f32 %v6420_v18, %v6249_v3 }
 0x64c   :  { %v9819_v4 = vpop.f32.mrf.mxu1  ;;  %10058 = vmatmul.mubr.f32.gmra.mxu1 %v15121_v46  ;;  %v6257_v18 = vadd.f32 %v14303_v9, %v5983_v50  ;;  %v15134_v9 = vld [vmem:[#allocation87_spill] sm:$0xff] }
 0x64d   :  { %v14422_v0 = vadd.f32 %v9819_v4, %v14276_v60  ;;  %10060 = vmatprep.mubr.f32.mxu1 %v15122_v6  ;;  %v5985_v4 = vadd.f32 %v14139_v42, %v15132_v7  ;;  %v15136_v42 = vld [vmem:[#allocation63_spill] sm:$0xff] }
 0x64e   :  { %v6430_v40 = vpop.f32.mrf.mxu1 }
 0x64f   :  { %v14427_v57 = vadd.f32 %v6430_v40, %v6251_v35  ;;  %v6259_v6 = vadd.f32 %v14311_v23, %v5985_v4  ;;  %v15137_v23 = vld [vmem:[#allocation53_spill] sm:$0xff] }
 0x650   :  { %v9822_v28 = vpop.f32.mrf.mxu1  ;;  %10061 = vmatmul.mubr.f32.gmra.mxu1 %v15124_v17 }
 0x651   :  { %v14432_v52 = vadd.f32 %v9822_v28, %v14284_v43  ;;  %10063 = vmatprep.mubr.f32.mxu1 %v15125_v47 }
 0x652   :  { %v6440_v60 = vpop.f32.mrf.mxu1 }
 0x653   :  { %v14437_v53 = vadd.f32 %v6440_v60, %v6253_v45  ;;  %v6261_v45 = vadd.f32 %v14319_v14, %v5987_v2  ;;  %v5678_v60 = vpop.trf.xlu0 }
 0x654   :  { %v9825_v39 = vpop.f32.mrf.mxu1  ;;  %10064 = vmatmul.mubr.f32.gmra.mxu1 %v15127_v25  ;;  %v15139_v25 = vld [vmem:[#allocation41_spill] sm:$0xff] }
 0x655   :  { %v14442_v54 = vadd.f32 %v9825_v39, %v14292_v26  ;;  %10066 = vmatprep.mubr.f32.mxu1 %v15128_v8 }
 0x656   :  { %v6450_v43 = vpop.f32.mrf.mxu1 }
 0x657   :  { %v14447_v3 = vadd.f32 %v6450_v43, %v6255_v31  ;;  %v6263_v31 = vadd.f32 %v14326_v48, %v5989_v55 }
 0x658   :  { %v9828_v36 = vpop.f32.mrf.mxu1  ;;  %10067 = vmatmul.mubr.f32.gmra.mxu1 %v15130_v29 }
 0x659   :  { %v14452_v13 = vadd.f32 %v9828_v36, %v14300_v12  ;;  %10069 = vmatprep.mubr.f32.mxu1 %v15131_v10 }
 0x65a   :  { %v6460_v26 = vpop.f32.mrf.mxu1 }
 0x65b   :  { %v14457_v46 = vadd.f32 %v6460_v26, %v6257_v18 }
 0x65c   :  { %v9831_v35 = vpop.f32.mrf.mxu1  ;;  %10070 = vmatmul.mubr.f32.gmra.mxu1 %v15133_v58 }
 0x65d   :  { %v14462_v40 = vadd.f32 %v9831_v35, %v14308_v21  ;;  %10072 = vmatprep.mubr.f32.mxu1 %v15134_v9 }
 0x65e   :  { %v6470_v12 = vpop.f32.mrf.mxu1 }
 0x65f   :  { %v14467_v28 = vadd.f32 %v6470_v12, %v6259_v6 }
 0x660   :  { %v9834_v17 = vpop.f32.mrf.mxu1  ;;  %10073 = vmatmul.mubr.f32.gmra.mxu1 %v15136_v42 }
 0x661   :  { %v14472_v47 = vadd.f32 %v9834_v17, %v14316_v11  ;;  %10075 = vmatprep.mubr.f32.mxu1 %v15137_v23  ;;  %v5710_v11 = vpop.trf.xlu1 }
 0x662   :  { %v6480_v21 = vpop.f32.mrf.mxu1 }
 0x663   :  { %v14477_v39 = vadd.f32 %v6480_v21, %v6261_v45 }
 0x664   :  { %v9837_v22 = vpop.f32.mrf.mxu1  ;;  %10076 = vmatmul.mubr.f32.gmra.mxu1 %v15139_v25 }
 0x665   :  { %v14482_v8 = vadd.f32 %v9837_v22, %v14324_v30  ;;  %10078 = vmatprep.mubr.f32.mxu1 %v5678_v60 }
 0x666   :  { %v6490_v14 = vpop.f32.mrf.mxu1 }
 0x667   :  { %v14484_v43 = vadd.f32 %v6490_v14, %v6263_v31 }
 0x668   :  { %v9840_v20 = vpop.f32.mrf.mxu1  ;;  %10079 = vmatmul.mubr.f32.gmra.mxu1 %v5710_v11 }
 0x669   :  { %v14487_v50 = vadd.f32 %v9840_v20, %v14332_v15 }
 0x66a   :  { %v6500_v63 = vpop.f32.mrf.mxu1 }
 0x66b   :  { %v14490_v36 = vadd.f32 %v6500_v63, %v14337_v62 }
 0x66c   :  { %v9875_v29 = vpop.f32.mrf.mxu1 }
 0x66d   :  { %v14493_v48 = vadd.f32 %v9875_v29, %v14342_v41 }
 0x66e   :  { %v6624_v30 = vpop.f32.mrf.mxu1 }
 0x66f   :  { %v14496_v18 = vadd.f32 %v6624_v30, %v14347_v61 }
 0x670   :  { %v9878_v10 = vpop.f32.mrf.mxu1 }
 0x671   :  { %v14499_v26 = vadd.f32 %v9878_v10, %v14352_v19 }
 0x672   :  { %v6634_v7 = vpop.f32.mrf.mxu1 }
 0x673   :  { %v14502_v15 = vadd.f32 %v6634_v7, %v14357_v32 }
 0x674   :  { %v9881_v4 = vpop.f32.mrf.mxu1 }
 0x675   :  { %v14505_v62 = vadd.f32 %v9881_v4, %v14362_v56 }
 0x676   :  { %v6644_v35 = vpop.f32.mrf.mxu1 }
 0x677   :  { %v14508_v41 = vadd.f32 %v6644_v35, %v14367_v34 }
 0x678   :  { %v9884_v58 = vpop.f32.mrf.mxu1 }
 0x679   :  { %v14511_v61 = vadd.f32 %v9884_v58, %v14372_v1 }
 0x67a   :  { %v6654_v6 = vpop.f32.mrf.mxu1 }
 0x67b   :  { %v14514_v19 = vadd.f32 %v6654_v6, %v14377_v51 }
 0x67c   :  { %v9887_v9 = vpop.f32.mrf.mxu1 }
 0x67d   :  { %v14517_v32 = vadd.f32 %v9887_v9, %v14382_v16 }
 0x67e   :  { %v6664_v12 = vpop.f32.mrf.mxu1 }
 0x67f   :  { %v14520_v56 = vadd.f32 %v6664_v12, %v14387_v27 }
 0x680   :  { %v9890_v49 = vpop.f32.mrf.mxu1 }
 0x681   :  { %v14523_v34 = vadd.f32 %v9890_v49, %v14392_v5 }
 0x682   :  { %v6674_v2 = vpop.f32.mrf.mxu1 }
 0x683   :  { %v14526_v1 = vadd.f32 %v6674_v2, %v14397_v24 }
 0x684   :  { %v9893_v17 = vpop.f32.mrf.mxu1 }
 0x685   :  { %v14529_v51 = vadd.f32 %v9893_v17, %v14402_v37 }
 0x686   :  { %v6684_v42 = vpop.f32.mrf.mxu1 }
 0x687   :  { %v14532_v16 = vadd.f32 %v6684_v42, %v14407_v33 }
 0x688   :  { %v9896_v45 = vpop.f32.mrf.mxu1 }
 0x689   :  { %v14535_v27 = vadd.f32 %v9896_v45, %v14412_v59 }
 0x68a   :  { %v6694_v23 = vpop.f32.mrf.mxu1 }
 0x68b   :  { %v14538_v5 = vadd.f32 %v6694_v23, %v14417_v38 }
 0x68c   :  { %v9899_v21 = vpop.f32.mrf.mxu1 }
 0x68d   :  { %v14541_v24 = vadd.f32 %v9899_v21, %v14422_v0 }
 0x68e   :  { %v6704_v60 = vpop.f32.mrf.mxu1 }
 0x68f   :  { %v14544_v37 = vadd.f32 %v6704_v60, %v14427_v57 }
 0x690   :  { %v9902_v44 = vpop.f32.mrf.mxu1 }
 0x691   :  { %v14547_v33 = vadd.f32 %v9902_v44, %v14432_v52 }
 0x692   :  { %v6714_v55 = vpop.f32.mrf.mxu1 }
 0x693   :  { %v14550_v59 = vadd.f32 %v6714_v55, %v14437_v53 }
 0x694   :  { %v9905_v22 = vpop.f32.mrf.mxu1 }
 0x695   :  { %v14553_v38 = vadd.f32 %v9905_v22, %v14442_v54 }
 0x696   :  { %v6724_v25 = vpop.f32.mrf.mxu1 }
 0x697   :  { %v14556_v0 = vadd.f32 %v6724_v25, %v14447_v3 }
 0x698   :  { %v9908_v31 = vpop.f32.mrf.mxu1 }
 0x699   :  { %v14559_v57 = vadd.f32 %v9908_v31, %v14452_v13 }
 0x69a   :  { %v6734_v11 = vpop.f32.mrf.mxu1 }
 0x69b   :  { %v14562_v52 = vadd.f32 %v6734_v11, %v14457_v46 }
 0x69c   :  { %v9911_v14 = vpop.f32.mrf.mxu1 }
 0x69d   :  { %v14565_v53 = vadd.f32 %v9911_v14, %v14462_v40 }
 0x69e   :  { %v6744_v20 = vpop.f32.mrf.mxu1 }
 0x69f   :  { %v14568_v54 = vadd.f32 %v6744_v20, %v14467_v28 }
 0x6a0   :  { %v9914_v63 = vpop.f32.mrf.mxu1 }
 0x6a1   :  { %v14571_v3 = vadd.f32 %v9914_v63, %v14472_v47 }
 0x6a2   :  { %v6754_v29 = vpop.f32.mrf.mxu1 }
 0x6a3   :  { %15140 = vst [vmem:[#allocation4_spill] sm:$0xff] %v14571_v3  ;;  %v14574_v13 = vadd.f32 %v6754_v29, %v14477_v39 }
 0x6a4   :  { %v9917_v30 = vpop.f32.mrf.mxu1 }
 0x6a5   :  { %15141 = vst [vmem:[#allocation6_spill] sm:$0xff] %v14574_v13  ;;  %v14577_v46 = vadd.f32 %v9917_v30, %v14482_v8 }
 0x6a6   :  { %v6764_v10 = vpop.f32.mrf.mxu1 }
 0x6a7   :  { %15142 = vst [vmem:[#allocation30_spill] sm:$0xff] %v14577_v46  ;;  %v14580_v40 = vadd.f32 %v6764_v10, %v14484_v43 }
 0x6a8   :  { %v9920_v7 = vpop.f32.mrf.mxu1 }
 0x6a9   :  { %15143 = vst [vmem:[#allocation32_spill] sm:$0xff] %v14580_v40  ;;  %v14583_v28 = vadd.f32 %v9920_v7, %v14487_v50  ;;  %v14635_v40 = vpop.permute.xlu0 %7366 }
 0x6aa   :  { %v6774_v4 = vpop.f32.mrf.mxu1 }
 0x6ab   :  { %15144 = vst [vmem:[#allocation68_spill] sm:$0xff] %v14583_v28  ;;  %v14586_v47 = vadd.f32 %v6774_v4, %v14490_v36 }
 0x6ac   :  { %v9955_v35 = vpop.f32.mrf.mxu1 }
 0x6ad   :  { %15145 = vst [vmem:[#allocation71_spill] sm:$0xff] %v14586_v47  ;;  %v7058_v47 = vadd.f32 %v9955_v35, %v14493_v48 }
 0x6ae   :  { %v6898_v58 = vpop.f32.mrf.mxu1 }
 0x6af   :  { %v7057_v46 = vadd.f32 %v6898_v58, %v14496_v18 }
 0x6b0   :  { %v9958_v39 = vpop.f32.mrf.mxu1 }
 0x6b2   :  { %v6908_v6 = vpop.f32.mrf.mxu1 }
 0x6b4   :  { %v9961_v9 = vpop.f32.mrf.mxu1 }
 0x6b5   :  { %v7062_v18 = vadd.f32 %v9961_v9, %v14505_v62 }
 0x6b6   :  { %v6918_v12 = vpop.f32.mrf.mxu1 }
 0x6b8   :  { %v9964_v8 = vpop.f32.mrf.mxu1 }
 0x6b9   :  { %v7064_v62 = vadd.f32 %v9964_v8, %v14511_v61 }
 0x6ba   :  { %v6928_v49 = vpop.f32.mrf.mxu1 }
 0x6bc   :  { %v9967_v2 = vpop.f32.mrf.mxu1 }
 0x6bd   :  { %v7066_v61 = vadd.f32 %v9967_v2, %v14517_v32 }
 0x6be   :  { %v14588_v17 = vpop.f32.mrf.mxu1 }
 0x6c0   :  { %v14590_v43 = vpop.f32.mrf.mxu1 }
 0x6c1   :  { %v7068_v32 = vadd.f32 %v14590_v43, %v14523_v34 }
 0x6c2   :  { %v14592_v42 = vpop.f32.mrf.mxu1 }
 0x6c4   :  { %v14594_v50 = vpop.f32.mrf.mxu1 }
 0x6c5   :  { %v7070_v34 = vadd.f32 %v14594_v50, %v14529_v51 }
 0x6c6   :  { %v14596_v45 = vpop.f32.mrf.mxu1 }
 0x6c8   :  { %v14598_v36 = vpop.f32.mrf.mxu1 }
 0x6c9   :  { %v7072_v51 = vadd.f32 %v14598_v36, %v14535_v27 }
 0x6ca   :  { %v14600_v23 = vpop.f32.mrf.mxu1 }
 0x6cc   :  { %v14602_v21 = vpop.f32.mrf.mxu1 }
 0x6cd   :  { %v7074_v27 = vadd.f32 %v14602_v21, %v14541_v24 }
 0x6ce   :  { %v14604_v60 = vpop.f32.mrf.mxu1 }
 0x6d0   :  { %v14606_v44 = vpop.f32.mrf.mxu1 }
 0x6d1   :  { %v7076_v24 = vadd.f32 %v14606_v44, %v14547_v33 }
 0x6d2   :  { %v14608_v55 = vpop.f32.mrf.mxu1 }
 0x6d4   :  { %v14610_v22 = vpop.f32.mrf.mxu1 }
 0x6d5   :  { %v7078_v33 = vadd.f32 %v14610_v22, %v14553_v38 }
 0x6d6   :  { %v14612_v25 = vpop.f32.mrf.mxu1 }
 0x6d8   :  { %v14614_v31 = vpop.f32.mrf.mxu1 }
 0x6d9   :  { %v7080_v38 = vadd.f32 %v14614_v31, %v14559_v57 }
 0x6da   :  { %v14616_v11 = vpop.f32.mrf.mxu1 }
 0x6dc   :  { %v14618_v14 = vpop.f32.mrf.mxu1 }
 0x6dd   :  { %v7082_v57 = vadd.f32 %v14618_v14, %v14565_v53  ;;  %v15153_v53 = vld [vmem:[#allocation4_spill] sm:$0xff] }
 0x6de   :  { %v14620_v20 = vpop.f32.mrf.mxu1 }
 0x6df   :  { %15146 = vst [vmem:[#allocation65_spill] sm:$0xff] %v14620_v20 }
 0x6e0   :  { %v14622_v63 = vpop.f32.mrf.mxu1 }
 0x6e1   :  { %15147 = vst [vmem:[#allocation101_spill] sm:$0xff] %v14622_v63  ;;  %v7060_v63 = vadd.f32 %v9958_v39, %v14499_v26 }
 0x6e2   :  { %v14624_v29 = vpop.f32.mrf.mxu1 }
 0x6e3   :  { %15148 = vst [vmem:[#allocation15_spill] sm:$0xff] %v14624_v29 }
 0x6e4   :  { %v14626_v30 = vpop.f32.mrf.mxu1 }
 0x6e5   :  { %15149 = vst [vmem:[#allocation24_spill] sm:$0xff] %v14626_v30 }
 0x6e6   :  { %v14628_v10 = vpop.f32.mrf.mxu1 }
 0x6e7   :  { %15150 = vst [vmem:[#allocation44_spill] sm:$0xff] %v14628_v10  ;;  %v7059_v10 = vadd.f32 %v6908_v6, %v14502_v15  ;;  %v7061_v15 = vadd.f32 %v6918_v12, %v14508_v41  ;;  %v7063_v41 = vadd.f32 %v6928_v49, %v14514_v19  ;;  %v7065_v19 = vadd.f32 %v14588_v17, %v14520_v56 }
 0x6e8   :  { %v14630_v7 = vpop.f32.mrf.mxu1  ;;  %v7067_v56 = vadd.f32 %v14592_v42, %v14526_v1  ;;  %v7069_v1 = vadd.f32 %v14596_v45, %v14532_v16  ;;  %v7071_v16 = vadd.f32 %v14600_v23, %v14538_v5  ;;  %v7073_v5 = vadd.f32 %v14604_v60, %v14544_v37  ;;  %v15154_v14 = vld [vmem:[#allocation101_spill] sm:$0xff] }
 0x6e9   :  { %v7075_v37 = vadd.f32 %v14608_v55, %v14550_v59  ;;  %v7077_v59 = vadd.f32 %v14612_v25, %v14556_v0  ;;  %v7079_v0 = vadd.f32 %v14616_v11, %v14562_v52  ;;  %v15152_v52 = vld [vmem:[#allocation65_spill] sm:$0xff] }
 0x6ea   :  { %v14632_v4 = vpop.f32.mrf.mxu1  ;;  %v7081_v11 = vadd.f32 %v15152_v52, %v14568_v54  ;;  %v15155_v54 = vld [vmem:[#allocation6_spill] sm:$0xff] }
 0x6eb   :  { %15151 = vst [vmem:[#allocation58_spill] sm:$0xff] %v14632_v4 }
 0x6ec   :  { %v10035_v28 = vpop.f32.mrf.mxu1 }
 0x6ed   :  { %v7332_v13 = vadd.f32 %v10035_v28, %v7058_v47 }
 0x6ee   :  { %v7172_v3 = vpop.f32.mrf.mxu1 }
 0x6ef   :  { %v7370_v29 = vadd.f32 %v14635_v40, %v7332_v13  ;;  %v7331_v30 = vadd.f32 %v7172_v3, %v7057_v46 }
 0x6f0   :  { %v10038_v20 = vpop.f32.mrf.mxu1 }
 0x6f1   :  { %7402 = vst [vmem:[%s14823_s4 + $0x8] sm:$0xff] %v7370_v29  ;;  %v7369_v48 = vadd.f32 %v14635_v40, %v7331_v30  ;;  %v7334_v35 = vadd.f32 %v10038_v20, %v7060_v63 }
 0x6f2   :  { %v7182_v4 = vpop.f32.mrf.mxu1 }
 0x6f3   :  { %7401 = vst [vmem:[%s14823_s4] sm:$0xff] %v7369_v48  ;;  %v7372_v26 = vadd.f32 %v14635_v40, %v7334_v35  ;;  %v7333_v3 = vadd.f32 %v7182_v4, %v7059_v10 }
 0x6f4   :  { %v10041_v13 = vpop.f32.mrf.mxu1 }
 0x6f5   :  { %7404 = vst [vmem:[%s14823_s4 + $0x18] sm:$0xff] %v7372_v26  ;;  %v7371_v46 = vadd.f32 %v14635_v40, %v7333_v3  ;;  %v7336_v28 = vadd.f32 %v10041_v13, %v7062_v18 }
 0x6f6   :  { %v7192_v47 = vpop.f32.mrf.mxu1 }
 0x6f7   :  { %7403 = vst [vmem:[%s14823_s4 + $0x10] sm:$0xff] %v7371_v46  ;;  %v7374_v58 = vadd.f32 %v14635_v40, %v7336_v28  ;;  %v7335_v39 = vadd.f32 %v7192_v47, %v7061_v15 }
 0x6f8   :  { %v10044_v6 = vpop.f32.mrf.mxu1 }
 0x6f9   :  { %7406 = vst [vmem:[%s14823_s4 + $0x28] sm:$0xff] %v7374_v58  ;;  %v7373_v9 = vadd.f32 %v14635_v40, %v7335_v39  ;;  %v7338_v12 = vadd.f32 %v10044_v6, %v7064_v62 }
 0x6fa   :  { %v7202_v20 = vpop.f32.mrf.mxu1 }
 0x6fb   :  { %7405 = vst [vmem:[%s14823_s4 + $0x20] sm:$0xff] %v7373_v9  ;;  %v7376_v8 = vadd.f32 %v14635_v40, %v7338_v12  ;;  %v7337_v63 = vadd.f32 %v7202_v20, %v7063_v41 }
 0x6fc   :  { %v10047_v29 = vpop.f32.mrf.mxu1 }
 0x6fd   :  { %7408 = vst [vmem:[%s14823_s4 + $0x38] sm:$0xff] %v7376_v8  ;;  %v7375_v49 = vadd.f32 %v14635_v40, %v7337_v63  ;;  %v7340_v30 = vadd.f32 %v10047_v29, %v7066_v61 }
 0x6fe   :  { %v7212_v10 = vpop.f32.mrf.mxu1 }
 0x6ff   :  { %7407 = vst [vmem:[%s14823_s4 + $0x30] sm:$0xff] %v7375_v49  ;;  %v7378_v2 = vadd.f32 %v14635_v40, %v7340_v30  ;;  %v7339_v4 = vadd.f32 %v7212_v10, %v7065_v19 }
 0x700   :  { %v10050_v48 = vpop.f32.mrf.mxu1 }
 0x701   :  { %7410 = vst [vmem:[%s14823_s4 + $0x48] sm:$0xff] %v7378_v2  ;;  %v7377_v17 = vadd.f32 %v14635_v40, %v7339_v4  ;;  %v7342_v35 = vadd.f32 %v10050_v48, %v7068_v32 }
 0x702   :  { %v7222_v18 = vpop.f32.mrf.mxu1 }
 0x703   :  { %7409 = vst [vmem:[%s14823_s4 + $0x40] sm:$0xff] %v7377_v17  ;;  %v7380_v43 = vadd.f32 %v14635_v40, %v7342_v35  ;;  %v7341_v26 = vadd.f32 %v7222_v18, %v7067_v56  ;;  %v7084_v35 = vadd.f32 %v15154_v14, %v15153_v53 }
 0x704   :  { %v10053_v3 = vpop.f32.mrf.mxu1 }
 0x705   :  { %7412 = vst [vmem:[%s14823_s4 + $0x58] sm:$0xff] %v7380_v43  ;;  %v7379_v42 = vadd.f32 %v14635_v40, %v7341_v26  ;;  %v7344_v13 = vadd.f32 %v10053_v3, %v7070_v34  ;;  %v15156_v26 = vld [vmem:[#allocation15_spill] sm:$0xff] }
 0x706   :  { %v7232_v15 = vpop.f32.mrf.mxu1  ;;  %v7083_v3 = vadd.f32 %v15156_v26, %v15155_v54 }
 0x707   :  { %7411 = vst [vmem:[%s14823_s4 + $0x50] sm:$0xff] %v7379_v42  ;;  %v7382_v50 = vadd.f32 %v14635_v40, %v7344_v13  ;;  %v7343_v46 = vadd.f32 %v7232_v15, %v7069_v1  ;;  %v15157_v15 = vld [vmem:[#allocation30_spill] sm:$0xff] }
 0x708   :  { %v10056_v28 = vpop.f32.mrf.mxu1 }
 0x709   :  { %7414 = vst [vmem:[%s14823_s4 + $0x68] sm:$0xff] %v7382_v50  ;;  %v7381_v45 = vadd.f32 %v14635_v40, %v7343_v46  ;;  %v7346_v47 = vadd.f32 %v10056_v28, %v7072_v51  ;;  %v15158_v51 = vld [vmem:[#allocation24_spill] sm:$0xff] }
 0x70a   :  { %v7242_v62 = vpop.f32.mrf.mxu1  ;;  %v7086_v50 = vadd.f32 %v15158_v51, %v15157_v15 }
 0x70b   :  { %7413 = vst [vmem:[%s14823_s4 + $0x60] sm:$0xff] %v7381_v45  ;;  %v7384_v36 = vadd.f32 %v14635_v40, %v7346_v47  ;;  %v7345_v58 = vadd.f32 %v7242_v62, %v7071_v16  ;;  %v15159_v45 = vld [vmem:[#allocation32_spill] sm:$0xff] }
 0x70c   :  { %v10059_v39 = vpop.f32.mrf.mxu1  ;;  %v15160_v47 = vld [vmem:[#allocation44_spill] sm:$0xff] }
 0x70d   :  { %7416 = vst [vmem:[%s14823_s4 + $0x78] sm:$0xff] %v7384_v36  ;;  %v7383_v23 = vadd.f32 %v14635_v40, %v7345_v58  ;;  %v7348_v6 = vadd.f32 %v10059_v39, %v7074_v27  ;;  %v7085_v62 = vadd.f32 %v15160_v47, %v15159_v45  ;;  %v15161_v39 = vld [vmem:[#allocation68_spill] sm:$0xff] }
 0x70e   :  { %v7252_v41 = vpop.f32.mrf.mxu1 }
 0x70f   :  { %7415 = vst [vmem:[%s14823_s4 + $0x70] sm:$0xff] %v7383_v23  ;;  %v7386_v21 = vadd.f32 %v14635_v40, %v7348_v6  ;;  %v7347_v9 = vadd.f32 %v7252_v41, %v7073_v5  ;;  %v7088_v5 = vadd.f32 %v14630_v7, %v15161_v39 }
 0x710   :  { %v10062_v12 = vpop.f32.mrf.mxu1 }
 0x711   :  { %7418 = vst [vmem:[%s14823_s4 + $0x88] sm:$0xff] %v7386_v21  ;;  %v7385_v60 = vadd.f32 %v14635_v40, %v7347_v9  ;;  %v7350_v20 = vadd.f32 %v10062_v12, %v7076_v24  ;;  %v15162_v24 = vld [vmem:[#allocation71_spill] sm:$0xff]  ;;  %v15163_v21 = vld [vmem:[#allocation58_spill] sm:$0xff] }
 0x712   :  { %v7262_v61 = vpop.f32.mrf.mxu1  ;;  %v7087_v9 = vadd.f32 %v15163_v21, %v15162_v24 }
 0x713   :  { %7417 = vst [vmem:[%s14823_s4 + $0x80] sm:$0xff] %v7385_v60  ;;  %v7388_v44 = vadd.f32 %v14635_v40, %v7350_v20  ;;  %v7349_v8 = vadd.f32 %v7262_v61, %v7075_v37 }
 0x714   :  { %v10065_v63 = vpop.f32.mrf.mxu1 }
 0x715   :  { %7420 = vst [vmem:[%s14823_s4 + $0x98] sm:$0xff] %v7388_v44  ;;  %v7387_v55 = vadd.f32 %v14635_v40, %v7349_v8  ;;  %v7352_v29 = vadd.f32 %v10065_v63, %v7078_v33 }
 0x716   :  { %v7272_v19 = vpop.f32.mrf.mxu1 }
 0x717   :  { %7419 = vst [vmem:[%s14823_s4 + $0x90] sm:$0xff] %v7387_v55  ;;  %v7390_v22 = vadd.f32 %v14635_v40, %v7352_v29  ;;  %v7351_v49 = vadd.f32 %v7272_v19, %v7077_v59 }
 0x718   :  { %v10068_v30 = vpop.f32.mrf.mxu1 }
 0x719   :  { %7422 = vst [vmem:[%s14823_s4 + $0xa8] sm:$0xff] %v7390_v22  ;;  %v7389_v25 = vadd.f32 %v14635_v40, %v7351_v49  ;;  %v7354_v10 = vadd.f32 %v10068_v30, %v7080_v38 }
 0x71a   :  { %v7282_v32 = vpop.f32.mrf.mxu1 }
 0x71b   :  { %7421 = vst [vmem:[%s14823_s4 + $0xa0] sm:$0xff] %v7389_v25  ;;  %v7392_v31 = vadd.f32 %v14635_v40, %v7354_v10  ;;  %v7353_v2 = vadd.f32 %v7282_v32, %v7079_v0 }
 0x71c   :  { %v10071_v4 = vpop.f32.mrf.mxu1 }
 0x71d   :  { %7424 = vst [vmem:[%s14823_s4 + $0xb8] sm:$0xff] %v7392_v31  ;;  %v7391_v48 = vadd.f32 %v14635_v40, %v7353_v2  ;;  %v7356_v56 = vadd.f32 %v10071_v4, %v7082_v57 }
 0x71e   :  { %v7292_v17 = vpop.f32.mrf.mxu1 }
 0x71f   :  { %7423 = vst [vmem:[%s14823_s4 + $0xb0] sm:$0xff] %v7391_v48  ;;  %v7394_v18 = vadd.f32 %v14635_v40, %v7356_v56  ;;  %v7355_v34 = vadd.f32 %v7292_v17, %v7081_v11 }
 0x720   :  { %v10074_v43 = vpop.f32.mrf.mxu1 }
 0x721   :  { %7426 = vst [vmem:[%s14823_s4 + $0xc8] sm:$0xff] %v7394_v18  ;;  %v7393_v1 = vadd.f32 %v14635_v40, %v7355_v34  ;;  %v7358_v42 = vadd.f32 %v10074_v43, %v7084_v35 }
 0x722   :  { %v7302_v13 = vpop.f32.mrf.mxu1 }
 0x723   :  { %7425 = vst [vmem:[%s14823_s4 + $0xc0] sm:$0xff] %v7393_v1  ;;  %v7396_v46 = vadd.f32 %v14635_v40, %v7358_v42  ;;  %v7357_v28 = vadd.f32 %v7302_v13, %v7083_v3 }
 0x724   :  { %v10077_v16 = vpop.f32.mrf.mxu1 }
 0x725   :  { %7428 = vst [vmem:[%s14823_s4 + $0xd8] sm:$0xff] %v7396_v46  ;;  %v7395_v27 = vadd.f32 %v14635_v40, %v7357_v28  ;;  %v7360_v36 = vadd.f32 %v10077_v16, %v7086_v50 }
 0x726   :  { %v7312_v58 = vpop.f32.mrf.mxu1 }
 0x727   :  { %7427 = vst [vmem:[%s14823_s4 + $0xd0] sm:$0xff] %v7395_v27  ;;  %v7398_v23 = vadd.f32 %v14635_v40, %v7360_v36  ;;  %v7359_v6 = vadd.f32 %v7312_v58, %v7085_v62 }
 0x728   :  { %v10080_v41 = vpop.f32.mrf.mxu1 }
 0x729   :  { %7430 = vst [vmem:[%s14823_s4 + $0xe8] sm:$0xff] %v7398_v23  ;;  %v7397_v12 = vadd.f32 %v14635_v40, %v7359_v6  ;;  %v7362_v37 = vadd.f32 %v10080_v41, %v7088_v5 }
 0x72a   :  { %v7322_v60 = vpop.f32.mrf.mxu1 }
 0x72b   :  { %7429 = vst [vmem:[%s14823_s4 + $0xe0] sm:$0xff] %v7397_v12  ;;  %v7400_v7 = vadd.f32 %v14635_v40, %v7362_v37  ;;  %v7361_v20 = vadd.f32 %v7322_v60, %v7087_v9 }
 0x72d   :  { %7432 = vst [vmem:[%s14823_s4 + $0xf8] sm:$0xff] %v7400_v7  ;;  %v7399_v61 = vadd.f32 %v14635_v40, %v7361_v20 }
 0x72f   :  { %7431 = vst [vmem:[%s14823_s4 + $0xf0] sm:$0xff] %v7399_v61 }

</bundles_post_ra>
